<compile_context>
chip_gen: v6e
topology: v6e:2x2x1
jax: 0.10.0
libtpu: 0.0.40
codegen_flags: <defaults>
</compile_context>

<pallas_src>
import numpy as np
import jax
import jax.numpy as jnp
from jax.experimental import pallas as pl
from jax.experimental.pallas import tpu as pltpu

# ---------------- configuration (small, consistent with the module) ----------
B = 2                                  # batch
S = 16                                 # sequence length
EMB_DIM = 32                           # emb_dim
MLP_DIM = 64                           # mlp_dims = [64]
NUM_EXPERT = 5
DOMAIN_NUM = 3
VOCAB = 100
FEATURE_KERNELS = (1, 2, 3, 5, 10)     # feature_kernel = {1:64,2:64,3:64,5:64,10:64}
NKER = len(FEATURE_KERNELS)            # 5
KCHAN = 64
KMAX = max(FEATURE_KERNELS)            # 10
SHARED_DIM = NKER * KCHAN              # 320 (shared_feature width)

# ---- packed big weight slab (bf16) layout ----
EXP_W = 384                            # per-expert column block (320 conv + 64 zero pad) = 3*128
NTOT2 = NUM_EXPERT * EXP_W             # 1920 conv columns
CLS1_W = 128                           # classifier layer-1 padded N (64 real + 64 zero)
N_TOTAL = NTOT2 + CLS1_W               # 2048 total columns
K_IM2COL = KMAX * EMB_DIM              # 320 im2col rows (tap-major)
ONES_ROW = K_IM2COL                    # 320: ones column -> folded conv biases
MASK_ROW0 = ONES_ROW + 1               # 321..325: -1e30 validity-mask rows (one per kernel size)
K_PAD = 384                            # padded contraction dim = 3*128
MASK_NEG = -1e30
OUT_W = EXP_W + 128                    # 512 output slab width (4*128)

# ---- small f32 slab layout (lane-dense, 128 cols; sections start on 8-row boundaries) ----
WS_COLS = 128
DL_ROWS = 8
DL_R = 0        # rows 0..B-1 : [domain_emb (32) | label (col 32)]
GW1_R = 8       # gate_w1   (32, 64)
GB1_R = 40      # gate_b1   (1, 64)
GW2_R = 48      # gate_w2   (64, 5)
GB2_R = 112     # gate_b2   (1, 5)
CB1_R = 120     # cls_b1    (1, 64)  (cols 64..127 stay zero -> used as padded 128-wide bias)
CW2_R = 128     # cls_w2    (64, 2)  stored in a 128-row section (rows 64..127 zero)
CB2_R = 256     # cls_b2    (1, 2)
C1W_R = 264     # cls1_w    stored transposed as a (1, 2) row
C1B_R = 272     # cls1_b    (1, 1)
WS_ROWS = 280


# ---------------------------- Pallas kernel ----------------------------------
def mdfend_kernel(lhs_ref, wbig_ref, ws_ref, out_ref):
    # ---- gate: Linear -> ReLU -> Linear -> Softmax(dim=1), all in f32 ----
    dl = ws_ref[DL_R:DL_R + B, :]                        # (B, 128)
    dom = dl[:, :EMB_DIM]                                # (B, 32)
    label = dl[:, EMB_DIM:EMB_DIM + 1]                   # (B, 1)
    gw1 = ws_ref[GW1_R:GW1_R + EMB_DIM, :MLP_DIM]
    gb1 = ws_ref[GB1_R:GB1_R + 1, :MLP_DIM]
    gw2 = ws_ref[GW2_R:GW2_R + MLP_DIM, :NUM_EXPERT]
    gb2 = ws_ref[GB2_R:GB2_R + 1, :NUM_EXPERT]
    g = jnp.maximum(jnp.dot(dom, gw1, preferred_element_type=jnp.float32) + gb1, 0.0)
    g = jnp.dot(g, gw2, preferred_element_type=jnp.float32) + gb2
    g = jnp.exp(g - jnp.max(g, axis=1, keepdims=True))
    gate = g * pl.reciprocal(jnp.sum(g, axis=1, keepdims=True), approx=True)   # (B, 5)

    # ---- fused MoE CNN extractor: ONE bf16 MXU matmul (biases + validity mask folded in) ----
    conv = jnp.dot(lhs_ref[...], wbig_ref[:, :NTOT2],
                   preferred_element_type=jnp.float32)                          # (B*S, 1920)
    # max-pool over time per batch row block (invalid positions are already -1e30)
    feats = [jnp.max(conv[b * S:(b + 1) * S, :], axis=0, keepdims=True) for b in range(B)]
    feat = jnp.concatenate(feats, axis=0)                                       # (B, 1920)

    # ---- gate-weighted mixture over experts (128-lane-aligned 384-wide blocks) ----
    shared = feat[:, 0:EXP_W] * gate[:, 0:1]
    for e in range(1, NUM_EXPERT):
        shared = shared + feat[:, e * EXP_W:(e + 1) * EXP_W] * gate[:, e:e + 1]  # (B, 384)
    # cols 320..383 of `shared` are zero (zero-padded weight columns).

    # ---- classifier: Linear(320->64) + f32 bias + ReLU (dropout==identity), Linear(64->2) ----
    cb1 = ws_ref[CB1_R:CB1_R + 1, :]                      # (1, 128), cols 64.. are 0
    h = jnp.dot(shared.astype(jnp.bfloat16), wbig_ref[:, NTOT2:NTOT2 + CLS1_W],
                preferred_element_type=jnp.float32) + cb1                       # (B, 128)
    h = jnp.maximum(h, 0.0)                               # cols 64..127 stay 0
    cw2 = ws_ref[CW2_R:CW2_R + CLS1_W, :2]                # (128, 2), rows 64.. are 0
    cb2 = ws_ref[CB2_R:CB2_R + 1, :2]
    logits = jnp.dot(h, cw2, preferred_element_type=jnp.float32) + cb2          # (B, 2)

    # ---- classifier1: Linear(2,1) -> sigmoid -> BCE loss (mean) ----
    c1w = ws_ref[C1W_R:C1W_R + 1, :2]                     # (1, 2): transposed weight row
    c1b = ws_ref[C1B_R:C1B_R + 1, :1]                     # (1, 1)
    z = jnp.sum(logits * c1w, axis=1, keepdims=True) + c1b                      # (B, 1)
    p = 1.0 / (1.0 + jnp.exp(-z))                         # exact reciprocal (feeds log)
    eps = 1e-12
    bce = -(label * jnp.log(p + eps) + (1.0 - label) * jnp.log(1.0 - p + eps))  # (B, 1)
    loss = jnp.sum(bce, axis=0, keepdims=True) * (1.0 / B)                      # (1, 1)

    # ---- two lane-aligned stores into the (B, 512) output slab ----
    out_ref[:, :EXP_W] = shared
    out_ref[:, EXP_W:] = jnp.concatenate(
        [logits, p, jnp.broadcast_to(loss, (B, 1)),
         jnp.zeros((B, 128 - 4), jnp.float32)], axis=1)


# ------------------------------ wrapper ---------------------------------------
def _full_spec(shape):
    nd = len(shape)
    return pl.BlockSpec(tuple(shape), lambda i, nd=nd: (0,) * nd)


def _build_im2col_lhs(x):
    """(B,S,E) f32 -> lane-dense (B*S, 384) bf16 im2col slab with ones + mask columns."""
    xp = jnp.concatenate([x, jnp.zeros((B, KMAX - 1, EMB_DIM), jnp.float32)], axis=1)
    taps = [xp[:, j:j + S, :] for j in range(KMAX)]                      # 10 x (B,S,E)
    ones = jnp.ones((B, S, 1), jnp.float32)                              # folded conv bias col
    t = jnp.arange(S)[:, None]
    ks = jnp.asarray(FEATURE_KERNELS, jnp.int32)[None, :]
    mask = (t + ks > S).astype(jnp.float32)                              # (S, 5) invalid flags
    mask = jnp.broadcast_to(mask[None], (B, S, NKER))
    pad = jnp.zeros((B, S, K_PAD - (K_IM2COL + 1 + NKER)), jnp.float32)  # 58 zero cols
    lhs = jnp.concatenate(taps + [ones, mask, pad], axis=2)              # (B, S, 384)
    return lhs.reshape(B * S, K_PAD).astype(jnp.bfloat16)


@jax.jit
def mdfend_forward(init_feature, dom_emb, label, wbig, ws_static):
    """init_feature (B,S,E); dom_emb (B,E); label (B,) -> logits, output, shared, loss."""
    lhs = _build_im2col_lhs(init_feature.astype(jnp.float32))            # (B*S, 384) bf16

    # fold [domain_emb | label] into the small f32 param slab (one DMA for all f32 scalars)
    dl_block = jnp.zeros((DL_ROWS, WS_COLS), jnp.float32)
    dl_block = dl_block.at[:B, :EMB_DIM].set(dom_emb.astype(jnp.float32))
    dl_block = dl_block.at[:B, EMB_DIM].set(label.astype(jnp.float32))
    wsmall = jnp.concatenate([dl_block, ws_static], axis=0)              # (280, 128)

    slab = pl.pallas_call(
        mdfend_kernel,
        grid=(1,),
        in_specs=[_full_spec((B * S, K_PAD)),
                  _full_spec((K_PAD, N_TOTAL)),
                  _full_spec((WS_ROWS, WS_COLS))],
        out_specs=_full_spec((B, OUT_W)),
        out_shape=jax.ShapeDtypeStruct((B, OUT_W), jnp.float32),
        compiler_params=pltpu.CompilerParams(dimension_semantics=("arbitrary",)),
    )(lhs, wbig, wsmall)

    shared = slab[:, :SHARED_DIM]
    logits = slab[:, EXP_W:EXP_W + 2]
    output = slab[:, EXP_W + 2]
    loss = slab[0, EXP_W + 3]
    return logits, output, shared, loss


# --------------------------- parameter init / packing --------------------------
def init_params(key):
    ks = list(jax.random.split(key, 64))
    it = iter(ks)

    def nrm(shape, scale=0.1):
        return (scale * jax.random.normal(next(it), shape)).astype(jnp.float32)

    p = {}
    # MaskAttention / SelfAttentionFeatureExtract params are dead in forward() -> omitted.
    p['gate_w1'] = nrm((EMB_DIM, MLP_DIM)); p['gate_b1'] = nrm((1, MLP_DIM))
    p['gate_w2'] = nrm((MLP_DIM, NUM_EXPERT)); p['gate_b2'] = nrm((1, NUM_EXPERT))
    for k in FEATURE_KERNELS:
        p[f'conv_w{k}'] = nrm((NUM_EXPERT, k, EMB_DIM, KCHAN))
        p[f'conv_b{k}'] = nrm((NUM_EXPERT, 1, KCHAN))
    p['cls_w1'] = nrm((SHARED_DIM, MLP_DIM)); p['cls_b1'] = nrm((1, MLP_DIM))
    p['cls_w2'] = nrm((MLP_DIM, 2)); p['cls_b2'] = nrm((1, 2))
    p['cls1_w'] = nrm((2, 1)); p['cls1_b'] = nrm((1, 1))
    return p


def pack_params(p):
    """Host-side layout plumbing: one bf16 weight slab + one lane-dense f32 slab (static part)."""
    # big bf16 slab (K_PAD=384 rows x N_TOTAL=2048 cols):
    #   rows: [im2col taps (320) | ones/bias row | 5 mask rows (-1e30) | zero pad]
    #   cols: [5 experts x 384 (320 conv + 64 pad) | classifier layer-1 (128, rows 0..319=cls_w1)]
    wbig = np.zeros((K_PAD, N_TOTAL), np.float32)
    for ki, k in enumerate(FEATURE_KERNELS):
        w = np.asarray(p[f'conv_w{k}'], np.float32)      # (NE, k, E, 64)
        b = np.asarray(p[f'conv_b{k}'], np.float32)      # (NE, 1, 64)
        for e in range(NUM_EXPERT):
            c0 = e * EXP_W + ki * KCHAN
            wbig[:k * EMB_DIM, c0:c0 + KCHAN] = w[e].reshape(k * EMB_DIM, KCHAN)
            wbig[ONES_ROW:ONES_ROW + 1, c0:c0 + KCHAN] = b[e]          # folded conv bias
            wbig[MASK_ROW0 + ki:MASK_ROW0 + ki + 1, c0:c0 + KCHAN] = MASK_NEG
    wbig[:SHARED_DIM, NTOT2:NTOT2 + MLP_DIM] = np.asarray(p['cls_w1'], np.float32)
    wbig_bf16 = jnp.asarray(wbig, dtype=jnp.bfloat16)

    # small f32 slab (static parameter part; rows DL_ROWS..WS_ROWS-1 of the full slab)
    ws = np.zeros((WS_ROWS - DL_ROWS, WS_COLS), np.float32)

    def put(row, arr):                                    # 2-D slice assignment only
        a = np.asarray(arr, np.float32)
        if a.ndim == 1:
            a = a.reshape(1, -1)
        r = row - DL_ROWS
        ws[r:r + a.shape[0], :a.shape[1]] = a

    put(GW1_R, p['gate_w1'])
    put(GB1_R, p['gate_b1'])
    put(GW2_R, p['gate_w2'])
    put(GB2_R, p['gate_b2'])
    put(CB1_R, p['cls_b1'])
    put(CW2_R, p['cls_w2'])                               # rows CW2_R+64..+127 stay zero
    put(CB2_R, p['cls_b2'])
    put(C1W_R, np.asarray(p['cls1_w'], np.float32).reshape(1, 2))   # stored transposed
    put(C1B_R, p['cls1_b'])
    return {'wbig': wbig_bf16, 'ws_static': jnp.asarray(ws)}


# --------------------------- pure-JAX reference (f32, module semantics) --------
def reference_forward(x, dom, label, p):
    g = jax.nn.relu(dom @ p['gate_w1'] + p['gate_b1'])
    g = g @ p['gate_w2'] + p['gate_b2']
    gate = jax.nn.softmax(g, axis=1)
    bsz, seq, _ = x.shape
    shared = jnp.zeros((bsz, SHARED_DIM), jnp.float32)
    for i in range(NUM_EXPERT):
        feats = []
        for k in FEATURE_KERNELS:
            w = p[f'conv_w{k}'][i]; b = p[f'conv_b{k}'][i]
            L = seq - k + 1
            acc = sum(x[:, j:j + L, :] @ w[j] for j in range(k))
            feats.append(jnp.max(acc, axis=1) + b)
        shared = shared + jnp.concatenate(feats, axis=1) * gate[:, i:i + 1]
    h = jax.nn.relu(shared @ p['cls_w1'] + p['cls_b1'])
    logits = h @ p['cls_w2'] + p['cls_b2']
    z = logits @ p['cls1_w'] + p['cls1_b']
    pr = jax.nn.sigmoid(z)[:, 0]
    eps = 1e-12
    loss = jnp.mean(-(label * jnp.log(pr + eps) + (1.0 - label) * jnp.log(1.0 - pr + eps)))
    return logits, pr, shared, loss


# ------------------------------------ main --------------------------------------
if __name__ == "__main__":
    key = jax.random.PRNGKey(0)
    k_tok, k_emb, k_dom, k_par = jax.random.split(key, 4)

    # kwargs of the original forward
    content = jax.random.randint(k_tok, (B, S), 0, VOCAB)          # token ids
    content_masks = jnp.ones((B, S), jnp.float32)                  # attention masks (all valid)
    category = jnp.array([0, 2], jnp.int32)                        # domain ids
    label = jnp.array([1.0, 0.0], jnp.float32)

    # frozen BERT replaced by a deterministic embedding lookup (glue in plain JAX)
    token_table = (0.1 * jax.random.normal(k_emb, (VOCAB, EMB_DIM))).astype(jnp.float32)
    init_feature = token_table[content]                            # (B, S, E)

    # domain_embedder(idxs).squeeze(1) (embedding gather is glue in plain JAX)
    domain_table = (0.1 * jax.random.normal(k_dom, (DOMAIN_NUM, EMB_DIM))).astype(jnp.float32)
    dom_emb = domain_table[category]                               # (B, E)

    params = init_params(k_par)
    packed = pack_params(params)                                   # host-side packing, done once

    outs = mdfend_forward(init_feature, dom_emb, label, packed['wbig'], packed['ws_static'])
    outs = jax.block_until_ready(outs)
    logits, output, shared, loss = outs

    r_logits, r_output, r_shared, r_loss = reference_forward(init_feature, dom_emb, label, params)
    # tolerances account for bf16 MXU inputs / approx reciprocal (f32 accumulation throughout)
    RT, AT = 2e-2, 1e-2
    assert jnp.allclose(logits, r_logits, rtol=RT, atol=AT), "logits mismatch"
    assert jnp.allclose(output, r_output, rtol=RT, atol=AT), "output mismatch"
    assert jnp.allclose(shared, r_shared, rtol=RT, atol=AT), "shared_feature mismatch"
    assert jnp.allclose(loss, r_loss, rtol=RT, atol=AT), "loss mismatch"

    print("KERNEL_OK")
</pallas_src>

<mosaic_0001>
module attributes {stable_mosaic.version = 11 : i64} {
  func.func @mdfend_kernel(%arg0: i32, %arg1: memref<32x384xbf16, #tpu.memory_space<vmem>>, %arg2: memref<384x2048xbf16, #tpu.memory_space<vmem>>, %arg3: memref<280x128xf32, #tpu.memory_space<vmem>>, %arg4: memref<2x512xf32, #tpu.memory_space<vmem>>) attributes {dimension_semantics = [#tpu.dimension_semantics<arbitrary>], iteration_bounds = array<i64: 1>, scalar_prefetch = 0 : i64, scratch_operands = 0 : i64, tpu.core_type = #tpu.core_type<tc>, window_params = [{pipeline_mode = #tpu.pipeline_mode<synchronous>, transform_indices = @transform_0, window_bounds = array<i64: 32, 384>}, {pipeline_mode = #tpu.pipeline_mode<synchronous>, transform_indices = @transform_1, window_bounds = array<i64: 384, 2048>}, {pipeline_mode = #tpu.pipeline_mode<synchronous>, transform_indices = @transform_2, window_bounds = array<i64: 280, 128>}, {pipeline_mode = #tpu.pipeline_mode<synchronous>, transform_indices = @transform_3, window_bounds = array<i64: 2, 512>}]} {
    %c0 = arith.constant 0 : index
    %c0_0 = arith.constant 0 : index
    %0 = vector.load %arg3[%c0, %c0_0] : memref<280x128xf32, #tpu.memory_space<vmem>>, vector<2x128xf32>
    %1 = vector.extract_strided_slice %0 {offsets = [0, 0], sizes = [2, 32], strides = [1, 1]} : vector<2x128xf32> to vector<2x32xf32>
    %2 = vector.extract_strided_slice %0 {offsets = [0, 32], sizes = [2, 1], strides = [1, 1]} : vector<2x128xf32> to vector<2x1xf32>
    %c8 = arith.constant 8 : index
    %c0_1 = arith.constant 0 : index
    %3 = vector.load %arg3[%c8, %c0_1] : memref<280x128xf32, #tpu.memory_space<vmem>>, vector<32x64xf32>
    %c40 = arith.constant 40 : index
    %c0_2 = arith.constant 0 : index
    %4 = vector.load %arg3[%c40, %c0_2] : memref<280x128xf32, #tpu.memory_space<vmem>>, vector<1x64xf32>
    %c48 = arith.constant 48 : index
    %c0_3 = arith.constant 0 : index
    %5 = vector.load %arg3[%c48, %c0_3] : memref<280x128xf32, #tpu.memory_space<vmem>>, vector<64x5xf32>
    %c112 = arith.constant 112 : index
    %c0_4 = arith.constant 0 : index
    %6 = vector.load %arg3[%c112, %c0_4] : memref<280x128xf32, #tpu.memory_space<vmem>>, vector<1x5xf32>
    %cst = arith.constant dense<0.000000e+00> : vector<2x64xf32>
    %7 = tpu.matmul %1, %3, %cst {dimension_numbers = #tpu.dot_dimension_numbers<[1], [0], [0], [1], [0, 0, 1, 1], [], []>} : vector<2x32xf32>, vector<32x64xf32>, vector<2x64xf32> -> vector<2x64xf32>
    %8 = vector.broadcast %4 : vector<1x64xf32> to vector<2x64xf32>
    %9 = arith.addf %7, %8 : vector<2x64xf32>
    %cst_5 = arith.constant 0.000000e+00 : f32
    %10 = vector.broadcast %cst_5 : f32 to vector<2x64xf32>
    %11 = arith.maximumf %9, %10 : vector<2x64xf32>
    %cst_6 = arith.constant dense<0.000000e+00> : vector<2x5xf32>
    %12 = tpu.matmul %11, %5, %cst_6 {dimension_numbers = #tpu.dot_dimension_numbers<[1], [0], [0], [1], [0, 0, 1, 1], [], []>} : vector<2x64xf32>, vector<64x5xf32>, vector<2x5xf32> -> vector<2x5xf32>
    %13 = vector.broadcast %6 : vector<1x5xf32> to vector<2x5xf32>
    %14 = arith.addf %12, %13 : vector<2x5xf32>
    %cst_7 = arith.constant dense<0xFF800000> : vector<2xf32>
    %15 = vector.multi_reduction <maximumf>, %14, %cst_7 [1] : vector<2x5xf32> to vector<2xf32>
    %16 = vector.shape_cast %15 : vector<2xf32> to vector<2x1xf32>
    %17 = vector.broadcast %16 : vector<2x1xf32> to vector<2x5xf32>
    %18 = arith.subf %14, %17 : vector<2x5xf32>
    %19 = math.exp %18 : vector<2x5xf32>
    %cst_8 = arith.constant dense<0.000000e+00> : vector<2xf32>
    %20 = vector.multi_reduction <add>, %19, %cst_8 [1] : vector<2x5xf32> to vector<2xf32>
    %21 = vector.shape_cast %20 : vector<2xf32> to vector<2x1xf32>
    %22 = tpu.reciprocal %21 {approx = true} : vector<2x1xf32> -> vector<2x1xf32>
    %23 = vector.broadcast %22 : vector<2x1xf32> to vector<2x5xf32>
    %24 = arith.mulf %19, %23 : vector<2x5xf32>
    %c0_9 = arith.constant 0 : index
    %c0_10 = arith.constant 0 : index
    %25 = vector.load %arg1[%c0_9, %c0_10] : memref<32x384xbf16, #tpu.memory_space<vmem>>, vector<32x384xbf16>
    %c0_11 = arith.constant 0 : index
    %c0_12 = arith.constant 0 : index
    %26 = vector.load %arg2[%c0_11, %c0_12] : memref<384x2048xbf16, #tpu.memory_space<vmem>>, vector<384x1920xbf16>
    %cst_13 = arith.constant dense<0.000000e+00> : vector<32x1920xf32>
    %27 = tpu.matmul %25, %26, %cst_13 {dimension_numbers = #tpu.dot_dimension_numbers<[1], [0], [0], [1], [0, 0, 1, 1], [], []>} : vector<32x384xbf16>, vector<384x1920xbf16>, vector<32x1920xf32> -> vector<32x1920xf32>
    %28 = vector.extract_strided_slice %27 {offsets = [0, 0], sizes = [16, 1920], strides = [1, 1]} : vector<32x1920xf32> to vector<16x1920xf32>
    %cst_14 = arith.constant dense<0xFF800000> : vector<1920xf32>
    %29 = vector.multi_reduction <maximumf>, %28, %cst_14 [0] : vector<16x1920xf32> to vector<1920xf32>
    %30 = vector.shape_cast %29 : vector<1920xf32> to vector<1x1920xf32>
    %31 = vector.extract_strided_slice %27 {offsets = [16, 0], sizes = [16, 1920], strides = [1, 1]} : vector<32x1920xf32> to vector<16x1920xf32>
    %cst_15 = arith.constant dense<0xFF800000> : vector<1920xf32>
    %32 = vector.multi_reduction <maximumf>, %31, %cst_15 [0] : vector<16x1920xf32> to vector<1920xf32>
    %33 = vector.shape_cast %32 : vector<1920xf32> to vector<1x1920xf32>
    %34 = tpu.concatenate %30, %33 in 0 : vector<1x1920xf32>, vector<1x1920xf32> -> vector<2x1920xf32>
    %35 = vector.extract_strided_slice %34 {offsets = [0, 0], sizes = [2, 384], strides = [1, 1]} : vector<2x1920xf32> to vector<2x384xf32>
    %36 = vector.extract_strided_slice %24 {offsets = [0, 0], sizes = [2, 1], strides = [1, 1]} : vector<2x5xf32> to vector<2x1xf32>
    %37 = vector.broadcast %36 : vector<2x1xf32> to vector<2x384xf32>
    %38 = arith.mulf %35, %37 : vector<2x384xf32>
    %39 = vector.extract_strided_slice %34 {offsets = [0, 384], sizes = [2, 384], strides = [1, 1]} : vector<2x1920xf32> to vector<2x384xf32>
    %40 = vector.extract_strided_slice %24 {offsets = [0, 1], sizes = [2, 1], strides = [1, 1]} : vector<2x5xf32> to vector<2x1xf32>
    %41 = vector.broadcast %40 : vector<2x1xf32> to vector<2x384xf32>
    %42 = arith.mulf %39, %41 : vector<2x384xf32>
    %43 = arith.addf %38, %42 : vector<2x384xf32>
    %44 = vector.extract_strided_slice %34 {offsets = [0, 768], sizes = [2, 384], strides = [1, 1]} : vector<2x1920xf32> to vector<2x384xf32>
    %45 = vector.extract_strided_slice %24 {offsets = [0, 2], sizes = [2, 1], strides = [1, 1]} : vector<2x5xf32> to vector<2x1xf32>
    %46 = vector.broadcast %45 : vector<2x1xf32> to vector<2x384xf32>
    %47 = arith.mulf %44, %46 : vector<2x384xf32>
    %48 = arith.addf %43, %47 : vector<2x384xf32>
    %49 = vector.extract_strided_slice %34 {offsets = [0, 1152], sizes = [2, 384], strides = [1, 1]} : vector<2x1920xf32> to vector<2x384xf32>
    %50 = vector.extract_strided_slice %24 {offsets = [0, 3], sizes = [2, 1], strides = [1, 1]} : vector<2x5xf32> to vector<2x1xf32>
    %51 = vector.broadcast %50 : vector<2x1xf32> to vector<2x384xf32>
    %52 = arith.mulf %49, %51 : vector<2x384xf32>
    %53 = arith.addf %48, %52 : vector<2x384xf32>
    %54 = vector.extract_strided_slice %34 {offsets = [0, 1536], sizes = [2, 384], strides = [1, 1]} : vector<2x1920xf32> to vector<2x384xf32>
    %55 = vector.extract_strided_slice %24 {offsets = [0, 4], sizes = [2, 1], strides = [1, 1]} : vector<2x5xf32> to vector<2x1xf32>
    %56 = vector.broadcast %55 : vector<2x1xf32> to vector<2x384xf32>
    %57 = arith.mulf %54, %56 : vector<2x384xf32>
    %58 = arith.addf %53, %57 : vector<2x384xf32>
    %c120 = arith.constant 120 : index
    %c0_16 = arith.constant 0 : index
    %59 = vector.load %arg3[%c120, %c0_16] : memref<280x128xf32, #tpu.memory_space<vmem>>, vector<1x128xf32>
    %60 = arith.truncf %58 : vector<2x384xf32> to vector<2x384xbf16>
    %c0_17 = arith.constant 0 : index
    %c1920 = arith.constant 1920 : index
    %61 = vector.load %arg2[%c0_17, %c1920] : memref<384x2048xbf16, #tpu.memory_space<vmem>>, vector<384x128xbf16>
    %cst_18 = arith.constant dense<0.000000e+00> : vector<2x128xf32>
    %62 = tpu.matmul %60, %61, %cst_18 {dimension_numbers = #tpu.dot_dimension_numbers<[1], [0], [0], [1], [0, 0, 1, 1], [], []>} : vector<2x384xbf16>, vector<384x128xbf16>, vector<2x128xf32> -> vector<2x128xf32>
    %63 = vector.broadcast %59 : vector<1x128xf32> to vector<2x128xf32>
    %64 = arith.addf %62, %63 : vector<2x128xf32>
    %cst_19 = arith.constant 0.000000e+00 : f32
    %65 = vector.broadcast %cst_19 : f32 to vector<2x128xf32>
    %66 = arith.maximumf %64, %65 : vector<2x128xf32>
    %c128 = arith.constant 128 : index
    %c0_20 = arith.constant 0 : index
    %67 = vector.load %arg3[%c128, %c0_20] : memref<280x128xf32, #tpu.memory_space<vmem>>, vector<128x2xf32>
    %c256 = arith.constant 256 : index
    %c0_21 = arith.constant 0 : index
    %68 = vector.load %arg3[%c256, %c0_21] : memref<280x128xf32, #tpu.memory_space<vmem>>, vector<1x2xf32>
    %cst_22 = arith.constant dense<0.000000e+00> : vector<2x2xf32>
    %69 = tpu.matmul %66, %67, %cst_22 {dimension_numbers = #tpu.dot_dimension_numbers<[1], [0], [0], [1], [0, 0, 1, 1], [], []>} : vector<2x128xf32>, vector<128x2xf32>, vector<2x2xf32> -> vector<2x2xf32>
    %70 = vector.broadcast %68 : vector<1x2xf32> to vector<2x2xf32>
    %71 = arith.addf %69, %70 : vector<2x2xf32>
    %c264 = arith.constant 264 : index
    %c0_23 = arith.constant 0 : index
    %72 = vector.load %arg3[%c264, %c0_23] : memref<280x128xf32, #tpu.memory_space<vmem>>, vector<1x2xf32>
    %c272 = arith.constant 272 : index
    %c0_24 = arith.constant 0 : index
    %73 = vector.load %arg3[%c272, %c0_24] : memref<280x128xf32, #tpu.memory_space<vmem>>, vector<1x1xf32>
    %74 = vector.broadcast %72 : vector<1x2xf32> to vector<2x2xf32>
    %75 = arith.mulf %71, %74 : vector<2x2xf32>
    %cst_25 = arith.constant dense<0.000000e+00> : vector<2xf32>
    %76 = vector.multi_reduction <add>, %75, %cst_25 [1] : vector<2x2xf32> to vector<2xf32>
    %77 = vector.shape_cast %76 : vector<2xf32> to vector<2x1xf32>
    %78 = vector.broadcast %73 : vector<1x1xf32> to vector<2x1xf32>
    %79 = arith.addf %77, %78 : vector<2x1xf32>
    %cst_26 = arith.constant 0.000000e+00 : f32
    %80 = vector.broadcast %cst_26 : f32 to vector<2x1xf32>
    %81 = arith.subf %80, %79 : vector<2x1xf32>
    %82 = math.exp %81 : vector<2x1xf32>
    %cst_27 = arith.constant 1.000000e+00 : f32
    %83 = vector.broadcast %cst_27 : f32 to vector<2x1xf32>
    %84 = arith.addf %83, %82 : vector<2x1xf32>
    %cst_28 = arith.constant 1.000000e+00 : f32
    %85 = vector.broadcast %cst_28 : f32 to vector<2x1xf32>
    %86 = arith.divf %85, %84 : vector<2x1xf32>
    %cst_29 = arith.constant 9.99999996E-13 : f32
    %87 = vector.broadcast %cst_29 : f32 to vector<2x1xf32>
    %88 = arith.addf %86, %87 : vector<2x1xf32>
    %89 = math.log %88 : vector<2x1xf32>
    %90 = arith.mulf %2, %89 : vector<2x1xf32>
    %cst_30 = arith.constant 1.000000e+00 : f32
    %91 = vector.broadcast %cst_30 : f32 to vector<2x1xf32>
    %92 = arith.subf %91, %2 : vector<2x1xf32>
    %cst_31 = arith.constant 1.000000e+00 : f32
    %93 = vector.broadcast %cst_31 : f32 to vector<2x1xf32>
    %94 = arith.subf %93, %86 : vector<2x1xf32>
    %cst_32 = arith.constant 9.99999996E-13 : f32
    %95 = vector.broadcast %cst_32 : f32 to vector<2x1xf32>
    %96 = arith.addf %94, %95 : vector<2x1xf32>
    %97 = math.log %96 : vector<2x1xf32>
    %98 = arith.mulf %92, %97 : vector<2x1xf32>
    %99 = arith.addf %90, %98 : vector<2x1xf32>
    %cst_33 = arith.constant 0.000000e+00 : f32
    %100 = vector.broadcast %cst_33 : f32 to vector<2x1xf32>
    %101 = arith.subf %100, %99 : vector<2x1xf32>
    %cst_34 = arith.constant dense<0.000000e+00> : vector<1xf32>
    %102 = vector.multi_reduction <add>, %101, %cst_34 [0] : vector<2x1xf32> to vector<1xf32>
    %103 = vector.shape_cast %102 : vector<1xf32> to vector<1x1xf32>
    %cst_35 = arith.constant 5.000000e-01 : f32
    %104 = vector.broadcast %cst_35 : f32 to vector<1x1xf32>
    %105 = arith.mulf %103, %104 : vector<1x1xf32>
    %c0_36 = arith.constant 0 : index
    %c0_37 = arith.constant 0 : index
    %106 = vector.load %arg4[%c0_36, %c0_37] : memref<2x512xf32, #tpu.memory_space<vmem>>, vector<2x384xf32>
    tpu.vector_store %arg4[%c0_36, %c0_37], %58 {strides = array<i32>} : memref<2x512xf32, #tpu.memory_space<vmem>>, vector<2x384xf32>,
    %107 = vector.shape_cast %105 : vector<1x1xf32> to vector<1x1xf32>
    %108 = vector.broadcast %107 : vector<1x1xf32> to vector<2x1xf32>
    %cst_38 = arith.constant 0.000000e+00 : f32
    %109 = vector.broadcast %cst_38 : f32 to vector<2x124xf32>
    %110 = tpu.concatenate %71, %86, %108, %109 in 1 : vector<2x2xf32>, vector<2x1xf32>, vector<2x1xf32>, vector<2x124xf32> -> vector<2x128xf32>
    %c0_39 = arith.constant 0 : index
    %c384 = arith.constant 384 : index
    %111 = vector.load %arg4[%c0_39, %c384] : memref<2x512xf32, #tpu.memory_space<vmem>>, vector<2x128xf32>
    tpu.vector_store %arg4[%c0_39, %c384], %110 {strides = array<i32>} : memref<2x512xf32, #tpu.memory_space<vmem>>, vector<2x128xf32>,
    return
  }
  func.func @transform_0(%arg0: i32) -> (i32, i32) {
    %c0_i32 = arith.constant 0 : i32
    %c0_i32_0 = arith.constant 0 : i32
    %c0_i32_1 = arith.constant 0 : i32
    return %c0_i32, %c0_i32_0 : i32, i32
  }
  func.func @transform_1(%arg0: i32) -> (i32, i32) {
    %c0_i32 = arith.constant 0 : i32
    %c0_i32_0 = arith.constant 0 : i32
    %c0_i32_1 = arith.constant 0 : i32
    return %c0_i32, %c0_i32_0 : i32, i32
  }
  func.func @transform_2(%arg0: i32) -> (i32, i32) {
    %c0_i32 = arith.constant 0 : i32
    %c0_i32_0 = arith.constant 0 : i32
    %c0_i32_1 = arith.constant 0 : i32
    return %c0_i32, %c0_i32_0 : i32, i32
  }
  func.func @transform_3(%arg0: i32) -> (i32, i32) {
    %c0_i32 = arith.constant 0 : i32
    %c0_i32_0 = arith.constant 0 : i32
    %c0_i32_1 = arith.constant 0 : i32
    return %c0_i32, %c0_i32_0 : i32, i32
  }
}

</mosaic_0001>

<bundles_post_ra>
// kernel: mdfend_forward.1
= control target key start
LH: loop header
LB: loop body
LE: loop exit
PB: predicated region body
PF: predicated region fallthrough
CT: control target
= control target key end

     0   :  { %8 = vsyncpa [#allocation3], 0  ;;  %s4715_s12 = smov [#allocation2]   ;;  %s5177_s0 = inlined_call_operand.vmem [shape: bf16[32,384], index: 0, kind: input, shape index: {}]   ;;  %s5178_s1 = inlined_call_operand.hbm [shape: bf16[384,2048], index: 1, kind: input, shape index: {}]   ;;  %s5179_s2 = inlined_call_operand.vmem [shape: f32[280,128], index: 2, kind: input, shape index: {}]   ;;  %s5180_s3 = inlined_call_operand.vmem [shape: f32[2,512], index: 3, kind: output, shape index: {}]  }
   0x1   :  { %s16_s13 = sshll.u32 %s4715_s12, 4  ;;  %s17_s13 = int_to_ptr.vmem [resolvable:$true] %s16_s13 }
   0x2   :  { %s4701_s14 = scalar_lea.vmem %s17_s13, 49152  ;;  %p4706_p1 = scmp.lt.s32.totalorder %s17_s13, %s17_s13 }
   0x3   :  { %p4702_p0 = scmp.ne.s32.totalorder %s17_s13, %s4701_s14  ;;  %p4707_p2 = scmp.lt.s32.totalorder %s4701_s14, %s4701_s14 }
   0x5   :  { %p4708_p3 = por %p4707_p2, %p4706_p1 }
   0x7   :  { %p4709_p4 = pnand %p4708_p3, %p4702_p0 }
   0x9   :  { %4712 = shalt.err (!%p4709_p4)
}
   0xa   :  { %s4716_s15 = smov 1024   ;;  %s4717_s16 = smov 64  }
   0xb   :  { %22 = dma.hbm_to_vmem [thread:$0]  %s5178_s1, 49152, %s17_s13, [#allocation3], %s4716_s15, %s4716_s15, %s4717_s16  }
   0xc   :  { %4713 = dma.done.wait [#allocation3], 49152  }
   0xd   :  { %4714 = vsyncadd [#allocation3], 4294918144  ;;  %v5181_v0 = vmov 0.0   ;;  %vm4719_vm0 = vmmov 0   ;;  %v33_v1 = vld [vmem:[%s5179_s2 + $0x20] sm:$0xff]  ;;  %v32_v2 = vld [vmem:[%s5179_s2 + $0x18] sm:$0xff] }
   0xe   :  { %4537 = vmatprep.subr.mxu0 %v5181_v0  ;;  %4545 = vmatprep.mubr.msk.f32.mxu0 %vm4719_vm0, %v5181_v0  ;;  %v42_v3 = vld [vmem:[%s5179_s2 + $0x68] sm:$0xff]  ;;  %v31_v4 = vld [vmem:[%s5179_s2 + $0x10] sm:$0xff]  ;;  %v41_v6 = vld [vmem:[%s5179_s2 + $0x60] sm:$0xff]  ;;  %vm48_vm1 = vcmask 261120   ;;  %v4720_v55 = vmov 0   ;;  %vm127_vm2 = vcmask 523264  }
   0xf   :  { %4548 = vmatprep.subr.mxu1 %v5181_v0  ;;  %4564 = vmatprep.mubr.msk.f32.mxu1 %vm4719_vm0, %v5181_v0  ;;  %v30_v5 = vld [vmem:[%s5179_s2 + $0x8] sm:$0xff]  ;;  %v29_v7 = vld [vmem:[%s5179_s2] sm:$0x3]  ;;  %v40_v8 = vld [vmem:[%s5179_s2 + $0x58] sm:$0xff]  ;;  %vm201_vm3 = vcmask 33792   ;;  %vm3511_vm4 = vcmask 1040384  }
  0x10   :  { %4538 = vmatpush3.msra.mxu0 %v33_v1  ;;  %4549 = vmatpush3.msra.mxu1 %v42_v3  ;;  %v39_v9 = vld [vmem:[%s5179_s2 + $0x50] sm:$0xff]  ;;  %v38_v10 = vld [vmem:[%s5179_s2 + $0x48] sm:$0xff]  ;;  %v37_v11 = vld [vmem:[%s5179_s2 + $0x40] sm:$0xff]  ;;  %vm3954_vm5 = vcmask 9216   ;;  %s4726_s9 = smov 32   ;;  %s4727_s10 = smov 2  }
  0x11   :  { %4539 = vmatprep.subr.mxu0 %v5181_v0  ;;  %4550 = vmatprep.subr.mxu1 %v5181_v0  ;;  %v36_v12 = vld [vmem:[%s5179_s2 + $0x38] sm:$0xff]  ;;  %v35_v13 = vld [vmem:[%s5179_s2 + $0x30] sm:$0xff]  ;;  %v333_v14 = vld [vmem:[#allocation2 + $0x380] sm:$0xff]  ;;  %vm3989_vm6 = vcmask 263424   ;;  %s4728_s13 = smov 99   ;;  %vm4027_vm7 = vcmask 15360  }
  0x12   :  { %4540 = vmatpush3.msra.mxu0 %v32_v2  ;;  %4551 = vmatpush3.msra.mxu1 %v41_v6  ;;  %v341_v15 = vld [vmem:[#allocation2 + $0x3c0] sm:$0xff]  ;;  %vm4029_vm8 = vcmask 23552   ;;  %vm4031_vm9 = vcmask 31744  }
  0x13   :  { %4541 = vmatprep.subr.mxu0 %v5181_v0  ;;  %4552 = vmatprep.subr.mxu1 %v5181_v0  ;;  %v317_v16 = vld [vmem:[#allocation2 + $0x300] sm:$0xff]  ;;  %v4154_v17 = vcombine.low %v333_v14, %v341_v15  ;;  %v4155_v18 = vcombine.high %v333_v14, %v341_v15 }
  0x14   :  { %4542 = vmatpush3.msra.mxu0 %v31_v4  ;;  %4553 = vmatpush3.msra.mxu1 %v40_v8  ;;  %v325_v19 = vld [vmem:[#allocation2 + $0x340] sm:$0xff] }
  0x15   :  { %4543 = vmatprep.subr.mxu0 %v5181_v0  ;;  %4554 = vmatprep.subr.mxu1 %v5181_v0  ;;  %v301_v20 = vld [vmem:[#allocation2 + $0x280] sm:$0xff]  ;;  %v4140_v21 = vcombine.high %v317_v16, %v325_v19  ;;  %v4139_v27 = vcombine.low %v317_v16, %v325_v19 }
  0x16   :  { %4544 = vmatpush3.msra.mxu0 %v30_v5  ;;  %4555 = vmatpush3.msra.mxu1 %v39_v9  ;;  %v309_v22 = vld [vmem:[#allocation2 + $0x2c0] sm:$0xff] }
  0x17   :  { %4546 = vmatmul.mubr.msk.f32.vlgmr.msra.gmra.mxu0 %vm48_vm1, %v29_v7  ;;  %4556 = vmatprep.subr.mxu1 %v5181_v0  ;;  %v4807_v23 = vld [vmem:[#allocation2 + $0xb80] sm:$0xff]  ;;  %v4125_v28 = vcombine.high %v301_v20, %v309_v22  ;;  %v4124_v31 = vcombine.low %v301_v20, %v309_v22  ;;  %v590_v20 = vld [vmem:[#allocation2 + $0xb88] sm:$0xff] }
  0x18   :  { %4557 = vmatpush3.msra.mxu1 %v38_v10  ;;  %v4809_v24 = vld [vmem:[#allocation2 + $0xbc0] sm:$0xff]  ;;  %2461 = vmatprep.subr.bf16.mxu0 %v4155_v18 }
  0x19   :  { %4558 = vmatprep.subr.mxu1 %v5181_v0  ;;  %v4394_v25 = vcombine.low %v4807_v23, %v4809_v24  ;;  %v4395_v26 = vcombine.high %v4807_v23, %v4809_v24  ;;  %2462 = vmatpush1.bf16.msra.mxu0 %v4154_v17  ;;  %v285_v29 = vld [vmem:[#allocation2 + $0x200] sm:$0xff]  ;;  %v415_v24 = vld [vmem:[#allocation2 + $0x610] sm:$0xff] }
  0x1a   :  { %4559 = vmatpush3.msra.mxu1 %v37_v11  ;;  %2463 = vmatprep.subr.bf16.mxu0 %v4140_v21  ;;  %v293_v30 = vld [vmem:[#allocation2 + $0x240] sm:$0xff]  ;;  %v598_v21 = vld [vmem:[#allocation2 + $0xbc8] sm:$0xff] }
  0x1b   :  { %4560 = vmatprep.subr.mxu1 %v5181_v0  ;;  %v4110_v32 = vcombine.high %v285_v29, %v293_v30  ;;  %v269_v33 = vld [vmem:[#allocation2 + $0x180] sm:$0xff]  ;;  %v4109_v35 = vcombine.low %v285_v29, %v293_v30  ;;  %4656 = vset.pattern.permute.xlu1 %v4720_v55  ;;  %v4396_v30 = vcombine.low %v590_v20, %v598_v21 }
  0x1c   :  { %4561 = vmatpush3.msra.mxu1 %v36_v12  ;;  %v277_v34 = vld [vmem:[#allocation2 + $0x1c0] sm:$0xff] }
  0x1d   :  { %4562 = vmatprep.subr.mxu1 %v5181_v0  ;;  %2464 = vmatpush1.bf16.msra.mxu0 %v4139_v27  ;;  %v4095_v36 = vcombine.high %v269_v33, %v277_v34  ;;  %v253_v37 = vld [vmem:[#allocation2 + $0x100] sm:$0xff]  ;;  %v4094_v39 = vcombine.low %v269_v33, %v277_v34  ;;  %v574_v27 = vld [vmem:[#allocation2 + $0xb08] sm:$0xff] }
  0x1e   :  { %4563 = vmatpush3.msra.mxu1 %v35_v13  ;;  %2465 = vmatprep.subr.bf16.mxu0 %v4125_v28  ;;  %v261_v38 = vld [vmem:[#allocation2 + $0x140] sm:$0xff]  ;;  %v582_v28 = vld [vmem:[#allocation2 + $0xb48] sm:$0xff] }
  0x1f   :  { %2514 = vmatprep.subr.bf16.mxu1 %v4395_v26  ;;  %v4080_v40 = vcombine.high %v253_v37, %v261_v38  ;;  %v237_v41 = vld [vmem:[#allocation2 + $0x80] sm:$0xff]  ;;  %v4079_v43 = vcombine.low %v253_v37, %v261_v38  ;;  %v4397_v26 = vcombine.high %v590_v20, %v598_v21  ;;  %v558_v33 = vld [vmem:[#allocation2 + $0xa88] sm:$0xff]  ;;  %v263_v20 = vld [vmem:[#allocation2 + $0x150] sm:$0xff] }
  0x20   :  { %v245_v42 = vld [vmem:[#allocation2 + $0xc0] sm:$0xff]  ;;  %v566_v34 = vld [vmem:[#allocation2 + $0xac8] sm:$0xff] }
  0x21   :  { %2466 = vmatpush1.bf16.msra.mxu0 %v4124_v31  ;;  %v4065_v44 = vcombine.high %v237_v41, %v245_v42  ;;  %v221_v45 = vld [vmem:[#allocation2] sm:$0xff]  ;;  %v4064_v47 = vcombine.low %v237_v41, %v245_v42  ;;  %v4830_v31 = vld [vmem:[%s5177_s0 + $0x1c] ss:$12 sps:$4 sm:$0xff]  }
  0x22   :  { %2467 = vmatprep.subr.bf16.mxu0 %v4110_v32  ;;  %v229_v46 = vld [vmem:[#allocation2 + $0x40] sm:$0xff]  ;;  %v4382_v32 = vcombine.high %v574_v27, %v582_v28  ;;  %v542_v37 = vld [vmem:[#allocation2 + $0xa08] sm:$0xff] }
  0x23   :  { %v4050_v48 = vcombine.high %v221_v45, %v229_v46  ;;  %v461_v49 = vld [vmem:[#allocation2 + $0x780] sm:$0xff]  ;;  %v4049_v51 = vcombine.low %v221_v45, %v229_v46  ;;  %v550_v38 = vld [vmem:[#allocation2 + $0xa48] sm:$0xff] }
  0x24   :  { %v469_v50 = vld [vmem:[#allocation2 + $0x7c0] sm:$0xff]  ;;  %v4352_v41 = vcombine.high %v542_v37, %v550_v38  ;;  %v526_v42 = vld [vmem:[#allocation2 + $0x988] sm:$0xff] }
  0x25   :  { %2468 = vmatpush1.bf16.msra.mxu0 %v4109_v35  ;;  %v4275_v52 = vcombine.high %v461_v49, %v469_v50  ;;  %v445_v53 = vld [vmem:[#allocation2 + $0x700] sm:$0xff]  ;;  %v4274_v56 = vcombine.low %v461_v49, %v469_v50  ;;  %v4381_v35 = vcombine.low %v574_v27, %v582_v28  ;;  %v510_v46 = vld [vmem:[#allocation2 + $0x908] sm:$0xff]  ;;  %v247_v27 = vld [vmem:[#allocation2 + $0xd0] sm:$0xff] }
  0x26   :  { %2469 = vmatprep.subr.bf16.mxu0 %v4095_v36  ;;  %v453_v54 = vld [vmem:[#allocation2 + $0x740] sm:$0xff]  ;;  %v4367_v36 = vcombine.high %v558_v33, %v566_v34  ;;  %v494_v50 = vld [vmem:[#allocation2 + $0x888] sm:$0xff] }
  0x27   :  { %v4260_v57 = vcombine.high %v445_v53, %v453_v54  ;;  %v429_v58 = vld [vmem:[#allocation2 + $0x680] sm:$0xff]  ;;  %v4259_v60 = vcombine.low %v445_v53, %v453_v54  ;;  %v478_v54 = vld [vmem:[#allocation2 + $0x808] sm:$0xff] }
  0x28   :  { %v437_v59 = vld [vmem:[#allocation2 + $0x6c0] sm:$0xff] }
  0x29   :  { %2470 = vmatpush1.bf16.msra.mxu0 %v4094_v39  ;;  %v4245_v61 = vcombine.high %v429_v58, %v437_v59  ;;  %v413_v62 = vld [vmem:[#allocation2 + $0x600] sm:$0xff]  ;;  %v4244_v1 = vcombine.low %v429_v58, %v437_v59  ;;  %v335_v59 = vld [vmem:[#allocation2 + $0x390] sm:$0xff] }
  0x2a   :  { %2471 = vmatprep.subr.bf16.mxu0 %v4080_v40  ;;  %v421_v63 = vld [vmem:[#allocation2 + $0x640] sm:$0xff]  ;;  %v4366_v40 = vcombine.low %v558_v33, %v566_v34  ;;  %v231_v33 = vld [vmem:[#allocation2 + $0x50] sm:$0xff] }
  0x2b   :  { %v4230_v2 = vcombine.high %v413_v62, %v421_v63  ;;  %v397_v3 = vld [vmem:[#allocation2 + $0x580] sm:$0xff]  ;;  %v4229_v5 = vcombine.low %v413_v62, %v421_v63  ;;  %v319_v63 = vld [vmem:[#allocation2 + $0x310] sm:$0xff] }
  0x2c   :  { %v405_v4 = vld [vmem:[#allocation2 + $0x5c0] sm:$0xff] }
  0x2d   :  { %2472 = vmatpush1.bf16.msra.mxu0 %v4079_v43  ;;  %v4215_v6 = vcombine.high %v397_v3, %v405_v4  ;;  %v381_v7 = vld [vmem:[#allocation2 + $0x500] sm:$0xff]  ;;  %v4214_v9 = vcombine.low %v397_v3, %v405_v4  ;;  %v534_v43 = vld [vmem:[#allocation2 + $0x9c8] sm:$0xff] }
  0x2e   :  { %2473 = vmatprep.subr.bf16.mxu0 %v4065_v44  ;;  %v389_v8 = vld [vmem:[#allocation2 + $0x540] sm:$0xff]  ;;  %v4351_v44 = vcombine.low %v542_v37, %v550_v38  ;;  %v4337_v45 = vcombine.high %v526_v42, %v534_v43  ;;  %v4844_v3 = vld [vmem:[%s5177_s0 + $0x8] ss:$12 sps:$4 sm:$0xff]  }
  0x2f   :  { %v4200_v10 = vcombine.high %v381_v7, %v389_v8  ;;  %v365_v11 = vld [vmem:[#allocation2 + $0x480] sm:$0xff]  ;;  %v4199_v14 = vcombine.low %v381_v7, %v389_v8 }
  0x30   :  { %v373_v12 = vld [vmem:[#allocation2 + $0x4c0] sm:$0xff] }
  0x31   :  { %2474 = vmatpush1.bf16.msra.mxu0 %v4064_v47  ;;  %v4819_v13 = vld [vmem:[%s5177_s0 + $0x4] ss:$12 sps:$4 sm:$0xff]   ;;  %v4185_v15 = vcombine.high %v365_v11, %v373_v12  ;;  %v4184_v18 = vcombine.low %v365_v11, %v373_v12  ;;  %v4825_v29 = vld [vmem:[%s5177_s0] ss:$12 sps:$4 sm:$0xff]  }
  0x32   :  { %2475 = vmatprep.subr.bf16.mxu0 %v4050_v48  ;;  %2493 = vmatprep.mubr.bf16.mxu0 %v4819_v13  ;;  %v349_v16 = vld [vmem:[#allocation2 + $0x400] sm:$0xff]  ;;  %v518_v47 = vld [vmem:[#allocation2 + $0x948] sm:$0xff]  ;;  %v4336_v48 = vcombine.low %v526_v42, %v534_v43  ;;  %v471_v42 = vld [vmem:[#allocation2 + $0x7d0] sm:$0xff] }
  0x33   :  { %v357_v17 = vld [vmem:[#allocation2 + $0x440] sm:$0xff]  ;;  %v4322_v49 = vcombine.high %v510_v46, %v518_v47 }
  0x34   :  { %v4170_v19 = vcombine.high %v349_v16, %v357_v17  ;;  %v4169_v22 = vcombine.low %v349_v16, %v357_v17  ;;  %v4837_v39 = vld [vmem:[%s5177_s0 + $0x18] ss:$12 sps:$4 sm:$0xff]   ;;  %v4851_v12 = vld [vmem:[%s5177_s0 + $0x20] ss:$12 sps:$4 sm:$0xff]   ;;  %v279_v16 = vld [vmem:[#allocation2 + $0x1d0] sm:$0xff] }
  0x35   :  { %2476 = vmatpush1.bf16.msra.mxu0 %v4049_v51  ;;  %v502_v51 = vld [vmem:[#allocation2 + $0x8c8] sm:$0xff]  ;;  %v573_v37 = vld [vmem:[#allocation2 + $0xb00] sm:$0xff] }
  0x36   :  { %2477 = vmatprep.subr.bf16.mxu0 %v4275_v52  ;;  %v4321_v52 = vcombine.low %v510_v46, %v518_v47  ;;  %v4307_v53 = vcombine.high %v494_v50, %v502_v51 }
  0x39   :  { %2478 = vmatpush2.bf16.msra.mxu0 %v4274_v56  ;;  %v486_v56 = vld [vmem:[#allocation2 + $0x848] sm:$0xff] }
  0x3a   :  { %2479 = vmatprep.subr.bf16.mxu0 %v4260_v57  ;;  %v4306_v57 = vcombine.low %v494_v50, %v502_v51  ;;  %v4292_v58 = vcombine.high %v478_v54, %v486_v56  ;;  %v455_v50 = vld [vmem:[#allocation2 + $0x750] sm:$0xff]  ;;  %v557_v51 = vld [vmem:[#allocation2 + $0xa80] sm:$0xff] }
  0x3d   :  { %2480 = vmatpush2.bf16.msra.mxu0 %v4259_v60  ;;  %v343_v60 = vld [vmem:[#allocation2 + $0x3d0] sm:$0xff] }
  0x3e   :  { %2481 = vmatprep.subr.bf16.mxu0 %v4245_v61  ;;  %v4291_v61 = vcombine.low %v478_v54, %v486_v56  ;;  %v4159_v62 = vcombine.high %v335_v59, %v343_v60 }
  0x41   :  { %2482 = vmatpush2.bf16.msra.mxu0 %v4244_v1  ;;  %v327_v1 = vld [vmem:[#allocation2 + $0x350] sm:$0xff] }
  0x42   :  { %2483 = vmatprep.subr.bf16.mxu0 %v4230_v2  ;;  %v4158_v2 = vcombine.low %v335_v59, %v343_v60  ;;  %v4144_v4 = vcombine.high %v319_v63, %v327_v1  ;;  %v4143_v7 = vcombine.low %v319_v63, %v327_v1  ;;  %v439_v59 = vld [vmem:[#allocation2 + $0x6d0] sm:$0xff]  ;;  %v541_v60 = vld [vmem:[#allocation2 + $0xa00] sm:$0xff] }
  0x45   :  { %2484 = vmatpush2.bf16.msra.mxu0 %v4229_v5  ;;  %v303_v5 = vld [vmem:[#allocation2 + $0x290] sm:$0xff] }
  0x46   :  { %2485 = vmatprep.subr.bf16.mxu0 %v4215_v6  ;;  %v311_v6 = vld [vmem:[#allocation2 + $0x2d0] sm:$0xff] }
  0x47   :  { %v4129_v8 = vcombine.high %v303_v5, %v311_v6  ;;  %v4128_v11 = vcombine.low %v303_v5, %v311_v6 }
  0x49   :  { %2486 = vmatpush2.bf16.msra.mxu0 %v4214_v9  ;;  %v287_v9 = vld [vmem:[#allocation2 + $0x210] sm:$0xff] }
  0x4a   :  { %2487 = vmatprep.subr.bf16.mxu0 %v4200_v10  ;;  %v295_v10 = vld [vmem:[#allocation2 + $0x250] sm:$0xff] }
  0x4b   :  { %v4113_v17 = vcombine.low %v287_v9, %v295_v10 }
  0x4d   :  { %2488 = vmatpush2.bf16.msra.mxu0 %v4199_v14  ;;  %v4114_v14 = vcombine.high %v287_v9, %v295_v10  ;;  %v399_v9 = vld [vmem:[#allocation2 + $0x590] sm:$0xff] }
  0x4e   :  { %2489 = vmatprep.subr.bf16.mxu0 %v4185_v15  ;;  %v271_v15 = vld [vmem:[#allocation2 + $0x190] sm:$0xff] }
  0x4f   :  { %v4098_v21 = vcombine.low %v271_v15, %v279_v16  ;;  %v407_v10 = vld [vmem:[#allocation2 + $0x5d0] sm:$0xff] }
  0x51   :  { %2490 = vmatpush2.bf16.msra.mxu0 %v4184_v18  ;;  %v4099_v18 = vcombine.high %v271_v15, %v279_v16 }
  0x52   :  { %2491 = vmatprep.subr.bf16.mxu0 %v4170_v19  ;;  %v255_v19 = vld [vmem:[#allocation2 + $0x110] sm:$0xff] }
  0x53   :  { %v4083_v28 = vcombine.low %v255_v19, %v263_v20 }
  0x55   :  { %2492 = vmatpush2.bf16.msra.mxu0 %v4169_v22  ;;  %v4084_v22 = vcombine.high %v255_v19, %v263_v20  ;;  %v383_v19 = vld [vmem:[#allocation2 + $0x510] sm:$0xff] }
  0x56   :  { %2620 = vmatprep.subr.bf16.mxu0 %v4397_v26  ;;  %v239_v26 = vld [vmem:[#allocation2 + $0x90] sm:$0xff] }
  0x57   :  { %v4068_v34 = vcombine.low %v239_v26, %v247_v27  ;;  %v391_v20 = vld [vmem:[#allocation2 + $0x550] sm:$0xff] }
  0x58   :  { %2494 = vmatmul.mubr.bf16.vlgmr.msra.gmra.mxu0 %v4825_v29 }
  0x59   :  { %2621 = vmatpush1.bf16.msra.mxu0 %v4396_v30  ;;  %2503 = vmatprep.mubr.bf16.mxu0 %v4830_v31  ;;  %v4069_v30 = vcombine.high %v239_v26, %v247_v27  ;;  %v4218_v26 = vcombine.low %v399_v9, %v407_v10 }
  0x5a   :  { %2622 = vmatprep.subr.bf16.mxu0 %v4382_v32  ;;  %v223_v32 = vld [vmem:[#allocation2 + $0x10] sm:$0xff] }
  0x5d   :  { %2623 = vmatpush1.bf16.msra.mxu0 %v4381_v35  ;;  %v4039_v35 = vld [vmem:[%s5179_s2 + $0x28] ss:$0 sm:$0xff] }
  0x5e   :  { %2624 = vmatprep.subr.bf16.mxu0 %v4367_v36  ;;  %v4054_v36 = vcombine.high %v223_v32, %v231_v33 }
  0x60   :  { %2504 = vmatmul.mubr.bf16.gmra.mxu0 %v4837_v39 }
  0x61   :  { %2625 = vmatpush1.bf16.msra.mxu0 %v4366_v40  ;;  %2652 = vmatprep.mubr.bf16.mxu0 %v4720_v55  ;;  %v581_v40 = vld [vmem:[#allocation2 + $0xb40] sm:$0xff] }
  0x62   :  { %2626 = vmatprep.subr.bf16.mxu0 %v4352_v41  ;;  %v463_v41 = vld [vmem:[#allocation2 + $0x790] sm:$0xff]  ;;  %v4380_v47 = vcombine.high %v573_v37, %v581_v40  ;;  %v4379_v54 = vcombine.low %v573_v37, %v581_v40 }
  0x65   :  { %2627 = vmatpush1.bf16.msra.mxu0 %v4351_v44  ;;  %v4053_v44 = vcombine.low %v223_v32, %v231_v33  ;;  %v367_v32 = vld [vmem:[#allocation2 + $0x490] sm:$0xff] }
  0x66   :  { %2628 = vmatprep.subr.bf16.mxu0 %v4337_v45  ;;  %v375_v33 = vld [vmem:[#allocation2 + $0x4d0] sm:$0xff] }
  0x69   :  { %2629 = vmatpush1.bf16.msra.mxu0 %v4336_v48  ;;  %v4279_v48 = vcombine.high %v463_v41, %v471_v42 }
  0x6a   :  { %2630 = vmatprep.subr.bf16.mxu0 %v4322_v49  ;;  %v447_v49 = vld [vmem:[#allocation2 + $0x710] sm:$0xff] }
  0x6b   :  { %v4264_v56 = vcombine.high %v447_v49, %v455_v50 }
  0x6d   :  { %2631 = vmatpush1.bf16.msra.mxu0 %v4321_v52  ;;  %v565_v52 = vld [vmem:[#allocation2 + $0xac0] sm:$0xff] }
  0x6e   :  { %2632 = vmatprep.subr.bf16.mxu0 %v4307_v53  ;;  %v4278_v53 = vcombine.low %v463_v41, %v471_v42  ;;  %v4364_v63 = vcombine.low %v557_v51, %v565_v52  ;;  %v351_v41 = vld [vmem:[#allocation2 + $0x410] sm:$0xff] }
  0x6f   :  { %v359_v42 = vld [vmem:[#allocation2 + $0x450] sm:$0xff] }
  0x71   :  { %2633 = vmatpush1.bf16.msra.mxu0 %v4306_v57  ;;  %v4365_v57 = vcombine.high %v557_v51, %v565_v52  ;;  %v592_v51 = vld [vmem:[#allocation2 + $0xb98] sm:$0xff] }
  0x72   :  { %2634 = vmatprep.subr.bf16.mxu0 %v4292_v58  ;;  %v431_v58 = vld [vmem:[#allocation2 + $0x690] sm:$0xff]  ;;  %v600_v52 = vld [vmem:[#allocation2 + $0xbd8] sm:$0xff] }
  0x73   :  { %v4249_v1 = vcombine.high %v431_v58, %v439_v59  ;;  %v4248_v5 = vcombine.low %v431_v58, %v439_v59  ;;  %v576_v58 = vld [vmem:[#allocation2 + $0xb18] sm:$0xff] }
  0x74   :  { %v584_v59 = vld [vmem:[#allocation2 + $0xb58] sm:$0xff] }
  0x75   :  { %2635 = vmatpush1.bf16.msra.mxu0 %v4291_v61  ;;  %v549_v61 = vld [vmem:[#allocation2 + $0xa40] sm:$0xff] }
  0x76   :  { %2673 = vmatprep.subr.bf16.mxu0 %v4159_v62  ;;  %v4263_v62 = vcombine.low %v447_v49, %v455_v50  ;;  %v4350_v23 = vcombine.high %v541_v60, %v549_v61  ;;  %v4349_v6 = vcombine.low %v541_v60, %v549_v61  ;;  %v318_v49 = vld [vmem:[#allocation2 + $0x308] sm:$0xff] }
  0x77   :  { %v326_v50 = vld [vmem:[#allocation2 + $0x348] sm:$0xff] }
  0x78   :  { %2653 = vmatmul.mubr.bf16.vlgmr.msra.gmra.mxu0 %v4844_v3  ;;  %v302_v60 = vld [vmem:[#allocation2 + $0x288] sm:$0xff] }
  0x79   :  { %2674 = vmatpush1.bf16.msra.mxu0 %v4158_v2  ;;  %2662 = vmatprep.mubr.bf16.mxu0 %v4720_v55  ;;  %v525_v2 = vld [vmem:[#allocation2 + $0x980] sm:$0xff]  ;;  %v310_v61 = vld [vmem:[#allocation2 + $0x2c8] sm:$0xff] }
  0x7a   :  { %2675 = vmatprep.subr.bf16.mxu0 %v4144_v4  ;;  %v533_v4 = vld [vmem:[#allocation2 + $0x9c0] sm:$0xff] }
  0x7b   :  { %v4334_v16 = vcombine.low %v525_v2, %v533_v4 }
  0x7d   :  { %2676 = vmatpush1.bf16.msra.mxu0 %v4143_v7 }
  0x7e   :  { %2677 = vmatprep.subr.bf16.mxu0 %v4129_v8  ;;  %v4335_v8 = vcombine.high %v525_v2, %v533_v4  ;;  %v4385_v2 = vcombine.low %v576_v58, %v584_v59  ;;  %v4126_v4 = vcombine.low %v302_v60, %v310_v61 }
  0x80   :  { %2663 = vmatmul.mubr.bf16.gmra.mxu0 %v4851_v12 }
  0x81   :  { %2678 = vmatpush1.bf16.msra.mxu0 %v4128_v11  ;;  %2705 = vmatprep.mubr.bf16.mxu0 %v4819_v13  ;;  %v509_v11 = vld [vmem:[#allocation2 + $0x900] sm:$0xff] }
  0x82   :  { %2679 = vmatprep.subr.bf16.mxu0 %v4114_v14  ;;  %v517_v14 = vld [vmem:[#allocation2 + $0x940] sm:$0xff] }
  0x83   :  { %v4319_v27 = vcombine.low %v509_v11, %v517_v14 }
  0x85   :  { %2680 = vmatpush1.bf16.msra.mxu0 %v4113_v17  ;;  %v4219_v17 = vcombine.high %v399_v9, %v407_v10  ;;  %v254_v10 = vld [vmem:[#allocation2 + $0x108] sm:$0xff] }
  0x86   :  { %2681 = vmatprep.subr.bf16.mxu0 %v4099_v18  ;;  %v4320_v18 = vcombine.high %v509_v11, %v517_v14  ;;  %v262_v11 = vld [vmem:[#allocation2 + $0x148] sm:$0xff] }
  0x89   :  { %2682 = vmatpush1.bf16.msra.mxu0 %v4098_v21  ;;  %v493_v21 = vld [vmem:[#allocation2 + $0x880] sm:$0xff] }
  0x8a   :  { %2683 = vmatprep.subr.bf16.mxu0 %v4084_v22  ;;  %v501_v22 = vld [vmem:[#allocation2 + $0x8c0] sm:$0xff] }
  0x8b   :  { %v4304_v37 = vcombine.low %v493_v21, %v501_v22 }
  0x8d   :  { %2684 = vmatpush1.bf16.msra.mxu0 %v4083_v28  ;;  %v4204_v28 = vcombine.high %v383_v19, %v391_v20 }
  0x8e   :  { %2685 = vmatprep.subr.bf16.mxu0 %v4069_v30  ;;  %v4305_v30 = vcombine.high %v493_v21, %v501_v22  ;;  %v230_v21 = vld [vmem:[#allocation2 + $0x48] sm:$0xff] }
  0x91   :  { %2686 = vmatpush1.bf16.msra.mxu0 %v4068_v34  ;;  %v477_v34 = vld [vmem:[#allocation2 + $0x800] sm:$0xff] }
  0x92   :  { %2687 = vmatprep.subr.bf16.mxu0 %v4054_v36  ;;  %v4203_v36 = vcombine.low %v383_v19, %v391_v20  ;;  %v222_v20 = vld [vmem:[#allocation2 + $0x8] sm:$0xff] }
  0x95   :  { %2688 = vmatpush1.bf16.msra.mxu0 %v4053_v44  ;;  %v342_v44 = vld [vmem:[#allocation2 + $0x3c8] sm:$0xff] }
  0x96   :  { %2689 = vmatprep.subr.bf16.mxu0 %v4279_v48 }
  0x99   :  { %2690 = vmatpush2.bf16.msra.mxu0 %v4278_v53  ;;  %v4173_v53 = vcombine.low %v351_v41, %v359_v42 }
  0x9a   :  { %2691 = vmatprep.subr.bf16.mxu0 %v4264_v56  ;;  %v4142_v56 = vcombine.high %v318_v49, %v326_v50 }
  0x9d   :  { %2692 = vmatpush2.bf16.msra.mxu0 %v4263_v62  ;;  %v4400_v62 = vcombine.low %v592_v51, %v600_v52 }
  0x9e   :  { %2693 = vmatprep.subr.bf16.mxu0 %v4249_v1  ;;  %v4386_v1 = vcombine.high %v576_v58, %v584_v59  ;;  %v512_v58 = vld [vmem:[#allocation2 + $0x918] sm:$0xff] }
  0x9f   :  { %v520_v59 = vld [vmem:[#allocation2 + $0x958] sm:$0xff] }
  0xa1   :  { %2694 = vmatpush2.bf16.msra.mxu0 %v4248_v5 }
  0xd7   :  { %v118_v38 = vpop.f32.mrf.mxu0 }
  0xd8   :  { %v119_v43 = vadd.f32 %v4039_v35, %v118_v38  ;;  %v485_v35 = vld [vmem:[#allocation2 + $0x840] sm:$0xff]  ;;  %v4189_v38 = vcombine.high %v367_v32, %v375_v33 }
  0xd9   :  { %v4547_v45 = vpop.f32.mrf.mxu0  ;;  %v4290_v40 = vcombine.high %v477_v34, %v485_v35 }
  0xda   :  { %v122_v46 = vmax.f32 %v119_v43, 0.0  ;;  %v334_v43 = vld [vmem:[#allocation2 + $0x388] sm:$0xff]  ;;  %v4188_v45 = vcombine.low %v367_v32, %v375_v33 }
  0xdb   :  { %v4157_v48 = vcombine.high %v334_v43, %v342_v44  ;;  %v446_v33 = vld [vmem:[#allocation2 + $0x708] sm:$0xff] }
  0xdc   :  { %4565 = vmatmul.mubr.msk.f32.vlgmr.msra.gmra.mxu1 %vm127_vm2, %v122_v46  ;;  %v4289_v46 = vcombine.low %v477_v34, %v485_v35  ;;  %v454_v34 = vld [vmem:[#allocation2 + $0x748] sm:$0xff] }
  0xdd   :  { %2515 = vmatpush1.bf16.msra.mxu1 %v4394_v25  ;;  %2546 = vmatprep.mubr.bf16.mxu1 %v4720_v55  ;;  %v423_v25 = vld [vmem:[#allocation2 + $0x650] sm:$0xff] }
  0xde   :  { %2516 = vmatprep.subr.bf16.mxu1 %v4380_v47  ;;  %v4234_v7 = vcombine.high %v415_v24, %v423_v25  ;;  %v4233_v15 = vcombine.low %v415_v24, %v423_v25  ;;  %v4174_v47 = vcombine.high %v351_v41, %v359_v42  ;;  %v286_v24 = vld [vmem:[#allocation2 + $0x208] sm:$0xff] }
  0xdf   :  { %v294_v25 = vld [vmem:[#allocation2 + $0x248] sm:$0xff] }
  0xe0   :  { %2695 = vmatprep.subr.bf16.mxu0 %v4234_v7  ;;  %v4112_v5 = vcombine.high %v286_v24, %v294_v25  ;;  %v278_v7 = vld [vmem:[#allocation2 + $0x1c8] sm:$0xff] }
  0xe1   :  { %2517 = vmatpush1.bf16.msra.mxu1 %v4379_v54  ;;  %2696 = vmatpush2.bf16.msra.mxu0 %v4233_v15  ;;  %v4156_v54 = vcombine.low %v334_v43, %v342_v44  ;;  %v4082_v15 = vcombine.high %v254_v10, %v262_v11  ;;  %v430_v41 = vld [vmem:[#allocation2 + $0x688] sm:$0xff]  ;;  %v4261_v44 = vcombine.low %v446_v33, %v454_v34 }
  0xe2   :  { %2518 = vmatprep.subr.bf16.mxu1 %v4365_v57  ;;  %2697 = vmatprep.subr.bf16.mxu0 %v4219_v17  ;;  %v4401_v57 = vcombine.high %v592_v51, %v600_v52  ;;  %v246_v17 = vld [vmem:[#allocation2 + $0xc8] sm:$0xff]  ;;  %v528_v52 = vld [vmem:[#allocation2 + $0x998] sm:$0xff] }
  0xe3   :  { %v438_v42 = vld [vmem:[#allocation2 + $0x6c8] sm:$0xff] }
  0xe4   :  { %v422_v51 = vld [vmem:[#allocation2 + $0x648] sm:$0xff] }
  0xe5   :  { %2519 = vmatpush1.bf16.msra.mxu1 %v4364_v63  ;;  %2698 = vmatpush2.bf16.msra.mxu0 %v4218_v26  ;;  %v4141_v63 = vcombine.low %v318_v49, %v326_v50  ;;  %v4052_v26 = vcombine.high %v222_v20, %v230_v21  ;;  %v414_v50 = vld [vmem:[#allocation2 + $0x608] sm:$0xff] }
  0xe6   :  { %2520 = vmatprep.subr.bf16.mxu1 %v4350_v23  ;;  %2699 = vmatprep.subr.bf16.mxu0 %v4204_v28  ;;  %v4127_v23 = vcombine.high %v302_v60, %v310_v61  ;;  %v470_v28 = vld [vmem:[#allocation2 + $0x7c8] sm:$0xff]  ;;  %v4232_v60 = vcombine.high %v414_v50, %v422_v51 }
  0xe7   :  { %v398_v61 = vld [vmem:[#allocation2 + $0x588] sm:$0xff] }
  0xe9   :  { %2521 = vmatpush1.bf16.msra.mxu1 %v4349_v6  ;;  %2700 = vmatpush2.bf16.msra.mxu0 %v4203_v36  ;;  %v270_v6 = vld [vmem:[#allocation2 + $0x188] sm:$0xff]  ;;  %v560_v36 = vld [vmem:[#allocation2 + $0xa98] sm:$0xff] }
  0xea   :  { %2522 = vmatprep.subr.bf16.mxu1 %v4335_v8  ;;  %2701 = vmatprep.subr.bf16.mxu0 %v4189_v38  ;;  %v4111_v8 = vcombine.low %v286_v24, %v294_v25  ;;  %v4097_v9 = vcombine.high %v270_v6, %v278_v7  ;;  %v4096_v14 = vcombine.low %v270_v6, %v278_v7  ;;  %v390_v6 = vld [vmem:[#allocation2 + $0x548] sm:$0xff]  ;;  %v480_v7 = vld [vmem:[#allocation2 + $0x818] sm:$0xff] }
  0xeb   :  { %v4262_v38 = vcombine.high %v446_v33, %v454_v34  ;;  %v4231_v24 = vcombine.low %v414_v50, %v422_v51  ;;  %v4325_v25 = vcombine.low %v512_v58, %v520_v59 }
  0xed   :  { %2523 = vmatpush1.bf16.msra.mxu1 %v4334_v16  ;;  %2702 = vmatpush2.bf16.msra.mxu0 %v4188_v45  ;;  %v238_v16 = vld [vmem:[#allocation2 + $0x88] sm:$0xff]  ;;  %v544_v45 = vld [vmem:[#allocation2 + $0xa18] sm:$0xff] }
  0xee   :  { %2524 = vmatprep.subr.bf16.mxu1 %v4320_v18  ;;  %2703 = vmatprep.subr.bf16.mxu0 %v4174_v47  ;;  %v4081_v18 = vcombine.low %v254_v10, %v262_v11  ;;  %v4067_v19 = vcombine.high %v238_v16, %v246_v17  ;;  %v4066_v22 = vcombine.low %v238_v16, %v246_v17  ;;  %v374_v16 = vld [vmem:[#allocation2 + $0x4c8] sm:$0xff]  ;;  %v337_v17 = vld [vmem:[#allocation2 + $0x3a0] sm:$0xff] }
  0xef   :  { %v4247_v47 = vcombine.high %v430_v41, %v438_v42 }
  0xf1   :  { %2525 = vmatpush1.bf16.msra.mxu1 %v4319_v27  ;;  %2704 = vmatpush2.bf16.msra.mxu0 %v4173_v53  ;;  %v462_v27 = vld [vmem:[#allocation2 + $0x788] sm:$0xff]  ;;  %v536_v53 = vld [vmem:[#allocation2 + $0x9d8] sm:$0xff] }
  0xf2   :  { %2526 = vmatprep.subr.bf16.mxu1 %v4305_v30  ;;  %2832 = vmatprep.subr.bf16.mxu0 %v4401_v57  ;;  %v4051_v30 = vcombine.low %v222_v20, %v230_v21  ;;  %v4277_v32 = vcombine.high %v462_v27, %v470_v28  ;;  %v4276_v35 = vcombine.low %v462_v27, %v470_v28  ;;  %v358_v27 = vld [vmem:[#allocation2 + $0x448] sm:$0xff]  ;;  %v321_v28 = vld [vmem:[#allocation2 + $0x320] sm:$0xff] }
  0xf3   :  { %v4341_v57 = vcombine.high %v528_v52, %v536_v53 }
  0xf4   :  { %2706 = vmatmul.mubr.bf16.vlgmr.msra.gmra.mxu0 %v4825_v29 }
  0xf5   :  { %2527 = vmatpush1.bf16.msra.mxu1 %v4304_v37  ;;  %2833 = vmatpush1.bf16.msra.mxu0 %v4400_v62  ;;  %v568_v37 = vld [vmem:[#allocation2 + $0xad8] sm:$0xff]  ;;  %v4326_v62 = vcombine.high %v512_v58, %v520_v59 }
  0xf6   :  { %2528 = vmatprep.subr.bf16.mxu1 %v4290_v40  ;;  %2715 = vmatprep.mubr.bf16.mxu0 %v4830_v31  ;;  %v4371_v40 = vcombine.high %v560_v36, %v568_v37  ;;  %v4370_v43 = vcombine.low %v560_v36, %v568_v37  ;;  %v599_v37 = vld [vmem:[#allocation2 + $0xbd0] sm:$0xff] }
  0xf7   :  { %2834 = vmatprep.subr.bf16.mxu0 %v4386_v1  ;;  %v496_v1 = vld [vmem:[#allocation2 + $0x898] sm:$0xff] }
  0xf9   :  { %2529 = vmatpush1.bf16.msra.mxu1 %v4289_v46  ;;  %2835 = vmatpush1.bf16.msra.mxu0 %v4385_v2  ;;  %v552_v46 = vld [vmem:[#allocation2 + $0xa58] sm:$0xff] }
  0xfa   :  { %2567 = vmatprep.subr.bf16.mxu1 %v4157_v48  ;;  %2836 = vmatprep.subr.bf16.mxu0 %v4371_v40  ;;  %v4355_v48 = vcombine.low %v544_v45, %v552_v46  ;;  %v4356_v49 = vcombine.high %v544_v45, %v552_v46  ;;  %v313_v40 = vld [vmem:[#allocation2 + $0x2e0] sm:$0xff]  ;;  %v575_v45 = vld [vmem:[#allocation2 + $0xb10] sm:$0xff] }
  0xfb   :  { %v583_v46 = vld [vmem:[#allocation2 + $0xb50] sm:$0xff] }
  0xfc   :  { %2547 = vmatmul.mubr.bf16.vlgmr.msra.gmra.mxu1 %v4844_v3  ;;  %2716 = vmatmul.mubr.bf16.gmra.mxu0 %v4837_v39  ;;  %v4384_v50 = vcombine.high %v575_v45, %v583_v46  ;;  %v4383_v58 = vcombine.low %v575_v45, %v583_v46 }
  0xfd   :  { %2568 = vmatpush1.bf16.msra.mxu1 %v4156_v54  ;;  %2556 = vmatprep.mubr.bf16.mxu1 %v4720_v55  ;;  %v4246_v54 = vcombine.low %v430_v41, %v438_v42 }
  0xfe   :  { %2569 = vmatprep.subr.bf16.mxu1 %v4142_v56  ;;  %2864 = vmatprep.mubr.bf16.mxu0 %v4720_v55  ;;  %v4340_v56 = vcombine.low %v528_v52, %v536_v53  ;;  %v559_v52 = vld [vmem:[#allocation2 + $0xa90] sm:$0xff] }
  0xff   :  { %2837 = vmatpush1.bf16.msra.mxu0 %v4370_v43  ;;  %v567_v53 = vld [vmem:[#allocation2 + $0xad0] sm:$0xff] }
 0x100   :  { %2838 = vmatprep.subr.bf16.mxu0 %v4356_v49  ;;  %v4369_v59 = vcombine.high %v559_v52, %v567_v53 }
 0x101   :  { %2570 = vmatpush1.bf16.msra.mxu1 %v4141_v63  ;;  %v406_v63 = vld [vmem:[#allocation2 + $0x5c8] sm:$0xff] }
 0x102   :  { %2571 = vmatprep.subr.bf16.mxu1 %v4127_v23  ;;  %v504_v23 = vld [vmem:[#allocation2 + $0x8d8] sm:$0xff]  ;;  %v4217_v2 = vcombine.high %v398_v61, %v406_v63 }
 0x103   :  { %2839 = vmatpush1.bf16.msra.mxu0 %v4355_v48  ;;  %v4310_v10 = vcombine.low %v496_v1, %v504_v23  ;;  %v297_v48 = vld [vmem:[#allocation2 + $0x260] sm:$0xff] }
 0x104   :  { %2557 = vmatmul.mubr.bf16.gmra.mxu1 %v4851_v12  ;;  %2840 = vmatprep.subr.bf16.mxu0 %v4341_v57  ;;  %v281_v57 = vld [vmem:[#allocation2 + $0x1e0] sm:$0xff] }
 0x105   :  { %2572 = vmatpush1.bf16.msra.mxu1 %v4126_v4  ;;  %2599 = vmatprep.mubr.bf16.mxu1 %v4819_v13  ;;  %v382_v4 = vld [vmem:[#allocation2 + $0x508] sm:$0xff] }
 0x106   :  { %2573 = vmatprep.subr.bf16.mxu1 %v4112_v5  ;;  %v4311_v5 = vcombine.high %v496_v1, %v504_v23  ;;  %v4202_v11 = vcombine.high %v382_v4, %v390_v6  ;;  %v257_v1 = vld [vmem:[#allocation2 + $0x120] sm:$0xff]  ;;  %v4368_v23 = vcombine.low %v559_v52, %v567_v53 }
 0x107   :  { %2841 = vmatpush1.bf16.msra.mxu0 %v4340_v56  ;;  %v273_v56 = vld [vmem:[#allocation2 + $0x1a0] sm:$0xff] }
 0x108   :  { %2842 = vmatprep.subr.bf16.mxu0 %v4326_v62  ;;  %v551_v62 = vld [vmem:[#allocation2 + $0xa50] sm:$0xff]  ;;  %v425_v52 = vld [vmem:[#allocation2 + $0x660] sm:$0xff] }
 0x109   :  { %2574 = vmatpush1.bf16.msra.mxu1 %v4111_v8  ;;  %v488_v8 = vld [vmem:[#allocation2 + $0x858] sm:$0xff] }
 0x10a   :  { %2575 = vmatprep.subr.bf16.mxu1 %v4097_v9  ;;  %v4216_v9 = vcombine.low %v398_v61, %v406_v63  ;;  %v4295_v20 = vcombine.low %v480_v7, %v488_v8  ;;  %v543_v61 = vld [vmem:[#allocation2 + $0xa10] sm:$0xff]  ;;  %v4103_v63 = vcombine.high %v273_v56, %v281_v57 }
 0x10b   :  { %2843 = vmatpush1.bf16.msra.mxu0 %v4325_v25  ;;  %v4102_v25 = vcombine.low %v273_v56, %v281_v57  ;;  %v304_v57 = vld [vmem:[#allocation2 + $0x298] sm:$0xff] }
 0x10c   :  { %2844 = vmatprep.subr.bf16.mxu0 %v4311_v5  ;;  %v241_v5 = vld [vmem:[#allocation2 + $0xa0] sm:$0xff] }
 0x10d   :  { %2576 = vmatpush1.bf16.msra.mxu1 %v4096_v14  ;;  %v366_v14 = vld [vmem:[#allocation2 + $0x488] sm:$0xff] }
 0x10e   :  { %2577 = vmatprep.subr.bf16.mxu1 %v4082_v15  ;;  %v4296_v15 = vcombine.high %v480_v7, %v488_v8  ;;  %v4187_v21 = vcombine.high %v366_v14, %v374_v16  ;;  %v4353_v7 = vcombine.low %v543_v61, %v551_v62 }
 0x10f   :  { %2845 = vmatpush1.bf16.msra.mxu0 %v4310_v10  ;;  %v519_v10 = vld [vmem:[#allocation2 + $0x950] sm:$0xff] }
 0x110   :  { %2846 = vmatprep.subr.bf16.mxu0 %v4296_v15  ;;  %v233_v15 = vld [vmem:[#allocation2 + $0x60] sm:$0xff] }
 0x111   :  { %2578 = vmatpush1.bf16.msra.mxu1 %v4081_v18  ;;  %v345_v18 = vld [vmem:[#allocation2 + $0x3e0] sm:$0xff] }
 0x112   :  { %2579 = vmatprep.subr.bf16.mxu1 %v4067_v19  ;;  %v4201_v19 = vcombine.low %v382_v4, %v390_v6  ;;  %v4162_v33 = vcombine.low %v337_v17, %v345_v18  ;;  %v249_v6 = vld [vmem:[#allocation2 + $0xe0] sm:$0xff] }
 0x113   :  { %2847 = vmatpush1.bf16.msra.mxu0 %v4295_v20 }
 0x115   :  { %2580 = vmatpush1.bf16.msra.mxu1 %v4066_v22  ;;  %v350_v22 = vld [vmem:[#allocation2 + $0x408] sm:$0xff] }
 0x116   :  { %2581 = vmatprep.subr.bf16.mxu1 %v4052_v26  ;;  %v4163_v26 = vcombine.high %v337_v17, %v345_v18  ;;  %v4172_v34 = vcombine.high %v350_v22, %v358_v27  ;;  %2865 = vmatmul.mubr.bf16.vlgmr.msra.gmra.mxu0 %v4844_v3  ;;  %v4171_v41 = vcombine.low %v350_v22, %v358_v27  ;;  %v495_v18 = vld [vmem:[#allocation2 + $0x890] sm:$0xff]  ;;  %v473_v22 = vld [vmem:[#allocation2 + $0x7e0] sm:$0xff] }
 0x117   :  { %2874 = vmatprep.mubr.bf16.mxu0 %v4720_v55  ;;  %v4072_v17 = vcombine.low %v241_v5, %v249_v6 }
 0x118   :  { %2885 = vmatprep.subr.bf16.mxu0 %v4163_v26 }
 0x119   :  { %2582 = vmatpush1.bf16.msra.mxu1 %v4051_v30  ;;  %v329_v30 = vld [vmem:[#allocation2 + $0x360] sm:$0xff]  ;;  %2886 = vmatpush1.bf16.msra.mxu0 %v4162_v33 }
 0x11a   :  { %2583 = vmatprep.subr.bf16.mxu1 %v4277_v32  ;;  %v4186_v32 = vcombine.low %v366_v14, %v374_v16  ;;  %v4148_v36 = vcombine.high %v321_v28, %v329_v30  ;;  %v4147_v42 = vcombine.low %v321_v28, %v329_v30  ;;  %v225_v14 = vld [vmem:[#allocation2 + $0x20] sm:$0xff]  ;;  %v479_v30 = vld [vmem:[#allocation2 + $0x810] sm:$0xff] }
 0x11b   :  { %v4058_v20 = vcombine.high %v225_v14, %v233_v15  ;;  %v4057_v28 = vcombine.low %v225_v14, %v233_v15  ;;  %v256_v15 = vld [vmem:[#allocation2 + $0x118] sm:$0xff] }
 0x11c   :  { %2887 = vmatprep.subr.bf16.mxu0 %v4148_v36 }
 0x11d   :  { %2584 = vmatpush2.bf16.msra.mxu1 %v4276_v35  ;;  %v591_v35 = vld [vmem:[#allocation2 + $0xb90] sm:$0xff]  ;;  %2888 = vmatpush1.bf16.msra.mxu0 %v4147_v42 }
 0x11e   :  { %2585 = vmatprep.subr.bf16.mxu1 %v4262_v38  ;;  %v305_v38 = vld [vmem:[#allocation2 + $0x2a0] sm:$0xff]  ;;  %v4399_v43 = vcombine.high %v591_v35, %v599_v37  ;;  %v4398_v49 = vcombine.low %v591_v35, %v599_v37  ;;  %2875 = vmatmul.mubr.bf16.gmra.mxu0 %v4851_v12 }
 0x11f   :  { %v4132_v51 = vcombine.low %v305_v38, %v313_v40  ;;  %2917 = vmatprep.mubr.bf16.mxu0 %v4819_v13  ;;  %v457_v35 = vld [vmem:[#allocation2 + $0x760] sm:$0xff] }
 0x121   :  { %2586 = vmatpush2.bf16.msra.mxu1 %v4261_v44  ;;  %v4133_v44 = vcombine.high %v305_v38, %v313_v40  ;;  %v336_v40 = vld [vmem:[#allocation2 + $0x398] sm:$0xff] }
 0x122   :  { %2587 = vmatprep.subr.bf16.mxu1 %v4247_v47  ;;  %v289_v47 = vld [vmem:[#allocation2 + $0x220] sm:$0xff] }
 0x123   :  { %2889 = vmatprep.subr.bf16.mxu0 %v4133_v44  ;;  %v441_v44 = vld [vmem:[#allocation2 + $0x6e0] sm:$0xff] }
 0x124   :  { %2890 = vmatpush1.bf16.msra.mxu0 %v4132_v51  ;;  %v417_v51 = vld [vmem:[#allocation2 + $0x620] sm:$0xff] }
 0x125   :  { %2588 = vmatpush2.bf16.msra.mxu1 %v4246_v54  ;;  %v4118_v54 = vcombine.high %v289_v47, %v297_v48 }
 0x126   :  { %2589 = vmatprep.subr.bf16.mxu1 %v4232_v60  ;;  %v4117_v60 = vcombine.low %v289_v47, %v297_v48  ;;  %v320_v48 = vld [vmem:[#allocation2 + $0x318] sm:$0xff] }
 0x127   :  { %2891 = vmatprep.subr.bf16.mxu0 %v4118_v54 }
 0x128   :  { %2892 = vmatpush1.bf16.msra.mxu0 %v4117_v60  ;;  %v401_v60 = vld [vmem:[#allocation2 + $0x5a0] sm:$0xff] }
 0x129   :  { %2590 = vmatpush2.bf16.msra.mxu1 %v4231_v24  ;;  %v4354_v24 = vcombine.high %v543_v61, %v551_v62  ;;  %2893 = vmatprep.subr.bf16.mxu0 %v4103_v63  ;;  %v409_v61 = vld [vmem:[#allocation2 + $0x5e0] sm:$0xff] }
 0x12a   :  { %2591 = vmatprep.subr.bf16.mxu1 %v4217_v2  ;;  %v527_v2 = vld [vmem:[#allocation2 + $0x990] sm:$0xff] }
 0x12c   :  { %2894 = vmatpush1.bf16.msra.mxu0 %v4102_v25  ;;  %v385_v25 = vld [vmem:[#allocation2 + $0x520] sm:$0xff] }
 0x12d   :  { %2592 = vmatpush2.bf16.msra.mxu1 %v4216_v9  ;;  %v511_v9 = vld [vmem:[#allocation2 + $0x910] sm:$0xff] }
 0x12e   :  { %2593 = vmatprep.subr.bf16.mxu1 %v4202_v11  ;;  %v4073_v11 = vcombine.high %v241_v5, %v249_v6  ;;  %v4323_v26 = vcombine.low %v511_v9, %v519_v10  ;;  %v272_v5 = vld [vmem:[#allocation2 + $0x198] sm:$0xff] }
 0x12f   :  { %v280_v6 = vld [vmem:[#allocation2 + $0x1d8] sm:$0xff] }
 0x131   :  { %2594 = vmatpush2.bf16.msra.mxu1 %v4201_v19  ;;  %v503_v19 = vld [vmem:[#allocation2 + $0x8d0] sm:$0xff] }
 0x132   :  { %2595 = vmatprep.subr.bf16.mxu1 %v4187_v21  ;;  %v465_v21 = vld [vmem:[#allocation2 + $0x7a0] sm:$0xff]  ;;  %v4309_v27 = vcombine.high %v495_v18, %v503_v19  ;;  %v4308_v36 = vcombine.low %v495_v18, %v503_v19  ;;  %v4100_v18 = vcombine.low %v272_v5, %v280_v6 }
 0x133   :  { %v4283_v33 = vcombine.high %v465_v21, %v473_v22  ;;  %v4282_v38 = vcombine.low %v465_v21, %v473_v22  ;;  %v240_v21 = vld [vmem:[#allocation2 + $0x98] sm:$0xff] }
 0x134   :  { %v248_v22 = vld [vmem:[#allocation2 + $0xd8] sm:$0xff] }
 0x135   :  { %2596 = vmatpush2.bf16.msra.mxu1 %v4186_v32  ;;  %v487_v32 = vld [vmem:[#allocation2 + $0x850] sm:$0xff] }
 0x136   :  { %2597 = vmatprep.subr.bf16.mxu1 %v4172_v34  ;;  %v449_v34 = vld [vmem:[#allocation2 + $0x720] sm:$0xff]  ;;  %v4294_v37 = vcombine.high %v479_v30, %v487_v32  ;;  %v4293_v45 = vcombine.low %v479_v30, %v487_v32  ;;  %v4071_v32 = vcombine.high %v240_v21, %v248_v22 }
 0x137   :  { %v4268_v42 = vcombine.high %v449_v34, %v457_v35  ;;  %v4267_v47 = vcombine.low %v449_v34, %v457_v35  ;;  %v224_v34 = vld [vmem:[#allocation2 + $0x18] sm:$0xff] }
 0x138   :  { %v232_v35 = vld [vmem:[#allocation2 + $0x58] sm:$0xff] }
 0x139   :  { %2598 = vmatpush2.bf16.msra.mxu1 %v4171_v41  ;;  %v344_v41 = vld [vmem:[#allocation2 + $0x3d8] sm:$0xff] }
 0x13a   :  { %2726 = vmatprep.subr.bf16.mxu1 %v4399_v43  ;;  %v433_v43 = vld [vmem:[#allocation2 + $0x6a0] sm:$0xff]  ;;  %v4161_v46 = vcombine.high %v336_v40, %v344_v41  ;;  %v4160_v53 = vcombine.low %v336_v40, %v344_v41  ;;  %v4070_v40 = vcombine.low %v240_v21, %v248_v22  ;;  %v4056_v41 = vcombine.high %v224_v34, %v232_v35  ;;  %v482_v22 = vld [vmem:[#allocation2 + $0x828] sm:$0xff] }
 0x13b   :  { %v4252_v56 = vcombine.low %v433_v43, %v441_v44 }
 0x13c   :  { %2600 = vmatmul.mubr.bf16.vlgmr.msra.gmra.mxu1 %v4825_v29  ;;  %v265_v29 = vld [vmem:[#allocation2 + $0x160] sm:$0xff] }
 0x13d   :  { %2727 = vmatpush1.bf16.msra.mxu1 %v4398_v49  ;;  %2609 = vmatprep.mubr.bf16.mxu1 %v4830_v31  ;;  %v535_v31 = vld [vmem:[#allocation2 + $0x9d0] sm:$0xff]  ;;  %v4088_v4 = vcombine.high %v257_v1, %v265_v29  ;;  %v4087_v8 = vcombine.low %v257_v1, %v265_v29  ;;  %v328_v49 = vld [vmem:[#allocation2 + $0x358] sm:$0xff]  ;;  %v4237_v1 = vcombine.low %v417_v51, %v425_v52 }
 0x13e   :  { %2728 = vmatprep.subr.bf16.mxu1 %v4384_v50  ;;  %v4339_v13 = vcombine.high %v527_v2, %v535_v31  ;;  %v4338_v16 = vcombine.low %v527_v2, %v535_v31  ;;  %v4253_v50 = vcombine.high %v433_v43, %v441_v44  ;;  %v4146_v54 = vcombine.high %v320_v48, %v328_v49  ;;  %v288_v29 = vld [vmem:[#allocation2 + $0x218] sm:$0xff]  ;;  %v393_v2 = vld [vmem:[#allocation2 + $0x560] sm:$0xff] }
 0x13f   :  { %2895 = vmatprep.subr.bf16.mxu0 %v4088_v4  ;;  %v4145_v62 = vcombine.low %v320_v48, %v328_v49  ;;  %v4222_v4 = vcombine.low %v401_v60, %v409_v61  ;;  %v4207_v14 = vcombine.low %v385_v25, %v393_v2  ;;  %v464_v43 = vld [vmem:[#allocation2 + $0x798] sm:$0xff]  ;;  %v4055_v48 = vcombine.low %v224_v34, %v232_v35  ;;  %v4890_v49 = vld [vmem:[%s5177_s0] ss:$12 sps:$4 sm:$0xff]   ;;  %v339_v35 = vld [vmem:[#allocation2 + $0x3b0] sm:$0xff] }
 0x140   :  { %2896 = vmatpush1.bf16.msra.mxu0 %v4087_v8  ;;  %v377_v8 = vld [vmem:[#allocation2 + $0x4e0] sm:$0xff]  ;;  %v472_v44 = vld [vmem:[#allocation2 + $0x7d8] sm:$0xff] }
 0x141   :  { %2729 = vmatpush1.bf16.msra.mxu1 %v4383_v58  ;;  %2897 = vmatprep.subr.bf16.mxu0 %v4073_v11  ;;  %v312_v58 = vld [vmem:[#allocation2 + $0x2d8] sm:$0xff]  ;;  %v4101_v11 = vcombine.high %v272_v5, %v280_v6  ;;  %v514_v6 = vld [vmem:[#allocation2 + $0x928] sm:$0xff] }
 0x142   :  { %2730 = vmatprep.subr.bf16.mxu1 %v4369_v59  ;;  %v4238_v59 = vcombine.high %v417_v51, %v425_v52  ;;  %v4131_v63 = vcombine.high %v304_v57, %v312_v58  ;;  %v4130_v31 = vcombine.low %v304_v57, %v312_v58  ;;  %v448_v52 = vld [vmem:[#allocation2 + $0x718] sm:$0xff]  ;;  %v546_v57 = vld [vmem:[#allocation2 + $0xa28] sm:$0xff] }
 0x143   :  { %v554_v58 = vld [vmem:[#allocation2 + $0xa68] sm:$0xff] }
 0x144   :  { %2610 = vmatmul.mubr.bf16.gmra.mxu1 %v4837_v39  ;;  %v4324_v39 = vcombine.high %v511_v9, %v519_v10  ;;  %2898 = vmatpush1.bf16.msra.mxu0 %v4072_v17  ;;  %v4884_v10 = vld [vmem:[%s5177_s0 + $0x4] ss:$12 sps:$4 sm:$0xff]  }
 0x145   :  { %2731 = vmatpush1.bf16.msra.mxu1 %v4368_v23  ;;  %2758 = vmatprep.mubr.bf16.mxu1 %v4720_v55  ;;  %v296_v23 = vld [vmem:[#allocation2 + $0x258] sm:$0xff]  ;;  %v361_v17 = vld [vmem:[#allocation2 + $0x460] sm:$0xff] }
 0x146   :  { %2732 = vmatprep.subr.bf16.mxu1 %v4354_v24  ;;  %2899 = vmatprep.subr.bf16.mxu0 %v4058_v20  ;;  %v4223_v24 = vcombine.high %v401_v60, %v409_v61  ;;  %v4115_v9 = vcombine.low %v288_v29, %v296_v23 }
 0x148   :  { %2900 = vmatpush1.bf16.msra.mxu0 %v4057_v28  ;;  %v602_v28 = vld [vmem:[#allocation2 + $0xbe8] sm:$0xff] }
 0x149   :  { %2733 = vmatpush1.bf16.msra.mxu1 %v4353_v7  ;;  %2901 = vmatprep.subr.bf16.mxu0 %v4283_v33  ;;  %v4208_v7 = vcombine.high %v385_v25, %v393_v2  ;;  %v4902_v25 = vld [vmem:[%s5177_s0 + $0x18] ss:$12 sps:$4 sm:$0xff]  }
 0x14a   :  { %2734 = vmatprep.subr.bf16.mxu1 %v4339_v13  ;;  %v369_v13 = vld [vmem:[#allocation2 + $0x4a0] sm:$0xff] }
 0x14b   :  { %v4192_v20 = vcombine.low %v369_v13, %v377_v8 }
 0x14c   :  { %2902 = vmatpush2.bf16.msra.mxu0 %v4282_v38  ;;  %v586_v38 = vld [vmem:[#allocation2 + $0xb68] sm:$0xff] }
 0x14d   :  { %2735 = vmatpush1.bf16.msra.mxu1 %v4338_v16  ;;  %2903 = vmatprep.subr.bf16.mxu0 %v4268_v42  ;;  %v264_v16 = vld [vmem:[#allocation2 + $0x158] sm:$0xff] }
 0x14e   :  { %2736 = vmatprep.subr.bf16.mxu1 %v4324_v39  ;;  %v4193_v39 = vcombine.high %v369_v13, %v377_v8  ;;  %v4086_v19 = vcombine.high %v256_v15, %v264_v16  ;;  %v4085_v30 = vcombine.low %v256_v15, %v264_v16  ;;  %v498_v16 = vld [vmem:[#allocation2 + $0x8a8] sm:$0xff] }
 0x150   :  { %2904 = vmatpush2.bf16.msra.mxu0 %v4267_v47  ;;  %v570_v47 = vld [vmem:[#allocation2 + $0xae8] sm:$0xff] }
 0x151   :  { %2737 = vmatpush1.bf16.msra.mxu1 %v4323_v26  ;;  %2905 = vmatprep.subr.bf16.mxu0 %v4253_v50  ;;  %v4281_v50 = vcombine.high %v464_v43, %v472_v44 }
 0x152   :  { %2738 = vmatprep.subr.bf16.mxu1 %v4309_v27  ;;  %v594_v27 = vld [vmem:[#allocation2 + $0xba8] sm:$0xff] }
 0x153   :  { %v4404_v42 = vcombine.low %v594_v27, %v602_v28 }
 0x154   :  { %2906 = vmatpush2.bf16.msra.mxu0 %v4252_v56 }
 0x155   :  { %2739 = vmatpush1.bf16.msra.mxu1 %v4308_v36  ;;  %2907 = vmatprep.subr.bf16.mxu0 %v4238_v59  ;;  %v4405_v36 = vcombine.high %v594_v27, %v602_v28  ;;  %v4280_v59 = vcombine.low %v464_v43, %v472_v44  ;;  %v323_v44 = vld [vmem:[#allocation2 + $0x330] sm:$0xff] }
 0x156   :  { %2740 = vmatprep.subr.bf16.mxu1 %v4294_v37  ;;  %v578_v37 = vld [vmem:[#allocation2 + $0xb28] sm:$0xff] }
 0x157   :  { %v4389_v51 = vcombine.low %v578_v37, %v586_v38 }
 0x158   :  { %2908 = vmatpush2.bf16.msra.mxu0 %v4237_v1  ;;  %v4360_v1 = vcombine.high %v546_v57, %v554_v58 }
 0x159   :  { %2741 = vmatpush1.bf16.msra.mxu1 %v4293_v45  ;;  %2909 = vmatprep.subr.bf16.mxu0 %v4223_v24  ;;  %v4390_v45 = vcombine.high %v578_v37, %v586_v38 }
 0x15a   :  { %2779 = vmatprep.subr.bf16.mxu1 %v4161_v46  ;;  %v562_v46 = vld [vmem:[#allocation2 + $0xaa8] sm:$0xff] }
 0x15b   :  { %v4375_v56 = vcombine.high %v562_v46, %v570_v47  ;;  %v4374_v61 = vcombine.low %v562_v46, %v570_v47 }
 0x15c   :  { %2759 = vmatmul.mubr.bf16.vlgmr.msra.gmra.mxu1 %v4844_v3  ;;  %v4116_v3 = vcombine.high %v288_v29, %v296_v23  ;;  %2910 = vmatpush2.bf16.msra.mxu0 %v4222_v4  ;;  %v530_v29 = vld [vmem:[#allocation2 + $0x9a8] sm:$0xff]  ;;  %v424_v4 = vld [vmem:[#allocation2 + $0x658] sm:$0xff] }
 0x15d   :  { %2780 = vmatpush1.bf16.msra.mxu1 %v4160_v53  ;;  %2768 = vmatprep.mubr.bf16.mxu1 %v4720_v55  ;;  %v456_v53 = vld [vmem:[#allocation2 + $0x758] sm:$0xff]  ;;  %v538_v23 = vld [vmem:[#allocation2 + $0x9e8] sm:$0xff] }
 0x15e   :  { %2781 = vmatprep.subr.bf16.mxu1 %v4146_v54  ;;  %2911 = vmatprep.subr.bf16.mxu0 %v4208_v7  ;;  %v4896_v54 = vld [vmem:[%s5177_s0 + $0x1c] ss:$12 sps:$4 sm:$0xff]   ;;  %v4266_v60 = vcombine.high %v448_v52, %v456_v53  ;;  %v4265_v24 = vcombine.low %v448_v52, %v456_v53  ;;  %v4345_v5 = vcombine.high %v530_v29, %v538_v23  ;;  %v307_v53 = vld [vmem:[#allocation2 + $0x2b0] sm:$0xff] }
 0x15f   :  { %v522_v7 = vld [vmem:[#allocation2 + $0x968] sm:$0xff] }
 0x160   :  { %2912 = vmatpush2.bf16.msra.mxu0 %v4207_v14  ;;  %v408_v14 = vld [vmem:[#allocation2 + $0x5d8] sm:$0xff]  ;;  %v4330_v15 = vcombine.high %v514_v6, %v522_v7 }
 0x161   :  { %2782 = vmatpush1.bf16.msra.mxu1 %v4145_v62  ;;  %2913 = vmatprep.subr.bf16.mxu0 %v4193_v39  ;;  %v432_v62 = vld [vmem:[#allocation2 + $0x698] sm:$0xff]  ;;  %v506_v39 = vld [vmem:[#allocation2 + $0x8e8] sm:$0xff] }
 0x162   :  { %2783 = vmatprep.subr.bf16.mxu1 %v4131_v63  ;;  %v440_v63 = vld [vmem:[#allocation2 + $0x6d8] sm:$0xff]  ;;  %v4315_v21 = vcombine.high %v498_v16, %v506_v39 }
 0x163   :  { %v4251_v2 = vcombine.high %v432_v62, %v440_v63  ;;  %v4250_v13 = vcombine.low %v432_v62, %v440_v63  ;;  %v585_v62 = vld [vmem:[#allocation2 + $0xb60] sm:$0xff] }
 0x164   :  { %2769 = vmatmul.mubr.bf16.gmra.mxu1 %v4851_v12  ;;  %v353_v12 = vld [vmem:[#allocation2 + $0x420] sm:$0xff]  ;;  %2914 = vmatpush2.bf16.msra.mxu0 %v4192_v20  ;;  %v392_v20 = vld [vmem:[#allocation2 + $0x558] sm:$0xff] }
 0x165   :  { %2784 = vmatpush1.bf16.msra.mxu1 %v4130_v31  ;;  %2811 = vmatprep.mubr.bf16.mxu1 %v4884_v10  ;;  %v4178_v26 = vcombine.high %v353_v12, %v361_v17  ;;  %v4177_v33 = vcombine.low %v353_v12, %v361_v17  ;;  %v4359_v31 = vcombine.low %v546_v57, %v554_v58  ;;  %v4909_v58 = vld [vmem:[%s5177_s0 + $0x8] ss:$12 sps:$4 sm:$0xff]  }
 0x166   :  { %2785 = vmatprep.subr.bf16.mxu1 %v4116_v3  ;;  %v416_v3 = vld [vmem:[#allocation2 + $0x618] sm:$0xff] }
 0x167   :  { %2915 = vmatprep.subr.bf16.mxu0 %v4178_v26  ;;  %v4236_v8 = vcombine.high %v416_v3, %v424_v4  ;;  %v4235_v12 = vcombine.low %v416_v3, %v424_v4  ;;  %v490_v26 = vld [vmem:[#allocation2 + $0x868] sm:$0xff]  ;;  %v561_v3 = vld [vmem:[#allocation2 + $0xaa0] sm:$0xff] }
 0x168   :  { %2916 = vmatpush2.bf16.msra.mxu0 %v4177_v33  ;;  %v376_v33 = vld [vmem:[#allocation2 + $0x4d8] sm:$0xff]  ;;  %v4300_v34 = vcombine.high %v482_v22, %v490_v26  ;;  %v569_v4 = vld [vmem:[#allocation2 + $0xae0] sm:$0xff] }
 0x169   :  { %2786 = vmatpush1.bf16.msra.mxu1 %v4115_v9  ;;  %3044 = vmatprep.subr.bf16.mxu0 %v4405_v36  ;;  %v4344_v9 = vcombine.low %v530_v29, %v538_v23  ;;  %v347_v36 = vld [vmem:[#allocation2 + $0x3f0] sm:$0xff] }
 0x16a   :  { %2787 = vmatprep.subr.bf16.mxu1 %v4101_v11  ;;  %v400_v11 = vld [vmem:[#allocation2 + $0x598] sm:$0xff]  ;;  %v4167_v43 = vcombine.high %v339_v35, %v347_v36  ;;  %v299_v29 = vld [vmem:[#allocation2 + $0x270] sm:$0xff] }
 0x16b   :  { %2918 = vmatmul.mubr.bf16.vlgmr.msra.gmra.mxu0 %v4890_v49  ;;  %v4221_v17 = vcombine.high %v400_v11, %v408_v14  ;;  %v4220_v27 = vcombine.low %v400_v11, %v408_v14  ;;  %v4373_v14 = vcombine.high %v561_v3, %v569_v4 }
 0x16c   :  { %3045 = vmatpush1.bf16.msra.mxu0 %v4404_v42  ;;  %2927 = vmatprep.mubr.bf16.mxu0 %v4896_v54  ;;  %v360_v42 = vld [vmem:[#allocation2 + $0x458] sm:$0xff] }
 0x16d   :  { %2788 = vmatpush1.bf16.msra.mxu1 %v4100_v18  ;;  %3046 = vmatprep.subr.bf16.mxu0 %v4390_v45  ;;  %v4329_v18 = vcombine.low %v514_v6, %v522_v7  ;;  %v331_v45 = vld [vmem:[#allocation2 + $0x370] sm:$0xff] }
 0x16e   :  { %2789 = vmatprep.subr.bf16.mxu1 %v4086_v19  ;;  %v384_v19 = vld [vmem:[#allocation2 + $0x518] sm:$0xff]  ;;  %v4152_v52 = vcombine.high %v323_v44, %v331_v45  ;;  %v275_v7 = vld [vmem:[#allocation2 + $0x1b0] sm:$0xff] }
 0x16f   :  { %v4206_v28 = vcombine.high %v384_v19, %v392_v20  ;;  %v4205_v37 = vcombine.low %v384_v19, %v392_v20  ;;  %v259_v19 = vld [vmem:[#allocation2 + $0x130] sm:$0xff] }
 0x170   :  { %3047 = vmatpush1.bf16.msra.mxu0 %v4389_v51  ;;  %v601_v51 = vld [vmem:[#allocation2 + $0xbe0] sm:$0xff]  ;;  %v267_v20 = vld [vmem:[#allocation2 + $0x170] sm:$0xff] }
 0x171   :  { %2790 = vmatpush1.bf16.msra.mxu1 %v4085_v30  ;;  %3048 = vmatprep.subr.bf16.mxu0 %v4375_v56  ;;  %v4314_v30 = vcombine.low %v498_v16, %v506_v39  ;;  %v315_v56 = vld [vmem:[#allocation2 + $0x2f0] sm:$0xff]  ;;  %v545_v39 = vld [vmem:[#allocation2 + $0xa20] sm:$0xff] }
 0x172   :  { %2791 = vmatprep.subr.bf16.mxu1 %v4071_v32  ;;  %v368_v32 = vld [vmem:[#allocation2 + $0x498] sm:$0xff]  ;;  %v4137_v63 = vcombine.high %v307_v53, %v315_v56 }
 0x173   :  { %2928 = vmatmul.mubr.bf16.gmra.mxu0 %v4902_v25  ;;  %v4191_v38 = vcombine.high %v368_v32, %v376_v33  ;;  %v4190_v46 = vcombine.low %v368_v32, %v376_v33 }
 0x174   :  { %3049 = vmatpush1.bf16.msra.mxu0 %v4374_v61  ;;  %3076 = vmatprep.mubr.bf16.mxu0 %v4720_v55  ;;  %v577_v61 = vld [vmem:[#allocation2 + $0xb20] sm:$0xff] }
 0x175   :  { %2792 = vmatpush1.bf16.msra.mxu1 %v4070_v40  ;;  %3050 = vmatprep.subr.bf16.mxu0 %v4360_v1  ;;  %v4299_v40 = vcombine.low %v482_v22, %v490_v26  ;;  %v291_v1 = vld [vmem:[#allocation2 + $0x230] sm:$0xff] }
 0x176   :  { %2793 = vmatprep.subr.bf16.mxu1 %v4056_v41  ;;  %v352_v41 = vld [vmem:[#allocation2 + $0x418] sm:$0xff] }
 0x177   :  { %v4176_v47 = vcombine.high %v352_v41, %v360_v42  ;;  %v4175_v57 = vcombine.low %v352_v41, %v360_v42 }
 0x178   :  { %3051 = vmatpush1.bf16.msra.mxu0 %v4359_v31  ;;  %v4136_v31 = vcombine.low %v307_v53, %v315_v56  ;;  %v467_v56 = vld [vmem:[#allocation2 + $0x7b0] sm:$0xff] }
 0x179   :  { %2794 = vmatpush1.bf16.msra.mxu1 %v4055_v48  ;;  %3052 = vmatprep.subr.bf16.mxu0 %v4345_v5  ;;  %v4166_v48 = vcombine.low %v339_v35, %v347_v36  ;;  %v4122_v5 = vcombine.high %v291_v1, %v299_v29  ;;  %v513_v35 = vld [vmem:[#allocation2 + $0x920] sm:$0xff] }
 0x17a   :  { %2795 = vmatprep.subr.bf16.mxu1 %v4281_v50  ;;  %v593_v50 = vld [vmem:[#allocation2 + $0xba0] sm:$0xff] }
 0x17b   :  { %v4402_v23 = vcombine.low %v593_v50, %v601_v51  ;;  %v521_v36 = vld [vmem:[#allocation2 + $0x960] sm:$0xff] }
 0x17c   :  { %3053 = vmatpush1.bf16.msra.mxu0 %v4344_v9  ;;  %v4387_v9 = vcombine.low %v577_v61, %v585_v62  ;;  %v4328_v41 = vcombine.high %v513_v35, %v521_v36 }
 0x17d   :  { %2796 = vmatpush2.bf16.msra.mxu1 %v4280_v59  ;;  %3054 = vmatprep.subr.bf16.mxu0 %v4330_v15  ;;  %v4403_v59 = vcombine.high %v593_v50, %v601_v51  ;;  %v4121_v15 = vcombine.low %v291_v1, %v299_v29  ;;  %v235_v50 = vld [vmem:[#allocation2 + $0x70] sm:$0xff] }
 0x17e   :  { %2797 = vmatprep.subr.bf16.mxu1 %v4266_v60  ;;  %v4151_v60 = vcombine.low %v323_v44, %v331_v45  ;;  %v505_v44 = vld [vmem:[#allocation2 + $0x8e0] sm:$0xff]  ;;  %v459_v1 = vld [vmem:[#allocation2 + $0x770] sm:$0xff] }
 0x180   :  { %3055 = vmatpush1.bf16.msra.mxu0 %v4329_v18  ;;  %v4925_v18 = vld [vmem:[%s5177_s0 + $0x20] ss:$12 sps:$4 sm:$0xff]  }
 0x181   :  { %2798 = vmatpush2.bf16.msra.mxu1 %v4265_v24  ;;  %3056 = vmatprep.subr.bf16.mxu0 %v4315_v21  ;;  %v4041_v24 = vld [vmem:[%s5179_s2 + $0x70] ss:$0 sm:$0xff]  ;;  %v4372_v21 = vcombine.low %v561_v3, %v569_v4 }
 0x182   :  { %2799 = vmatprep.subr.bf16.mxu1 %v4251_v2  ;;  %v4388_v2 = vcombine.high %v577_v61, %v585_v62 }
 0x184   :  { %3057 = vmatpush1.bf16.msra.mxu0 %v4314_v30  ;;  %v4092_v30 = vcombine.high %v259_v19, %v267_v20 }
 0x185   :  { %2800 = vmatpush2.bf16.msra.mxu1 %v4250_v13  ;;  %3058 = vmatprep.subr.bf16.mxu0 %v4300_v34  ;;  %v283_v13 = vld [vmem:[#allocation2 + $0x1f0] sm:$0xff]  ;;  %v4091_v34 = vcombine.low %v259_v19, %v267_v20  ;;  %v306_v19 = vld [vmem:[#allocation2 + $0x2a8] sm:$0xff] }
 0x186   :  { %2801 = vmatprep.subr.bf16.mxu1 %v4236_v8  ;;  %v4106_v26 = vcombine.low %v275_v7, %v283_v13  ;;  %v314_v20 = vld [vmem:[#allocation2 + $0x2e8] sm:$0xff] }
 0x188   :  { %3059 = vmatpush1.bf16.msra.mxu0 %v4299_v40  ;;  %v251_v40 = vld [vmem:[#allocation2 + $0xf0] sm:$0xff] }
 0x189   :  { %2802 = vmatpush2.bf16.msra.mxu1 %v4235_v12  ;;  %3097 = vmatprep.subr.bf16.mxu0 %v4167_v43  ;;  %v553_v12 = vld [vmem:[#allocation2 + $0xa60] sm:$0xff] }
 0x18a   :  { %2803 = vmatprep.subr.bf16.mxu1 %v4221_v17  ;;  %v4107_v17 = vcombine.high %v275_v7, %v283_v13  ;;  %v4358_v22 = vcombine.high %v545_v39, %v553_v12  ;;  %v4357_v32 = vcombine.low %v545_v39, %v553_v12  ;;  %v497_v43 = vld [vmem:[#allocation2 + $0x8a0] sm:$0xff] }
 0x18b   :  { %3077 = vmatmul.mubr.bf16.vlgmr.msra.gmra.mxu0 %v4909_v58  ;;  %v4313_v51 = vcombine.high %v497_v43, %v505_v44  ;;  %v4312_v29 = vcombine.low %v497_v43, %v505_v44  ;;  %v387_v44 = vld [vmem:[#allocation2 + $0x530] sm:$0xff] }
 0x18c   :  { %3098 = vmatpush1.bf16.msra.mxu0 %v4166_v48  ;;  %3086 = vmatprep.mubr.bf16.mxu0 %v4720_v55  ;;  %v227_v48 = vld [vmem:[#allocation2 + $0x30] sm:$0xff] }
 0x18d   :  { %2804 = vmatpush2.bf16.msra.mxu1 %v4220_v27  ;;  %3099 = vmatprep.subr.bf16.mxu0 %v4152_v52  ;;  %v529_v27 = vld [vmem:[#allocation2 + $0x9a0] sm:$0xff]  ;;  %v4061_v52 = vcombine.low %v227_v48, %v235_v50  ;;  %v4062_v53 = vcombine.high %v227_v48, %v235_v50 }
 0x18e   :  { %2805 = vmatprep.subr.bf16.mxu1 %v4206_v28  ;;  %v537_v28 = vld [vmem:[#allocation2 + $0x9e0] sm:$0xff] }
 0x18f   :  { %v4343_v33 = vcombine.high %v529_v27, %v537_v28 }
 0x190   :  { %3100 = vmatpush1.bf16.msra.mxu0 %v4151_v60  ;;  %v475_v60 = vld [vmem:[#allocation2 + $0x7f0] sm:$0xff] }
 0x191   :  { %2806 = vmatpush2.bf16.msra.mxu1 %v4205_v37  ;;  %3101 = vmatprep.subr.bf16.mxu0 %v4137_v63  ;;  %v4342_v37 = vcombine.low %v529_v27, %v537_v28  ;;  %v4287_v62 = vcombine.high %v467_v56, %v475_v60  ;;  %v451_v63 = vld [vmem:[#allocation2 + $0x730] sm:$0xff] }
 0x192   :  { %2807 = vmatprep.subr.bf16.mxu1 %v4191_v38  ;;  %v243_v38 = vld [vmem:[#allocation2 + $0xb0] sm:$0xff]  ;;  %v4272_v3 = vcombine.high %v451_v63, %v459_v1 }
 0x193   :  { %3087 = vmatmul.mubr.bf16.gmra.mxu0 %v4925_v18  ;;  %v4077_v42 = vcombine.high %v243_v38, %v251_v40  ;;  %v4076_v45 = vcombine.low %v243_v38, %v251_v40  ;;  %v419_v27 = vld [vmem:[#allocation2 + $0x630] sm:$0xff]  ;;  %v298_v38 = vld [vmem:[#allocation2 + $0x268] sm:$0xff] }
 0x194   :  { %3102 = vmatpush1.bf16.msra.mxu0 %v4136_v31  ;;  %3129 = vmatprep.mubr.bf16.mxu0 %v4884_v10  ;;  %v346_v31 = vld [vmem:[#allocation2 + $0x3e8] sm:$0xff]  ;;  %v427_v28 = vld [vmem:[#allocation2 + $0x670] sm:$0xff] }
 0x195   :  { %2808 = vmatpush2.bf16.msra.mxu1 %v4190_v46  ;;  %3103 = vmatprep.subr.bf16.mxu0 %v4122_v5  ;;  %v4931_v46 = vpop.f32.mrf.mxu0  ;;  %v435_v5 = vld [vmem:[#allocation2 + $0x6b0] sm:$0xff] }
 0x196   :  { %2809 = vmatprep.subr.bf16.mxu1 %v4176_v47  ;;  %v4327_v47 = vcombine.low %v513_v35, %v521_v36  ;;  %v403_v35 = vld [vmem:[#allocation2 + $0x5b0] sm:$0xff] }
 0x197   :  { %v4933_v61 = vpop.f32.mrf.mxu0  ;;  %v411_v36 = vld [vmem:[#allocation2 + $0x5f0] sm:$0xff] }
 0x198   :  { %3104 = vmatpush1.bf16.msra.mxu0 %v4121_v15  ;;  %v4227_v43 = vcombine.high %v403_v35, %v411_v36 }
 0x199   :  { %2810 = vmatpush2.bf16.msra.mxu1 %v4175_v57  ;;  %3105 = vmatprep.subr.bf16.mxu0 %v4107_v17  ;;  %v481_v57 = vld [vmem:[#allocation2 + $0x820] sm:$0xff]  ;;  %v2499_v4 = vpop.f32.mrf.mxu0 }
 0x19a   :  { %2938 = vmatprep.subr.bf16.mxu1 %v4403_v59  ;;  %v489_v59 = vld [vmem:[#allocation2 + $0x860] sm:$0xff] }
 0x19b   :  { %v4297_v7 = vcombine.low %v481_v57, %v489_v59 }
 0x19c   :  { %v197_v6 = vpop.f32.mrf.mxu1  ;;  %2812 = vmatmul.mubr.bf16.vlgmr.msra.gmra.mxu1 %v4890_v49  ;;  %3106 = vmatpush1.bf16.msra.mxu0 %v4106_v26 }
 0x19d   :  { %v4917_v8 = vadd.f32 %v4041_v24, %v197_v6  ;;  %2939 = vmatpush1.bf16.msra.mxu1 %v4402_v23  ;;  %2821 = vmatprep.mubr.bf16.mxu1 %v4896_v54  ;;  %v4298_v23 = vcombine.high %v481_v57, %v489_v59  ;;  %v4286_v24 = vcombine.low %v467_v56, %v475_v60  ;;  %v443_v6 = vld [vmem:[#allocation2 + $0x6f0] sm:$0xff]  ;;  %v274_v56 = vld [vmem:[#allocation2 + $0x1a8] sm:$0xff] }
 0x19e   :  { %v4566_v11 = vpop.f32.mrf.mxu1  ;;  %2940 = vmatprep.subr.bf16.mxu1 %v4388_v2  ;;  %3107 = vmatprep.subr.bf16.mxu0 %v4092_v30  ;;  %v338_v2 = vld [vmem:[#allocation2 + $0x3a8] sm:$0xff]  ;;  %v4257_v15 = vcombine.high %v435_v5, %v443_v6  ;;  %v4256_v17 = vcombine.low %v435_v5, %v443_v6  ;;  %v4135_v30 = vcombine.high %v306_v19, %v314_v20 }
 0x19f   :  { %v202_v16 = vsel %vm201_vm3, %v4917_v8, -inf  ;;  %v4165_v13 = vcombine.high %v338_v2, %v346_v31  ;;  %v322_v11 = vld [vmem:[#allocation2 + $0x328] sm:$0xff]  ;;  %v4164_v39 = vcombine.low %v338_v2, %v346_v31 }
 0x1a0   :  { %203 = vmax.xlane.f32.xlu0 %v202_v16  ;;  %3108 = vmatpush1.bf16.msra.mxu0 %v4091_v34  ;;  %v2501_v16 = vpop.f32.mrf.mxu0  ;;  %v4242_v34 = vcombine.high %v419_v27, %v427_v28  ;;  %v282_v57 = vld [vmem:[#allocation2 + $0x1e8] sm:$0xff] }
 0x1a1   :  { %2941 = vmatpush1.bf16.msra.mxu1 %v4387_v9  ;;  %3109 = vmatprep.subr.bf16.mxu0 %v4077_v42  ;;  %v4271_v9 = vcombine.low %v451_v63, %v459_v1  ;;  %v371_v1 = vld [vmem:[#allocation2 + $0x4b0] sm:$0xff]  ;;  %v4105_v2 = vcombine.high %v274_v56, %v282_v57  ;;  %v266_v5 = vld [vmem:[#allocation2 + $0x168] sm:$0xff] }
 0x1a2   :  { %2942 = vmatprep.subr.bf16.mxu1 %v4373_v14  ;;  %v330_v14 = vld [vmem:[#allocation2 + $0x368] sm:$0xff] }
 0x1a3   :  { %v4150_v12 = vcombine.high %v322_v11, %v330_v14  ;;  %v4149_v26 = vcombine.low %v322_v11, %v330_v14  ;;  %v4104_v11 = vcombine.low %v274_v56, %v282_v57  ;;  %v580_v57 = vld [vmem:[#allocation2 + $0xb38] sm:$0xf] }
 0x1a4   :  { %2822 = vmatmul.mubr.bf16.gmra.mxu1 %v4902_v25  ;;  %3110 = vmatpush1.bf16.msra.mxu0 %v4076_v45  ;;  %v395_v45 = vld [vmem:[#allocation2 + $0x570] sm:$0xff] }
 0x1a5   :  { %2943 = vmatpush1.bf16.msra.mxu1 %v4372_v21  ;;  %2970 = vmatprep.mubr.bf16.mxu1 %v4720_v55  ;;  %v4212_v60 = vcombine.high %v387_v44, %v395_v45 }
 0x1a6   :  { %2944 = vmatprep.subr.bf16.mxu1 %v4358_v22  ;;  %3111 = vmatprep.subr.bf16.mxu0 %v4062_v53  ;;  %v2505_v22 = vpop.f32.mrf.mxu0  ;;  %v4226_v53 = vcombine.low %v403_v35, %v411_v36  ;;  %v604_v35 = vld [vmem:[#allocation2 + $0xbf8] sm:$0xf] }
 0x1a8   :  { %3112 = vmatpush1.bf16.msra.mxu0 %v4061_v52  ;;  %v2507_v42 = vpop.f32.mrf.mxu0 }
 0x1a9   :  { %2945 = vmatpush1.bf16.msra.mxu1 %v4357_v32  ;;  %3113 = vmatprep.subr.bf16.mxu0 %v4287_v62 }
 0x1aa   :  { %2946 = vmatprep.subr.bf16.mxu1 %v4343_v33  ;;  %v4241_v33 = vcombine.low %v419_v27, %v427_v28  ;;  %v2509_v63 = vpop.f32.mrf.mxu0  ;;  %v242_v27 = vld [vmem:[#allocation2 + $0xa8] sm:$0xff] }
 0x1ab   :  { %v250_v28 = vld [vmem:[#allocation2 + $0xe8] sm:$0xff] }
 0x1ac   :  { %3114 = vmatpush2.bf16.msra.mxu0 %v4286_v24 }
 0x1ad   :  { %2947 = vmatpush1.bf16.msra.mxu1 %v4342_v37  ;;  %3115 = vmatprep.subr.bf16.mxu0 %v4272_v3  ;;  %v290_v37 = vld [vmem:[#allocation2 + $0x228] sm:$0xff]  ;;  %v4211_v3 = vcombine.low %v387_v44, %v395_v45 }
 0x1ae   :  { %2948 = vmatprep.subr.bf16.mxu1 %v4328_v41  ;;  %v226_v44 = vld [vmem:[#allocation2 + $0x28] sm:$0xff] }
 0x1af   :  { %v234_v45 = vld [vmem:[#allocation2 + $0x68] sm:$0xff] }
 0x1b0   :  { %3116 = vmatpush2.bf16.msra.mxu0 %v4271_v9 }
 0x1b1   :  { %2949 = vmatpush1.bf16.msra.mxu1 %v4327_v47  ;;  %3117 = vmatprep.subr.bf16.mxu0 %v4257_v15  ;;  %v4134_v47 = vcombine.low %v306_v19, %v314_v20  ;;  %v2511_v15 = vpop.f32.mrf.mxu0 }
 0x1b2   :  { %2950 = vmatprep.subr.bf16.mxu1 %v4313_v51  ;;  %v4120_v51 = vcombine.high %v290_v37, %v298_v38 }
 0x1b4   :  { %3118 = vmatpush2.bf16.msra.mxu0 %v4256_v17 }
 0x1b5   :  { %2951 = vmatpush1.bf16.msra.mxu1 %v4312_v29  ;;  %3119 = vmatprep.subr.bf16.mxu0 %v4242_v34  ;;  %v379_v29 = vld [vmem:[#allocation2 + $0x4f0] sm:$0xff]  ;;  %v596_v34 = vld [vmem:[#allocation2 + $0xbb8] sm:$0xf] }
 0x1b6   :  { %2952 = vmatprep.subr.bf16.mxu1 %v4298_v23  ;;  %v4197_v9 = vcombine.high %v371_v1, %v379_v29 }
 0x1b8   :  { %3120 = vmatpush2.bf16.msra.mxu0 %v4241_v33 }
 0x1b9   :  { %2953 = vmatpush1.bf16.msra.mxu1 %v4297_v7  ;;  %3121 = vmatprep.subr.bf16.mxu0 %v4227_v43 }
 0x1ba   :  { %2991 = vmatprep.subr.bf16.mxu1 %v4165_v13 }
 0x1bc   :  { %2971 = vmatmul.mubr.bf16.vlgmr.msra.gmra.mxu1 %v4909_v58  ;;  %v2548_v21 = vpop.f32.mrf.mxu1  ;;  %3122 = vmatpush2.bf16.msra.mxu0 %v4226_v53 }
 0x1bd   :  { %2992 = vmatpush1.bf16.msra.mxu1 %v4164_v39  ;;  %2980 = vmatprep.mubr.bf16.mxu1 %v4720_v55  ;;  %v2549_v40 = vadd.f32 %v2548_v21, %v4931_v46  ;;  %v363_v39 = vld [vmem:[#allocation2 + $0x470] sm:$0xff] }
 0x1be   :  { %2993 = vmatprep.subr.bf16.mxu1 %v4150_v12  ;;  %v2550_v32 = vpop.f32.mrf.mxu1  ;;  %3123 = vmatprep.subr.bf16.mxu0 %v4212_v60 }
 0x1bf   :  { %v2551_v48 = vadd.f32 %v2550_v32, %v4933_v61  ;;  %v4119_v61 = vcombine.low %v290_v37, %v298_v38 }
 0x1c0   :  { %v2552_v41 = vpop.f32.mrf.mxu1  ;;  %3124 = vmatpush2.bf16.msra.mxu0 %v4211_v3  ;;  %v564_v3 = vld [vmem:[#allocation2 + $0xab8] sm:$0xf] }
 0x1c1   :  { %2994 = vmatpush1.bf16.msra.mxu1 %v4149_v26  ;;  %v2553_v50 = vadd.f32 %v2552_v41, %v2499_v4  ;;  %v258_v4 = vld [vmem:[#allocation2 + $0x128] sm:$0xff]  ;;  %v4196_v26 = vcombine.low %v371_v1, %v379_v29  ;;  %3125 = vmatprep.subr.bf16.mxu0 %v4197_v9  ;;  %v4075_v41 = vcombine.high %v242_v27, %v250_v28 }
 0x1c2   :  { %2995 = vmatprep.subr.bf16.mxu1 %v4135_v30  ;;  %v2554_v52 = vpop.f32.mrf.mxu1  ;;  %v4090_v20 = vcombine.high %v258_v4, %v266_v5  ;;  %v4089_v36 = vcombine.low %v258_v4, %v266_v5  ;;  %v572_v4 = vld [vmem:[#allocation2 + $0xaf8] sm:$0xf]  ;;  %v450_v9 = vld [vmem:[#allocation2 + $0x728] sm:$0xff] }
 0x1c3   :  { %v3301_v59 = vmax.f32 %v2549_v40, %v2553_v50  ;;  %v2555_v46 = vadd.f32 %v2554_v52, %v2501_v16  ;;  %v355_v16 = vld [vmem:[#allocation2 + $0x430] sm:$0xff]  ;;  %v4408_v50 = vcombine.low %v596_v34, %v604_v35 }
 0x1c4   :  { %v2558_v62 = vpop.f32.mrf.mxu1  ;;  %2981 = vmatmul.mubr.bf16.gmra.mxu1 %v4925_v18  ;;  %v4182_v33 = vcombine.high %v355_v16, %v363_v39  ;;  %3126 = vmatpush2.bf16.msra.mxu0 %v4196_v26 }
 0x1c5   :  { %2996 = vmatpush1.bf16.msra.mxu1 %v4134_v47  ;;  %v3302_v23 = vrot.slane %v3301_v59, 4  ;;  %v3308_v24 = vmax.f32 %v2551_v48, %v2555_v46  ;;  %3023 = vmatprep.mubr.bf16.mxu1 %v4884_v10  ;;  %v2559_v13 = vadd.f32 %v2558_v62, %v2505_v22  ;;  %v4060_v46 = vcombine.high %v226_v44, %v234_v45  ;;  %v466_v62 = vld [vmem:[#allocation2 + $0x7a8] sm:$0xff] }
 0x1c6   :  { %2997 = vmatprep.subr.bf16.mxu1 %v4120_v51  ;;  %v2560_v31 = vpop.f32.mrf.mxu1  ;;  %3127 = vmatprep.subr.bf16.mxu0 %v4182_v33  ;;  %v4074_v51 = vcombine.low %v242_v27, %v250_v28  ;;  %v532_v28 = vld [vmem:[#allocation2 + $0x9b8] sm:$0xf]  ;;  %v426_v33 = vld [vmem:[#allocation2 + $0x668] sm:$0xff] }
 0x1c7   :  { %v3303_v6 = vmax.f32 %v3301_v59, %v3302_v23  ;;  %v3309_v7 = vrot.slane %v3308_v24, 4  ;;  %v2561_v17 = vadd.f32 %v2560_v31, %v2507_v42  ;;  %v4181_v42 = vcombine.low %v355_v16, %v363_v39  ;;  %v588_v59 = vld [vmem:[#allocation2 + $0xb78] sm:$0xf] }
 0x1c8   :  { %v2562_v14 = vpop.f32.mrf.mxu1  ;;  %v548_v39 = vld [vmem:[#allocation2 + $0xa38] sm:$0xf] }
 0x1c9   :  { %2998 = vmatpush1.bf16.msra.mxu1 %v4119_v61  ;;  %v3304_v12 = vrot.slane %v3303_v6, 2  ;;  %v3310_v10 = vmax.f32 %v3308_v24, %v3309_v7  ;;  %v2563_v19 = vadd.f32 %v2562_v14, %v2509_v63  ;;  %3128 = vmatpush2.bf16.msra.mxu0 %v4181_v42  ;;  %v474_v63 = vld [vmem:[#allocation2 + $0x7e8] sm:$0xff]  ;;  %v4393_v61 = vcombine.low %v580_v57, %v588_v59 }
 0x1ca   :  { %2999 = vmatprep.subr.bf16.mxu1 %v4105_v2  ;;  %v2564_v21 = vpop.f32.mrf.mxu1  ;;  %4567 = vmatprep.subr.bf16.mxu0 %v4408_v50  ;;  %v4059_v24 = vcombine.low %v226_v44, %v234_v45  ;;  %v4285_v5 = vcombine.high %v466_v62, %v474_v63  ;;  %v4378_v14 = vcombine.low %v564_v3, %v572_v4  ;;  %v500_v44 = vld [vmem:[#allocation2 + $0x8b8] sm:$0xf]  ;;  %v370_v59 = vld [vmem:[#allocation2 + $0x4a8] sm:$0xff]  ;;  %v603_v3 = vld [vmem:[#allocation2 + $0xbf0] sm:$0xff] }
 0x1cb   :  { %v3311_v22 = vrot.slane %v3310_v10, 2  ;;  %v3406_v30 = vmax.f32 %v2559_v13, %v2563_v19  ;;  %v2565_v32 = vadd.f32 %v2564_v21, %v2511_v15  ;;  %v3305_v37 = vmax.f32 %v3303_v6, %v3304_v12  ;;  %v556_v12 = vld [vmem:[#allocation2 + $0xa78] sm:$0xf]  ;;  %v434_v19 = vld [vmem:[#allocation2 + $0x6a8] sm:$0xff] }
 0x1cc   :  { %3130 = vmatmul.mubr.bf16.vlgmr.msra.gmra.mxu0 %v4890_v49  ;;  %v4284_v15 = vcombine.low %v466_v62, %v474_v63  ;;  %v4363_v26 = vcombine.low %v548_v39, %v556_v12  ;;  %v508_v45 = vld [vmem:[#allocation2 + $0x8f8] sm:$0xf] }
 0x1cd   :  { %3000 = vmatpush1.bf16.msra.mxu1 %v4104_v11  ;;  %v3407_v38 = vrot.slane %v3406_v30, 4  ;;  %v3413_v40 = vmax.f32 %v2561_v17, %v2565_v32  ;;  %v3312_v43 = vmax.f32 %v3310_v10, %v3311_v22  ;;  %v3306_v52 = vrot.slane %v3305_v37, 1  ;;  %3139 = vmatprep.mubr.bf16.mxu0 %v4896_v54  ;;  %v458_v11 = vld [vmem:[#allocation2 + $0x768] sm:$0xff]  ;;  %v540_v22 = vld [vmem:[#allocation2 + $0x9f8] sm:$0xf] }
 0x1ce   :  { %3001 = vmatprep.subr.bf16.mxu1 %v4090_v20  ;;  %4568 = vmatpush3.bf16.msra.mxu0 %v4408_v50  ;;  %v4270_v17 = vcombine.high %v450_v9, %v458_v11  ;;  %v442_v20 = vld [vmem:[#allocation2 + $0x6e8] sm:$0xff]  ;;  %v4269_v27 = vcombine.low %v450_v9, %v458_v11  ;;  %v4348_v34 = vcombine.low %v532_v28, %v540_v22  ;;  %v555_v28 = vld [vmem:[#allocation2 + $0xa70] sm:$0xff] }
 0x1cf   :  { %v3408_v47 = vmax.f32 %v3406_v30, %v3407_v38  ;;  %v3414_v48 = vrot.slane %v3413_v40, 4  ;;  %v3313_v60 = vrot.slane %v3312_v43, 1  ;;  %v3307_v23 = vmax.f32 %v3305_v37, %v3306_v52  ;;  %4569 = vmatprep.subr.bf16.mxu0 %v4393_v61  ;;  %v418_v32 = vld [vmem:[#allocation2 + $0x628] sm:$0xff]  ;;  %v524_v37 = vld [vmem:[#allocation2 + $0x978] sm:$0xf] }
 0x1d0   :  { %v4255_v30 = vcombine.high %v434_v19, %v442_v20  ;;  %v4254_v35 = vcombine.low %v434_v19, %v442_v20  ;;  %v4240_v38 = vcombine.high %v418_v32, %v426_v33  ;;  %v394_v50 = vld [vmem:[#allocation2 + $0x568] sm:$0xff] }
 0x1d1   :  { %3002 = vmatpush1.bf16.msra.mxu1 %v4089_v36  ;;  %v3409_v53 = vrot.slane %v3408_v47, 2  ;;  %v3415_v56 = vmax.f32 %v3413_v40, %v3414_v48  ;;  %v3314_v6 = vmax.f32 %v3312_v43, %v3313_v60  ;;  %v516_v36 = vld [vmem:[#allocation2 + $0x938] sm:$0xf]  ;;  %v402_v40 = vld [vmem:[#allocation2 + $0x5a8] sm:$0xff]  ;;  %v4239_v43 = vcombine.low %v418_v32, %v426_v33  ;;  %v2654_v60 = vpop.f32.mrf.mxu0 }
 0x1d2   :  { %3003 = vmatprep.subr.bf16.mxu1 %v4075_v41  ;;  %4570 = vmatpush3.bf16.msra.mxu0 %v4393_v61  ;;  %v410_v41 = vld [vmem:[#allocation2 + $0x5e8] sm:$0xff]  ;;  %v4333_v42 = vcombine.low %v516_v36, %v524_v37 }
 0x1d3   :  { %v3410_v1 = vmax.f32 %v3408_v47, %v3409_v53  ;;  %v3416_v29 = vrot.slane %v3415_v56, 2  ;;  %4571 = vmatprep.subr.bf16.mxu0 %v4378_v14  ;;  %v4225_v47 = vcombine.high %v402_v40, %v410_v41  ;;  %v386_v48 = vld [vmem:[#allocation2 + $0x528] sm:$0xff]  ;;  %v4224_v52 = vcombine.low %v402_v40, %v410_v41  ;;  %v484_v53 = vld [vmem:[#allocation2 + $0x838] sm:$0xf] }
 0x1d4   :  { %3140 = vmatmul.mubr.bf16.gmra.mxu0 %v4902_v25  ;;  %v4210_v57 = vcombine.high %v386_v48, %v394_v50  ;;  %v4209_v63 = vcombine.low %v386_v48, %v394_v50  ;;  %v362_v61 = vld [vmem:[#allocation2 + $0x468] sm:$0xff] }
 0x1d5   :  { %3004 = vmatpush1.bf16.msra.mxu1 %v4074_v51  ;;  %v3411_v2 = vrot.slane %v3410_v1, 1  ;;  %v3417_v31 = vmax.f32 %v3415_v56, %v3416_v29  ;;  %4583 = vmatprep.mubr.bf16.mxu0 %v4909_v58  ;;  %v4318_v51 = vcombine.low %v500_v44, %v508_v45  ;;  %v492_v56 = vld [vmem:[#allocation2 + $0x878] sm:$0xf]  ;;  %v354_v29 = vld [vmem:[#allocation2 + $0x428] sm:$0xff] }
 0x1d6   :  { %3005 = vmatprep.subr.bf16.mxu1 %v4060_v46  ;;  %4572 = vmatpush3.bf16.msra.mxu0 %v4378_v14  ;;  %v378_v46 = vld [vmem:[#allocation2 + $0x4e8] sm:$0xff]  ;;  %v4303_v62 = vcombine.low %v484_v53, %v492_v56  ;;  %v523_v53 = vld [vmem:[#allocation2 + $0x970] sm:$0xff] }
 0x1d7   :  { %v3412_v7 = vmax.f32 %v3410_v1, %v3411_v2  ;;  %v3418_v13 = vrot.slane %v3417_v31, 1  ;;  %4573 = vmatprep.subr.bf16.mxu0 %v4363_v26  ;;  %v4195_v1 = vcombine.high %v370_v59, %v378_v46  ;;  %v4180_v2 = vcombine.high %v354_v29, %v362_v61 }
 0x1d9   :  { %3006 = vmatpush1.bf16.msra.mxu1 %v4059_v24  ;;  %v3419_v16 = vmax.f32 %v3417_v31, %v3418_v13  ;;  %v4944_v10 = vsel %vm3511_vm4, %v3307_v23, %v3412_v7  ;;  %v2656_v23 = vpop.f32.mrf.mxu0  ;;  %v4194_v24 = vcombine.low %v370_v59, %v378_v46  ;;  %v595_v31 = vld [vmem:[#allocation2 + $0xbb0] sm:$0xff] }
 0x1da   :  { %5183 = vst [vmem:[#allocation5_spill] sm:$0xff] %v4944_v10  ;;  %3007 = vmatprep.subr.bf16.mxu1 %v4285_v5  ;;  %4574 = vmatpush3.bf16.msra.mxu0 %v4363_v26  ;;  %v4179_v5 = vcombine.low %v354_v29, %v362_v61  ;;  %v579_v7 = vld [vmem:[#allocation2 + $0xb30] sm:$0xff]  ;;  %v4406_v11 = vcombine.low %v595_v31, %v603_v3 }
 0x1db   :  { %v4947_v21 = vsel %vm3511_vm4, %v3314_v6, %v3419_v16  ;;  %4575 = vmatprep.subr.bf16.mxu0 %v4348_v34  ;;  %v2658_v4 = vpop.f32.mrf.mxu0  ;;  %v4407_v6 = vcombine.high %v595_v31, %v603_v3  ;;  %v587_v13 = vld [vmem:[#allocation2 + $0xb70] sm:$0xff] }
 0x1dc   :  { %5184 = vst [vmem:[#allocation6_spill] sm:$0xff] %v4947_v21  ;;  %v4392_v14 = vcombine.high %v579_v7, %v587_v13  ;;  %v571_v16 = vld [vmem:[#allocation2 + $0xaf0] sm:$0xff] }
 0x1dd   :  { %3008 = vmatpush2.bf16.msra.mxu1 %v4284_v15  ;;  %v2660_v9 = vpop.f32.mrf.mxu0  ;;  %v563_v15 = vld [vmem:[#allocation2 + $0xab0] sm:$0xff] }
 0x1de   :  { %3009 = vmatprep.subr.bf16.mxu1 %v4270_v17  ;;  %4576 = vmatpush3.bf16.msra.mxu0 %v4348_v34  ;;  %v4391_v17 = vcombine.low %v579_v7, %v587_v13  ;;  %v4377_v20 = vcombine.high %v563_v15, %v571_v16  ;;  %v4376_v34 = vcombine.low %v563_v15, %v571_v16  ;;  %v491_v15 = vld [vmem:[#allocation2 + $0x870] sm:$0xff] }
 0x1df   :  { %4577 = vmatprep.subr.bf16.mxu0 %v4333_v42  ;;  %v2664_v12 = vpop.f32.mrf.mxu0 }
 0x1e1   :  { %3010 = vmatpush2.bf16.msra.mxu1 %v4269_v27  ;;  %v547_v27 = vld [vmem:[#allocation2 + $0xa30] sm:$0xff] }
 0x1e2   :  { %3011 = vmatprep.subr.bf16.mxu1 %v4255_v30  ;;  %4578 = vmatpush3.bf16.msra.mxu0 %v4333_v42  ;;  %v2666_v30 = vpop.f32.mrf.mxu0  ;;  %v4361_v44 = vcombine.low %v547_v27, %v555_v28 }
 0x1e3   :  { %4579 = vmatprep.subr.bf16.mxu0 %v4318_v51 }
 0x1e4   :  { %v2668_v41 = vpop.f32.mrf.mxu0 }
 0x1e5   :  { %3012 = vmatpush2.bf16.msra.mxu1 %v4254_v35 }
 0x1e6   :  { %3013 = vmatprep.subr.bf16.mxu1 %v4240_v38  ;;  %4580 = vmatpush3.bf16.msra.mxu0 %v4318_v51  ;;  %v539_v38 = vld [vmem:[#allocation2 + $0x9f0] sm:$0xff] }
 0x1e7   :  { %4581 = vmatprep.subr.bf16.mxu0 %v4303_v62 }
 0x1e9   :  { %3014 = vmatpush2.bf16.msra.mxu1 %v4239_v43 }
 0x1ea   :  { %3015 = vmatprep.subr.bf16.mxu1 %v4225_v47  ;;  %4582 = vmatpush3.bf16.msra.mxu0 %v4303_v62 }
 0x1eb   :  { %4587 = vmatprep.subr.bf16.mxu0 %v5181_v0 }
 0x1ed   :  { %3016 = vmatpush2.bf16.msra.mxu1 %v4224_v52  ;;  %4584 = vmatmul.mubr.bf16.vlgmr.msra.gmra.mxu0 %v4925_v18  ;;  %v515_v52 = vld [vmem:[#allocation2 + $0x930] sm:$0xff] }
 0x1ee   :  { %3017 = vmatprep.subr.bf16.mxu1 %v4210_v57  ;;  %4603 = vmatprep.mubr.msk.bf16.mxu0 %vm4719_vm0, %v5181_v0  ;;  %v2670_v57 = vpop.f32.mrf.mxu0 }
 0x1f0   :  { %v4959_v31 = vpop.f32.mrf.mxu0 }
 0x1f1   :  { %3018 = vmatpush2.bf16.msra.mxu1 %v4209_v63 }
 0x1f2   :  { %3019 = vmatprep.subr.bf16.mxu1 %v4195_v1  ;;  %v4332_v1 = vcombine.high %v515_v52, %v523_v53  ;;  %v2709_v16 = vpop.f32.mrf.mxu0 }
 0x1f5   :  { %3020 = vmatpush2.bf16.msra.mxu1 %v4194_v24  ;;  %v499_v24 = vld [vmem:[#allocation2 + $0x8b0] sm:$0xff] }
 0x1f6   :  { %3021 = vmatprep.subr.bf16.mxu1 %v4180_v2  ;;  %v507_v2 = vld [vmem:[#allocation2 + $0x8f0] sm:$0xff] }
 0x1f7   :  { %v4317_v7 = vcombine.high %v499_v24, %v507_v2 }
 0x1f9   :  { %3022 = vmatpush2.bf16.msra.mxu1 %v4179_v5 }
 0x1fa   :  { %3150 = vmatprep.subr.bf16.mxu1 %v4407_v6  ;;  %v4331_v6 = vcombine.low %v515_v52, %v523_v53  ;;  %v332_v52 = vld [vmem:[#allocation2 + $0x378] sm:$0xf] }
 0x1fb   :  { %v436_v53 = vld [vmem:[#allocation2 + $0x6b8] sm:$0xf] }
 0x1fc   :  { %v2601_v39 = vpop.f32.mrf.mxu1  ;;  %3024 = vmatmul.mubr.bf16.vlgmr.msra.gmra.mxu1 %v4890_v49  ;;  %v4362_v49 = vcombine.high %v547_v27, %v555_v28 }
 0x1fd   :  { %3033 = vmatprep.mubr.bf16.mxu1 %v4896_v54  ;;  %3151 = vmatpush1.bf16.msra.mxu1 %v4406_v11  ;;  %v2655_v26 = vadd.f32 %v2654_v60, %v2601_v39  ;;  %v531_v54 = vld [vmem:[#allocation2 + $0x9b0] sm:$0xff] }
 0x1fe   :  { %v2603_v19 = vpop.f32.mrf.mxu1  ;;  %3152 = vmatprep.subr.bf16.mxu1 %v4392_v14  ;;  %v4347_v47 = vcombine.high %v531_v54, %v539_v38  ;;  %v4346_v59 = vcombine.low %v531_v54, %v539_v38  ;;  %v483_v14 = vld [vmem:[#allocation2 + $0x830] sm:$0xff]  ;;  %v348_v54 = vld [vmem:[#allocation2 + $0x3f8] sm:$0xf] }
 0x1ff   :  { %v2657_v32 = vadd.f32 %v2656_v23, %v2603_v19  ;;  %v4316_v19 = vcombine.low %v499_v24, %v507_v2 }
 0x200   :  { %v2605_v22 = vpop.f32.mrf.mxu1 }
 0x201   :  { %v2659_v33 = vadd.f32 %v2658_v4, %v2605_v22  ;;  %3153 = vmatpush1.bf16.msra.mxu1 %v4391_v17  ;;  %v468_v22 = vld [vmem:[#allocation2 + $0x7b8] sm:$0xf] }
 0x202   :  { %v2607_v35 = vpop.f32.mrf.mxu1  ;;  %3154 = vmatprep.subr.bf16.mxu1 %v4377_v20  ;;  %v4302_v20 = vcombine.high %v483_v14, %v491_v15 }
 0x203   :  { %v3315_v36 = vmax.f32 %v2655_v26, %v2659_v33  ;;  %v2661_v37 = vadd.f32 %v2660_v9, %v2607_v35 }
 0x204   :  { %v2611_v40 = vpop.f32.mrf.mxu1  ;;  %3034 = vmatmul.mubr.bf16.gmra.mxu1 %v4902_v25 }
 0x205   :  { %v3316_v42 = vrot.slane %v3315_v36, 4  ;;  %v3322_v43 = vmax.f32 %v2657_v32, %v2661_v37  ;;  %3155 = vmatpush1.bf16.msra.mxu1 %v4376_v34  ;;  %3182 = vmatprep.mubr.bf16.mxu1 %v4720_v55  ;;  %v2665_v51 = vadd.f32 %v2664_v12, %v2611_v40  ;;  %v2711_v32 = vpop.f32.mrf.mxu0  ;;  %v340_v37 = vld [vmem:[#allocation2 + $0x3b8] sm:$0xf] }
 0x206   :  { %v2613_v45 = vpop.f32.mrf.mxu1  ;;  %3156 = vmatprep.subr.bf16.mxu1 %v4362_v49  ;;  %v4301_v49 = vcombine.low %v483_v14, %v491_v15  ;;  %v412_v14 = vld [vmem:[#allocation2 + $0x5f8] sm:$0xf] }
 0x207   :  { %v3317_v48 = vmax.f32 %v3315_v36, %v3316_v42  ;;  %v3323_v50 = vrot.slane %v3322_v43, 4  ;;  %v2667_v60 = vadd.f32 %v2666_v30, %v2613_v45  ;;  %v476_v30 = vld [vmem:[#allocation2 + $0x7f8] sm:$0xf] }
 0x208   :  { %v2615_v56 = vpop.f32.mrf.mxu1  ;;  %v4288_v36 = vcombine.low %v468_v22, %v476_v30  ;;  %v452_v42 = vld [vmem:[#allocation2 + $0x738] sm:$0xf] }
 0x209   :  { %v3318_v46 = vrot.slane %v3317_v48, 2  ;;  %v3324_v25 = vmax.f32 %v3322_v43, %v3323_v50  ;;  %v2669_v62 = vadd.f32 %v2668_v41, %v2615_v56  ;;  %3157 = vmatpush1.bf16.msra.mxu1 %v4361_v44  ;;  %v460_v43 = vld [vmem:[#allocation2 + $0x778] sm:$0xf]  ;;  %v2713_v44 = vpop.f32.mrf.mxu0 }
 0x20a   :  { %v2617_v63 = vpop.f32.mrf.mxu1  ;;  %3158 = vmatprep.subr.bf16.mxu1 %v4347_v47  ;;  %v4168_v47 = vcombine.low %v340_v37, %v348_v54  ;;  %v4273_v50 = vcombine.low %v452_v42, %v460_v43  ;;  %v444_v56 = vld [vmem:[#allocation2 + $0x6f8] sm:$0xf] }
 0x20b   :  { %v3325_v29 = vrot.slane %v3324_v25, 2  ;;  %v3420_v61 = vmax.f32 %v2665_v51, %v2669_v62  ;;  %v2671_v23 = vadd.f32 %v2670_v57, %v2617_v63  ;;  %v3319_v3 = vmax.f32 %v3317_v48, %v3318_v46  ;;  %v324_v51 = vld [vmem:[#allocation2 + $0x338] sm:$0xf]  ;;  %v2717_v46 = vpop.f32.mrf.mxu0 }
 0x20c   :  { %v4258_v62 = vcombine.low %v436_v53, %v444_v56  ;;  %v308_v63 = vld [vmem:[#allocation2 + $0x2b8] sm:$0xf] }
 0x20d   :  { %v3421_v4 = vrot.slane %v3420_v61, 4  ;;  %v3427_v5 = vmax.f32 %v2667_v60, %v2671_v23  ;;  %3159 = vmatpush1.bf16.msra.mxu1 %v4346_v59  ;;  %v3326_v13 = vmax.f32 %v3324_v25, %v3325_v29  ;;  %v3320_v39 = vrot.slane %v3319_v3, 1  ;;  %v428_v23 = vld [vmem:[#allocation2 + $0x678] sm:$0xf]  ;;  %v2719_v2 = vpop.f32.mrf.mxu0 }
 0x20e   :  { %3160 = vmatprep.subr.bf16.mxu1 %v4332_v1  ;;  %v4153_v25 = vcombine.low %v324_v51, %v332_v52  ;;  %v316_v1 = vld [vmem:[#allocation2 + $0x2f8] sm:$0xf] }
 0x20f   :  { %v3422_v9 = vmax.f32 %v3420_v61, %v3421_v4  ;;  %v3428_v11 = vrot.slane %v3427_v5, 4  ;;  %v3327_v26 = vrot.slane %v3326_v13, 1  ;;  %v3321_v33 = vmax.f32 %v3319_v3, %v3320_v39  ;;  %v420_v61 = vld [vmem:[#allocation2 + $0x638] sm:$0xf] }
 0x210   :  { %v260_v43 = vld [vmem:[#allocation2 + $0x138] sm:$0xf] }
 0x211   :  { %v3423_v12 = vrot.slane %v3422_v9, 2  ;;  %v3429_v17 = vmax.f32 %v3427_v5, %v3428_v11  ;;  %3161 = vmatpush1.bf16.msra.mxu1 %v4331_v6  ;;  %v3328_v38 = vmax.f32 %v3326_v13, %v3327_v26  ;;  %v4243_v6 = vcombine.low %v420_v61, %v428_v23  ;;  %v404_v11 = vld [vmem:[#allocation2 + $0x5b8] sm:$0xf] }
 0x212   :  { %3162 = vmatprep.subr.bf16.mxu1 %v4317_v7  ;;  %v292_v7 = vld [vmem:[#allocation2 + $0x238] sm:$0xf] }
 0x213   :  { %v3424_v27 = vmax.f32 %v3422_v9, %v3423_v12  ;;  %v3430_v28 = vrot.slane %v3429_v17, 2  ;;  %v372_v51 = vld [vmem:[#allocation2 + $0x4b8] sm:$0xf] }
 0x214   :  { %v380_v52 = vld [vmem:[#allocation2 + $0x4f8] sm:$0xf] }
 0x215   :  { %v3425_v34 = vrot.slane %v3424_v27, 1  ;;  %v3431_v35 = vmax.f32 %v3429_v17, %v3430_v28  ;;  %3163 = vmatpush1.bf16.msra.mxu1 %v4316_v19  ;;  %v276_v17 = vld [vmem:[#allocation2 + $0x1b8] sm:$0xf] }
 0x216   :  { %3164 = vmatprep.subr.bf16.mxu1 %v4302_v20  ;;  %v284_v19 = vld [vmem:[#allocation2 + $0x1f8] sm:$0xf]  ;;  %v4688_v20 = vld [vmem:[%s5177_s0 + $0x4] ss:$12 sps:$4 sm:$0xff]  }
 0x217   :  { %v3426_v40 = vmax.f32 %v3424_v27, %v3425_v34  ;;  %v3432_v41 = vrot.slane %v3431_v35, 1  ;;  %v4228_v27 = vcombine.low %v404_v11, %v412_v14  ;;  %v356_v61 = vld [vmem:[#allocation2 + $0x438] sm:$0xf] }
 0x218   :  { %v364_v23 = vld [vmem:[#allocation2 + $0x478] sm:$0xf] }
 0x219   :  { %v3433_v45 = vmax.f32 %v3431_v35, %v3432_v41  ;;  %3165 = vmatpush1.bf16.msra.mxu1 %v4301_v49  ;;  %v4962_v48 = vsel %vm3511_vm4, %v3321_v33, %v3426_v40  ;;  %v4108_v35 = vcombine.low %v276_v17, %v284_v19 }
 0x21a   :  { %5185 = vst [vmem:[#allocation7_spill] sm:$0xff] %v4962_v48  ;;  %4451 = vmatprep.subr.bf16.mxu1 %v4288_v36 }
 0x21b   :  { %v4965_v57 = vsel %vm3511_vm4, %v3328_v38, %v3433_v45 }
 0x21c   :  { %5186 = vst [vmem:[#allocation8_spill] sm:$0xff] %v4965_v57  ;;  %v2760_v59 = vpop.f32.mrf.mxu1  ;;  %3183 = vmatmul.mubr.bf16.vlgmr.msra.gmra.mxu1 %v4909_v58  ;;  %v4138_v58 = vcombine.low %v308_v63, %v316_v1 }
 0x21d   :  { %4452 = vmatpush3.bf16.msra.mxu1 %v4168_v47  ;;  %3192 = vmatprep.mubr.bf16.mxu1 %v4720_v55  ;;  %v2761_v29 = vadd.f32 %v2760_v59, %v4959_v31  ;;  %v300_v55 = vld [vmem:[#allocation2 + $0x278] sm:$0xf]  ;;  %v2721_v31 = vpop.f32.mrf.mxu0 }
 0x21e   :  { %v2762_v60 = vpop.f32.mrf.mxu1  ;;  %4453 = vmatprep.subr.bf16.mxu1 %v4273_v50 }
 0x21f   :  { %v2763_v3 = vadd.f32 %v2762_v60, %v2709_v16  ;;  %v4123_v16 = vcombine.low %v292_v7, %v300_v55  ;;  %v2723_v34 = vpop.f32.mrf.mxu0  ;;  %v4198_v60 = vcombine.low %v372_v51, %v380_v52 }
 0x220   :  { %v2764_v24 = vpop.f32.mrf.mxu1 }
 0x221   :  { %v2765_v4 = vadd.f32 %v2764_v24, %v2711_v32  ;;  %4454 = vmatpush3.bf16.msra.mxu1 %v4153_v25  ;;  %v388_v32 = vld [vmem:[#allocation2 + $0x538] sm:$0xf] }
 0x222   :  { %v2766_v5 = vpop.f32.mrf.mxu1  ;;  %4455 = vmatprep.subr.bf16.mxu1 %v4258_v62  ;;  %v252_v62 = vld [vmem:[#allocation2 + $0xf8] sm:$0xf] }
 0x223   :  { %v3329_v13 = vmax.f32 %v2761_v29, %v2765_v4  ;;  %v2767_v9 = vadd.f32 %v2766_v5, %v2713_v44  ;;  %v268_v44 = vld [vmem:[#allocation2 + $0x178] sm:$0xf] }
 0x224   :  { %v2770_v15 = vpop.f32.mrf.mxu1  ;;  %3193 = vmatmul.mubr.bf16.gmra.mxu1 %v4925_v18  ;;  %v396_v18 = vld [vmem:[#allocation2 + $0x578] sm:$0xf]  ;;  %v4093_v25 = vcombine.low %v260_v43, %v268_v44 }
 0x225   :  { %v3330_v39 = vrot.slane %v3329_v13, 4  ;;  %v3336_v12 = vmax.f32 %v2763_v3, %v2767_v9  ;;  %4456 = vmatpush3.bf16.msra.mxu1 %v4138_v58  ;;  %3235 = vmatprep.mubr.bf16.mxu1 %v4688_v20  ;;  %v2771_v30 = vadd.f32 %v2770_v15, %v2717_v46  ;;  %v4213_v42 = vcombine.low %v388_v32, %v396_v18  ;;  %v228_v5 = vld [vmem:[#allocation2 + $0x38] sm:$0xf]  ;;  %v2866_v32 = vpop.f32.mrf.mxu0 }
 0x226   :  { %v2772_v26 = vpop.f32.mrf.mxu1  ;;  %4457 = vmatprep.subr.bf16.mxu1 %v4243_v6  ;;  %v4183_v58 = vcombine.low %v356_v61, %v364_v23  ;;  %v236_v6 = vld [vmem:[#allocation2 + $0x78] sm:$0xf] }
 0x227   :  { %v3331_v28 = vmax.f32 %v3329_v13, %v3330_v39  ;;  %v3337_v22 = vrot.slane %v3336_v12, 4  ;;  %v2773_v54 = vadd.f32 %v2772_v26, %v2719_v2  ;;  %v4063_v15 = vcombine.low %v228_v5, %v236_v6  ;;  %v2868_v18 = vpop.f32.mrf.mxu0 }
 0x228   :  { %v2774_v33 = vpop.f32.mrf.mxu1 }
 0x229   :  { %v204_v49 = vpop.xlane.xlu0 %203  ;;  %v3332_v36 = vrot.slane %v3331_v28, 2  ;;  %v3338_v37 = vmax.f32 %v3336_v12, %v3337_v22  ;;  %v2775_v38 = vadd.f32 %v2774_v33, %v2721_v31  ;;  %4458 = vmatpush3.bf16.msra.mxu1 %v4123_v16  ;;  %v4691_v22 = vld [vmem:[%s5177_s0 + $0x18] ss:$12 sps:$4 sm:$0xff]   ;;  %v2870_v33 = vpop.f32.mrf.mxu0 }
 0x22a   :  { %v205_v40 = vsub.f32 %v4917_v8, %v204_v49  ;;  %v2776_v41 = vpop.f32.mrf.mxu1  ;;  %4459 = vmatprep.subr.bf16.mxu1 %v4228_v27  ;;  %v244_v8 = vld [vmem:[#allocation2 + $0xb8] sm:$0xf]  ;;  %v4689_v27 = vld [vmem:[%s5177_s0] ss:$12 sps:$4 sm:$0xff]  }
 0x22b   :  { %v3339_v45 = vrot.slane %v3338_v37, 2  ;;  %v3434_v47 = vmax.f32 %v2771_v30, %v2775_v38  ;;  %v2777_v50 = vadd.f32 %v2776_v41, %v2723_v34  ;;  %v3333_v56 = vmax.f32 %v3331_v28, %v3332_v36  ;;  %v4690_v28 = vld [vmem:[%s5177_s0 + $0x1c] ss:$12 sps:$4 sm:$0xff]   ;;  %v2872_v34 = vpop.f32.mrf.mxu0 }
 0x22c   :  { %v206_v53 = vmul.f32 1.442695, %v205_v40  ;;  %v4078_v4 = vcombine.low %v244_v8, %v252_v62  ;;  %v4721_v30 = vmov 2  }
 0x22d   :  { %v3435_v59 = vrot.slane %v3434_v47, 4  ;;  %v3441_v46 = vmax.f32 %v2773_v54, %v2777_v50  ;;  %4460 = vmatpush3.bf16.msra.mxu1 %v4108_v35  ;;  %v3340_v63 = vmax.f32 %v3338_v37, %v3339_v45  ;;  %v3334_v24 = vrot.slane %v3333_v56, 1  ;;  %4658 = vset.pattern.permute.xlu0 %v4721_v30  ;;  %v2876_v49 = vpop.f32.mrf.mxu0  ;;  %v3610_v30 = vld [vmem:[#allocation2 + $0x7fc] sm:$0xf] }
 0x22e   :  { %4670 = vpow2.f32 %v206_v53  ;;  %4461 = vmatprep.subr.bf16.mxu1 %v4213_v42 }
 0x22f   :  { %v3436_v1 = vmax.f32 %v3434_v47, %v3435_v59  ;;  %v3442_v29 = vrot.slane %v3441_v46, 4  ;;  %v3341_v7 = vrot.slane %v3340_v63, 1  ;;  %v3335_v9 = vmax.f32 %v3333_v56, %v3334_v24  ;;  %v2878_v38 = vpop.f32.mrf.mxu0 }
 0x231   :  { %v3437_v2 = vrot.slane %v3436_v1, 2  ;;  %v3443_v3 = vmax.f32 %v3441_v46, %v3442_v29  ;;  %4462 = vmatpush3.bf16.msra.mxu1 %v4093_v25  ;;  %v3342_v31 = vmax.f32 %v3340_v63, %v3341_v7  ;;  %v2880_v47 = vpop.f32.mrf.mxu0 }
 0x232   :  { %4463 = vmatprep.subr.bf16.mxu1 %v4198_v60 }
 0x233   :  { %v3438_v55 = vmax.f32 %v3436_v1, %v3437_v2  ;;  %v3444_v13 = vrot.slane %v3443_v3, 2  ;;  %v2882_v25 = vpop.f32.mrf.mxu0 }
 0x235   :  { %v3439_v11 = vrot.slane %v3438_v55, 1  ;;  %v3445_v14 = vmax.f32 %v3443_v3, %v3444_v13  ;;  %4464 = vmatpush3.bf16.msra.mxu1 %v4078_v4 }
 0x236   :  { %4465 = vmatprep.subr.bf16.mxu1 %v4183_v58 }
 0x237   :  { %v3440_v39 = vmax.f32 %v3438_v55, %v3439_v11  ;;  %v3446_v12 = vrot.slane %v3445_v14, 1 }
 0x239   :  { %v3447_v16 = vmax.f32 %v3445_v14, %v3446_v12  ;;  %4466 = vmatpush3.bf16.msra.mxu1 %v4063_v15  ;;  %v4976_v17 = vsel %vm3511_vm4, %v3335_v9, %v3440_v39 }
 0x23a   :  { %5187 = vst [vmem:[#allocation9_spill] sm:$0xff] %v4976_v17 }
 0x23b   :  { %v4978_v19 = vpop.eup %4670  ;;  %v4981_v20 = vsel %vm3511_vm4, %v3342_v31, %v3447_v16 }
 0x23c   :  { %5188 = vst [vmem:[#allocation10_spill] sm:$0xff] %v4981_v20  ;;  %v208_v26 = vsel %vm201_vm3, %v4978_v19, 0.0  ;;  %3236 = vmatmul.mubr.bf16.vlgmr.msra.gmra.mxu1 %v4689_v27 }
 0x23d   :  { %209 = vadd.xlane.f32.xlu0 %v208_v26  ;;  %3243 = vmatprep.mubr.bf16.mxu1 %v4690_v28 }
 0x244   :  { %3244 = vmatmul.mubr.bf16.gmra.mxu1 %v4691_v22  ;;  %v3609_v22 = vld [vmem:[#allocation2 + $0x7bc] sm:$0xf] }
 0x25c   :  { %v2813_v35 = vpop.f32.mrf.mxu1 }
 0x25d   :  { %v2867_v36 = vadd.f32 %v2866_v32, %v2813_v35  ;;  %v3625_v32 = vld [vmem:[#allocation2 + $0xbbc] sm:$0xf] }
 0x25e   :  { %v2815_v37 = vpop.f32.mrf.mxu1  ;;  %v3594_v35 = vld [vmem:[#allocation2 + $0x3fc] sm:$0xf] }
 0x25f   :  { %v2869_v40 = vadd.f32 %v2868_v18, %v2815_v37  ;;  %v4425_v18 = vcombine.low %v3609_v22, %v3610_v30  ;;  %v3607_v37 = vld [vmem:[#allocation2 + $0x73c] sm:$0xf]  ;;  %v4722_v22 = vmov 1  }
 0x260   :  { %v2817_v54 = vpop.f32.mrf.mxu1  ;;  %v3599_v30 = vld [vmem:[#allocation2 + $0x53c] sm:$0xf] }
 0x261   :  { %v2871_v41 = vadd.f32 %v2870_v33, %v2817_v54  ;;  %v3626_v33 = vld [vmem:[#allocation2 + $0xbfc] sm:$0xf]  ;;  %4489 = vmatprep.subr.bf16.mxu1 %v4425_v18 }
 0x262   :  { %v2819_v42 = vpop.f32.mrf.mxu1  ;;  %v3608_v54 = vld [vmem:[#allocation2 + $0x77c] sm:$0xf] }
 0x263   :  { %v3343_v43 = vmax.f32 %v2867_v36, %v2871_v41  ;;  %v2873_v44 = vadd.f32 %v2872_v34, %v2819_v42  ;;  %v3593_v34 = vld [vmem:[#allocation2 + $0x3bc] sm:$0xf] }
 0x264   :  { %v2823_v45 = vpop.f32.mrf.mxu1  ;;  %v4417_v36 = vcombine.low %v3593_v34, %v3594_v35  ;;  %v3624_v41 = vld [vmem:[#allocation2 + $0xb7c] sm:$0xf] }
 0x265   :  { %v3344_v50 = vrot.slane %v3343_v43, 4  ;;  %v3350_v51 = vmax.f32 %v2869_v40, %v2873_v44  ;;  %v2877_v59 = vadd.f32 %v2876_v49, %v2823_v45  ;;  %v4433_v49 = vcombine.low %v3625_v32, %v3626_v33  ;;  %v3591_v42 = vld [vmem:[#allocation2 + $0x33c] sm:$0xf] }
 0x266   :  { %v2825_v52 = vpop.f32.mrf.mxu1  ;;  %v4424_v40 = vcombine.low %v3607_v37, %v3608_v54  ;;  %4490 = vmatpush3.bf16.msra.mxu1 %v4417_v36  ;;  %v3600_v32 = vld [vmem:[#allocation2 + $0x57c] sm:$0xf]  ;;  %v4723_v33 = vmov 4  }
 0x267   :  { %v3345_v53 = vmax.f32 %v3343_v43, %v3344_v50  ;;  %v3351_v56 = vrot.slane %v3350_v51, 4  ;;  %v2879_v62 = vadd.f32 %v2878_v38, %v2825_v52  ;;  %v3623_v38 = vld [vmem:[#allocation2 + $0xb3c] sm:$0xf]  ;;  %4588 = vmatpush3.bf16.msra.mxu0 %v4433_v49  ;;  %v4420_v49 = vcombine.low %v3599_v30, %v3600_v32 }
 0x268   :  { %v2827_v46 = vpop.f32.mrf.mxu1  ;;  %v3592_v43 = vld [vmem:[#allocation2 + $0x37c] sm:$0xf]  ;;  %v4432_v44 = vcombine.low %v3623_v38, %v3624_v41  ;;  %4589 = vmatprep.subr.bf16.mxu0 %v5181_v0  ;;  %4491 = vmatprep.subr.bf16.mxu1 %v4424_v40 }
 0x269   :  { %v3346_v60 = vrot.slane %v3345_v53, 2  ;;  %v3352_v8 = vmax.f32 %v3350_v51, %v3351_v56  ;;  %v2881_v63 = vadd.f32 %v2880_v47, %v2827_v46  ;;  %v4416_v45 = vcombine.low %v3591_v42, %v3592_v43  ;;  %v3605_v47 = vld [vmem:[#allocation2 + $0x6bc] sm:$0xf] }
 0x26a   :  { %v2829_v1 = vpop.f32.mrf.mxu1  ;;  %v3606_v50 = vld [vmem:[#allocation2 + $0x6fc] sm:$0xf] }
 0x26b   :  { %v3353_v29 = vrot.slane %v3352_v8, 2  ;;  %v3448_v61 = vmax.f32 %v2877_v59, %v2881_v63  ;;  %v2883_v23 = vadd.f32 %v2882_v25, %v2829_v1  ;;  %v3347_v24 = vmax.f32 %v3345_v53, %v3346_v60  ;;  %v3621_v51 = vld [vmem:[#allocation2 + $0xabc] sm:$0xf]  ;;  %4590 = vmatpush3.bf16.msra.mxu0 %v4432_v44  ;;  %4492 = vmatpush3.bf16.msra.mxu1 %v4416_v45 }
 0x26c   :  { %v4423_v52 = vcombine.low %v3605_v47, %v3606_v50  ;;  %v3622_v53 = vld [vmem:[#allocation2 + $0xafc] sm:$0xf]  ;;  %4591 = vmatprep.subr.bf16.mxu0 %v5181_v0  ;;  %v4724_v47 = vmov 3  }
 0x26d   :  { %v3449_v2 = vrot.slane %v3448_v61, 4  ;;  %v3455_v3 = vmax.f32 %v2879_v62, %v2883_v23  ;;  %v3354_v4 = vmax.f32 %v3352_v8, %v3353_v29  ;;  %v3348_v6 = vrot.slane %v3347_v24, 1  ;;  %v3589_v56 = vld [vmem:[#allocation2 + $0x2bc] sm:$0xf] }
 0x26e   :  { %v3590_v59 = vld [vmem:[#allocation2 + $0x2fc] sm:$0xf]  ;;  %v4431_v46 = vcombine.low %v3621_v51, %v3622_v53  ;;  %4493 = vmatprep.subr.bf16.mxu1 %v4423_v52 }
 0x26f   :  { %v3450_v58 = vmax.f32 %v3448_v61, %v3449_v2  ;;  %v3456_v5 = vrot.slane %v3455_v3, 4  ;;  %v3355_v13 = vrot.slane %v3354_v4, 1  ;;  %v3349_v14 = vmax.f32 %v3347_v24, %v3348_v6  ;;  %v3603_v29 = vld [vmem:[#allocation2 + $0x63c] sm:$0xf] }
 0x270   :  { %v4415_v25 = vcombine.low %v3589_v56, %v3590_v59  ;;  %4592 = vmatpush3.bf16.msra.mxu0 %v4431_v46  ;;  %v3604_v61 = vld [vmem:[#allocation2 + $0x67c] sm:$0xf] }
 0x271   :  { %v3451_v7 = vrot.slane %v3450_v58, 2  ;;  %v3457_v55 = vmax.f32 %v3455_v3, %v3456_v5  ;;  %v3356_v39 = vmax.f32 %v3354_v4, %v3355_v13  ;;  %4593 = vmatprep.subr.bf16.mxu0 %v5181_v0  ;;  %v4422_v2 = vcombine.low %v3603_v29, %v3604_v61  ;;  %v3619_v3 = vld [vmem:[#allocation2 + $0xa3c] sm:$0xf] }
 0x272   :  { %4494 = vmatpush3.bf16.msra.mxu1 %v4415_v25  ;;  %v3620_v4 = vld [vmem:[#allocation2 + $0xa7c] sm:$0xf] }
 0x273   :  { %v3452_v9 = vmax.f32 %v3450_v58, %v3451_v7  ;;  %v3458_v11 = vrot.slane %v3457_v55, 2  ;;  %v3587_v58 = vld [vmem:[#allocation2 + $0x23c] sm:$0xf]  ;;  %v4430_v6 = vcombine.low %v3619_v3, %v3620_v4  ;;  %4495 = vmatprep.subr.bf16.mxu1 %v4422_v2 }
 0x274   :  { %v3588_v7 = vld [vmem:[#allocation2 + $0x27c] sm:$0xf] }
 0x275   :  { %v3453_v15 = vrot.slane %v3452_v9, 1  ;;  %v3459_v31 = vmax.f32 %v3457_v55, %v3458_v11  ;;  %v4414_v55 = vcombine.low %v3587_v58, %v3588_v7  ;;  %v3601_v13 = vld [vmem:[#allocation2 + $0x5bc] sm:$0xf]  ;;  %v5018_v11 = vpop.f32.mrf.mxu0  ;;  %4594 = vmatpush3.bf16.msra.mxu0 %v4430_v6 }
 0x276   :  { %4595 = vmatprep.subr.bf16.mxu0 %v5181_v0  ;;  %v3615_v18 = vld [vmem:[#allocation2 + $0x93c] sm:$0xf] }
 0x277   :  { %v3454_v12 = vmax.f32 %v3452_v9, %v3453_v15  ;;  %v3460_v16 = vrot.slane %v3459_v31, 1  ;;  %v3602_v9 = vld [vmem:[#allocation2 + $0x5fc] sm:$0xf]  ;;  %4496 = vmatpush3.bf16.msra.mxu1 %v4414_v55  ;;  %v5023_v34 = vpop.f32.mrf.mxu0 }
 0x278   :  { %v4421_v15 = vcombine.low %v3601_v13, %v3602_v9  ;;  %v3616_v36 = vld [vmem:[#allocation2 + $0x97c] sm:$0xf] }
 0x279   :  { %v3461_v26 = vmax.f32 %v3459_v31, %v3460_v16  ;;  %v4995_v27 = vsel %vm3511_vm4, %v3349_v14, %v3454_v12  ;;  %v3617_v31 = vld [vmem:[#allocation2 + $0x9bc] sm:$0xf]  ;;  %v4428_v38 = vcombine.low %v3615_v18, %v3616_v36  ;;  %v5029_v44 = vpop.f32.mrf.mxu0 }
 0x27a   :  { %5189 = vst [vmem:[#allocation11_spill] sm:$0xff] %v4995_v27  ;;  %v3586_v16 = vld [vmem:[#allocation2 + $0x1fc] sm:$0xf]  ;;  %4497 = vmatprep.subr.bf16.mxu1 %v4421_v15 }
 0x27b   :  { %v4998_v28 = vsel %vm3511_vm4, %v3356_v39, %v3461_v26  ;;  %v3585_v39 = vld [vmem:[#allocation2 + $0x1bc] sm:$0xf]  ;;  %v2925_v61 = vpop.f32.mrf.mxu0 }
 0x27c   :  { %5190 = vst [vmem:[#allocation12_spill] sm:$0xff] %v4998_v28  ;;  %v5003_v60 = vpop.f32.mrf.mxu1  ;;  %v4413_v26 = vcombine.low %v3585_v39, %v3586_v16  ;;  %v3583_v37 = vld [vmem:[#allocation2 + $0x13c] sm:$0xf] }
 0x27d   :  { %v3584_v54 = vld [vmem:[#allocation2 + $0x17c] sm:$0xf]  ;;  %v2929_v55 = vpop.f32.mrf.mxu0 }
 0x27e   :  { %v5005_v62 = vpop.f32.mrf.mxu1  ;;  %4498 = vmatpush3.bf16.msra.mxu1 %v4413_v26  ;;  %v4412_v40 = vcombine.low %v3583_v37, %v3584_v54  ;;  %v3597_v41 = vld [vmem:[#allocation2 + $0x4bc] sm:$0xf] }
 0x27f   :  { %4499 = vmatprep.subr.bf16.mxu1 %v4420_v49  ;;  %v3598_v42 = vld [vmem:[#allocation2 + $0x4fc] sm:$0xf]  ;;  %v2931_v9 = vpop.f32.mrf.mxu0 }
 0x280   :  { %v5007_v63 = vpop.f32.mrf.mxu1  ;;  %v3613_v43 = vld [vmem:[#allocation2 + $0x8bc] sm:$0xf]  ;;  %v4419_v50 = vcombine.low %v3597_v41, %v3598_v42 }
 0x281   :  { %v3614_v51 = vld [vmem:[#allocation2 + $0x8fc] sm:$0xf] }
 0x282   :  { %v5009_v1 = vpop.f32.mrf.mxu1  ;;  %v3581_v52 = vld [vmem:[#allocation2 + $0xbc] sm:$0xf]  ;;  %4500 = vmatpush3.bf16.msra.mxu1 %v4412_v40  ;;  %v4427_v53 = vcombine.low %v3613_v43, %v3614_v51 }
 0x283   :  { %v3582_v56 = vld [vmem:[#allocation2 + $0xfc] sm:$0xf]  ;;  %4501 = vmatprep.subr.bf16.mxu1 %v4419_v50 }
 0x284   :  { %v5011_v24 = vpop.f32.mrf.mxu1  ;;  %v4411_v46 = vcombine.low %v3581_v52, %v3582_v56  ;;  %v3595_v25 = vld [vmem:[#allocation2 + $0x43c] sm:$0xf] }
 0x285   :  { %v3611_v29 = vld [vmem:[#allocation2 + $0x83c] sm:$0xf]  ;;  %v2983_v17 = vadd.f32 %v5011_v24, %v2929_v55 }
 0x286   :  { %v5020_v14 = vpop.f32.mrf.mxu1  ;;  %v3612_v2 = vld [vmem:[#allocation2 + $0x87c] sm:$0xf]  ;;  %4502 = vmatpush3.bf16.msra.mxu1 %v4411_v46 }
 0x287   :  { %v3579_v3 = vld [vmem:[#allocation2 + $0x3c] sm:$0xf]  ;;  %v4426_v6 = vcombine.low %v3611_v29, %v3612_v2  ;;  %v2985_v57 = vadd.f32 %v5020_v14, %v2931_v9 }
 0x288   :  { %v5025_v35 = vpop.f32.mrf.mxu1  ;;  %v3580_v4 = vld [vmem:[#allocation2 + $0x7c] sm:$0xf] }
 0x289   :  { %v4410_v7 = vcombine.low %v3579_v3, %v3580_v4  ;;  %v2973_v3 = vadd.f32 %v5003_v60, %v5018_v11  ;;  %v2975_v4 = vadd.f32 %v5005_v62, %v5023_v34 }
 0x28a   :  { %v5031_v45 = vpop.f32.mrf.mxu1 }
 0x2bc   :  { %v5034_v59 = vpop.f32.mrf.mxu1 }
 0x2be   :  { %v3027_v58 = vpop.f32.mrf.mxu1 }
 0x2c0   :  { %v3029_v13 = vpop.f32.mrf.mxu1 }
 0x2c2   :  { %v3031_v15 = vpop.f32.mrf.mxu1 }
 0x2c6   :  { %v210_v8 = vpop.xlane.xlu0 %209 }
 0x2c7   :  { %4672 = vrcp.f32 %v210_v8  ;;  %v3596_v8 = vld [vmem:[#allocation2 + $0x47c] sm:$0xf] }
 0x2d4   :  { %v4673_v23 = vpop.eup %4672 }
 0x2d5   :  { %v5014_v5 = vmul.f32 %v4673_v23, %v4978_v19  ;;  %v3618_v19 = vld [vmem:[#allocation2 + $0x9fc] sm:$0xf]  ;;  %v4418_v23 = vcombine.low %v3595_v25, %v3596_v8 }
 0x2d6   :  { %v4429_v12 = vcombine.low %v3617_v31, %v3618_v19  ;;  %v2933_v31 = vpop.f32.mrf.mxu0  ;;  %v3035_v19 = vpop.f32.mrf.mxu1 }
 0x2d7   :  { %3546 = vperm.xlu0 %4658, %v5014_v5   ;;  %3529 = vperm.xlu1 %4656, %v5014_v5   ;;  %v2987_v48 = vadd.f32 %v5025_v35, %v2933_v31 }
 0x2d8   :  { %4596 = vmatpush3.bf16.msra.mxu0 %v4429_v12  ;;  %4503 = vmatprep.subr.bf16.mxu1 %v4418_v23  ;;  %v2935_v39 = vpop.f32.mrf.mxu0  ;;  %v3037_v16 = vpop.f32.mrf.mxu1 }
 0x2d9   :  { %4597 = vmatprep.subr.bf16.mxu0 %v5181_v0  ;;  %4504 = vmatpush3.bf16.msra.mxu1 %v4410_v7  ;;  %v2979_v7 = vadd.f32 %v5009_v1, %v2925_v61  ;;  %v2989_v60 = vadd.f32 %v5031_v45, %v2935_v39  ;;  %v3462_v14 = vmax.f32 %v2983_v17, %v2987_v48 }
 0x2da   :  { %4607 = vmatprep.subr.mxu1 %v5181_v0  ;;  %v3078_v12 = vpop.f32.mrf.mxu0 }
 0x2db   :  { %4657 = vset.pattern.permute.xlu1 %v4722_v22  ;;  %4661 = vset.pattern.permute.xlu0 %v4723_v33  ;;  %v3364_v20 = vmax.f32 %v2975_v4, %v2979_v7  ;;  %v3079_v62 = vadd.f32 %v3078_v12, %v5034_v59  ;;  %v3469_v9 = vmax.f32 %v2985_v57, %v2989_v60 }
 0x2dc   :  { %3536 = vperm.xlu1 %4657, %v5014_v5   ;;  %4598 = vmatpush3.bf16.msra.mxu0 %v4428_v38  ;;  %v3080_v26 = vpop.f32.mrf.mxu0 }
 0x2dd   :  { %4599 = vmatprep.subr.bf16.mxu0 %v5181_v0  ;;  %v3081_v34 = vadd.f32 %v3080_v26, %v3027_v58  ;;  %v3365_v55 = vrot.slane %v3364_v20, 4 }
 0x2de   :  { %v3082_v22 = vpop.f32.mrf.mxu0 }
 0x2df   :  { %v3366_v58 = vmax.f32 %v3364_v20, %v3365_v55 }
 0x2e0   :  { %4659 = vset.pattern.permute.xlu1 %v4724_v47  ;;  %4600 = vmatpush3.bf16.msra.mxu0 %v4427_v53  ;;  %v3084_v18 = vpop.f32.mrf.mxu0 }
 0x2e1   :  { %3556 = vperm.xlu1 %4659, %v5014_v5   ;;  %4601 = vmatprep.subr.bf16.mxu0 %v5181_v0 }
 0x2e2   :  { %v3088_v49 = vpop.f32.mrf.mxu0 }
 0x2e3   :  { %v3089_v1 = vadd.f32 %v3088_v49, %v3035_v19 }
 0x2e4   :  { %4602 = vmatpush3.bf16.msra.mxu0 %v4426_v6  ;;  %v3090_v37 = vpop.f32.mrf.mxu0  ;;  %v2977_v6 = vadd.f32 %v5007_v63, %v5029_v44  ;;  %v3083_v63 = vadd.f32 %v3082_v22, %v3029_v13  ;;  %v3085_v44 = vadd.f32 %v3084_v18, %v3031_v15  ;;  %v3463_v13 = vrot.slane %v3462_v14, 4 }
 0x2e5   :  { %4660 = vset.pattern.permute.xlu1 %v4723_v33  ;;  %v3091_v61 = vadd.f32 %v3090_v37, %v3037_v16  ;;  %v3470_v15 = vrot.slane %v3469_v9, 4 }
 0x2e6   :  { %3566 = vperm.xlu1 %4660, %v5014_v5   ;;  %v3039_v5 = vpop.f32.mrf.mxu1  ;;  %v3092_v38 = vpop.f32.mrf.mxu0  ;;  %v3357_v27 = vmax.f32 %v2973_v3, %v2977_v6  ;;  %v3371_v35 = vmax.f32 %v3079_v62, %v3083_v63  ;;  %v3378_v31 = vmax.f32 %v3081_v34, %v3085_v44 }
 0x2e7   :  { %v3093_v10 = vadd.f32 %v3092_v38, %v3039_v5 }
 0x2e8   :  { %v3041_v30 = vpop.f32.mrf.mxu1  ;;  %v3094_v41 = vpop.f32.mrf.mxu0  ;;  %v3358_v24 = vrot.slane %v3357_v27, 4  ;;  %v3372_v19 = vrot.slane %v3371_v35, 4  ;;  %v3379_v12 = vrot.slane %v3378_v31, 4 }
 0x2e9   :  { %v3095_v3 = vadd.f32 %v3094_v41, %v3041_v30  ;;  %v3476_v45 = vmax.f32 %v3089_v1, %v3093_v10 }
 0x2ea   :  { %v5040_v32 = vpop.f32.mrf.mxu1  ;;  %v3131_v42 = vpop.f32.mrf.mxu0  ;;  %v3359_v59 = vmax.f32 %v3357_v27, %v3358_v24 }
 0x2eb   :  { %v3483_v39 = vmax.f32 %v3091_v61, %v3095_v3  ;;  %v3477_v16 = vrot.slane %v3476_v45, 4  ;;  %v3185_v48 = vadd.f32 %v5040_v32, %v3131_v42 }
 0x2ec   :  { %v5042_v33 = vpop.f32.mrf.mxu1  ;;  %v3133_v47 = vpop.f32.mrf.mxu0 }
 0x2ed   :  { %v3484_v26 = vrot.slane %v3483_v39, 4  ;;  %v3187_v57 = vadd.f32 %v5042_v33, %v3133_v47 }
 0x2ee   :  { %v5044_v36 = vpop.f32.mrf.mxu1  ;;  %v3135_v51 = vpop.f32.mrf.mxu0 }
 0x2ef   :  { %v3189_v10 = vadd.f32 %v5044_v36, %v3135_v51  ;;  %v3380_v36 = vmax.f32 %v3378_v31, %v3379_v12  ;;  %v3485_v51 = vmax.f32 %v3483_v39, %v3484_v26 }
 0x2f0   :  { %v5046_v54 = vpop.f32.mrf.mxu1  ;;  %v3137_v56 = vpop.f32.mrf.mxu0 }
 0x2f1   :  { %v3191_v17 = vadd.f32 %v5046_v54, %v3137_v56  ;;  %v3385_v54 = vmax.f32 %v3185_v48, %v3189_v10  ;;  %v3381_v62 = vrot.slane %v3380_v36, 2  ;;  %v3486_v34 = vrot.slane %v3485_v51, 2 }
 0x2f2   :  { %v5048_v40 = vpop.f32.mrf.mxu1  ;;  %v3141_v25 = vpop.f32.mrf.mxu0 }
 0x2f3   :  { %v3195_v20 = vadd.f32 %v5048_v40, %v3141_v25  ;;  %v3392_v56 = vmax.f32 %v3187_v57, %v3191_v17  ;;  %v3360_v25 = vrot.slane %v3359_v59, 2 }
 0x2f4   :  { %v5050_v43 = vpop.f32.mrf.mxu1  ;;  %v3143_v29 = vpop.f32.mrf.mxu0 }
 0x2f5   :  { %v3197_v49 = vadd.f32 %v5050_v43, %v3143_v29  ;;  %v3367_v43 = vrot.slane %v3366_v58, 2  ;;  %v3393_v63 = vrot.slane %v3392_v56, 4  ;;  %v3361_v1 = vmax.f32 %v3359_v59, %v3360_v25 }
 0x2f6   :  { %v5052_v50 = vpop.f32.mrf.mxu1  ;;  %v3145_v2 = vpop.f32.mrf.mxu0 }
 0x2f7   :  { %v3199_v37 = vadd.f32 %v5052_v50, %v3145_v2  ;;  %v3368_v61 = vmax.f32 %v3366_v58, %v3367_v43 }
 0x2f8   :  { %v5054_v52 = vpop.f32.mrf.mxu1  ;;  %v3147_v28 = vpop.f32.mrf.mxu0 }
 0x2f9   :  { %5191 = vst [vmem:[#allocation13_spill] sm:$0xff] %v5054_v52 }
 0x2fa   :  { %v4585_v21 = vpop.f32.mrf.mxu0 }
 0x2fc   :  { %v4467_v53 = vpop.f32.mrf.mxu1  ;;  %v3286_v6 = vpop.f32.mrf.mxu0 }
 0x2fe   :  { %v4468_v46 = vpop.f32.mrf.mxu1  ;;  %v4586_v52 = vpop.f32.mrf.mxu0 }
 0x2ff   :  { %v4469_v5 = vadd.f32 %v4468_v46, %v4467_v53  ;;  %v3464_v53 = vmax.f32 %v3462_v14, %v3463_v13  ;;  %v3373_v46 = vmax.f32 %v3371_v35, %v3372_v19  ;;  %v3487_v35 = vmax.f32 %v3485_v51, %v3486_v34  ;;  %v5195_v34 = vld [vmem:[#allocation7_spill] sm:$0xff] }
 0x300   :  { %v4470_v8 = vpop.f32.mrf.mxu1  ;;  %v3289_v27 = vpop.f32.mrf.mxu0  ;;  %v5192_v38 = vld [vmem:[#allocation13_spill] sm:$0xff]  ;;  %v3362_v13 = vrot.slane %v3361_v1, 1 }
 0x301   :  { %v3201_v41 = vadd.f32 %v5192_v38, %v3147_v28  ;;  %v3287_v42 = vadd.f32 %v4469_v5, %v3286_v6  ;;  %v3465_v29 = vrot.slane %v3464_v53, 2  ;;  %v3374_v2 = vrot.slane %v3373_v46, 2 }
 0x302   :  { %v4471_v23 = vpop.f32.mrf.mxu1  ;;  %v3363_v10 = vmax.f32 %v3361_v1, %v3362_v13 }
 0x303   :  { %v4472_v22 = vadd.f32 %v4471_v23, %v4470_v8  ;;  %v3478_v8 = vmax.f32 %v3476_v45, %v3477_v16  ;;  %v3490_v23 = vmax.f32 %v3195_v20, %v3199_v37  ;;  %v3497_v40 = vmax.f32 %v3197_v49, %v3201_v41 }
 0x304   :  { %v4473_v0 = vpop.f32.mrf.mxu1  ;;  %v3466_v3 = vmax.f32 %v3464_v53, %v3465_v29  ;;  %v3375_v6 = vmax.f32 %v3373_v46, %v3374_v2  ;;  %v3394_v45 = vmax.f32 %v3392_v56, %v3393_v63  ;;  %v5193_v2 = vld [vmem:[#allocation5_spill] sm:$0xff]  ;;  %v5196_v63 = vld [vmem:[#allocation8_spill] sm:$0xff] }
 0x305   :  { %v3290_v47 = vadd.f32 %v4472_v22, %v3289_v27  ;;  %v3479_v28 = vrot.slane %v3478_v8, 2  ;;  %v3498_v44 = vrot.slane %v3497_v40, 4  ;;  %v3488_v22 = vrot.slane %v3487_v35, 1 }
 0x306   :  { %v4474_v11 = vpop.f32.mrf.mxu1  ;;  %v3467_v19 = vrot.slane %v3466_v3, 1  ;;  %v3376_v16 = vrot.slane %v3375_v6, 1 }
 0x307   :  { %v4475_v30 = vadd.f32 %v4474_v11, %v4473_v0  ;;  %v3471_v0 = vmax.f32 %v3469_v9, %v3470_v15  ;;  %v3399_v11 = vmax.f32 %v3287_v42, %v3290_v47  ;;  %v3480_v24 = vmax.f32 %v3478_v8, %v3479_v28 }
 0x308   :  { %v4476_v4 = vpop.f32.mrf.mxu1  ;;  %v3382_v9 = vmax.f32 %v3380_v36, %v3381_v62  ;;  %v3369_v15 = vrot.slane %v3368_v61, 1  ;;  %v3468_v27 = vmax.f32 %v3466_v3, %v3467_v19  ;;  %v3377_v49 = vmax.f32 %v3375_v6, %v3376_v16 }
 0x309   :  { %v3295_v32 = vadd.f32 %v4585_v21, %v4475_v30  ;;  %v3472_v50 = vrot.slane %v3471_v0, 2  ;;  %v3386_v21 = vrot.slane %v3385_v54, 4  ;;  %v3400_v14 = vrot.slane %v3399_v11, 4 }
 0x30a   :  { %v4477_v7 = vpop.f32.mrf.mxu1  ;;  %v3481_v26 = vrot.slane %v3480_v24, 1  ;;  %v3383_v5 = vrot.slane %v3382_v9, 1  ;;  %v3370_v17 = vmax.f32 %v3368_v61, %v3369_v15  ;;  %v3520_v47 = vsel %vm3511_vm4, %v3363_v10, %v3468_v27  ;;  %v5198_v61 = vld [vmem:[#allocation10_spill] sm:$0xff] }
 0x30b   :  { %v4478_v18 = vadd.f32 %v4477_v7, %v4476_v4  ;;  %v3473_v4 = vmax.f32 %v3471_v0, %v3472_v50  ;;  %v3387_v31 = vmax.f32 %v3385_v54, %v3386_v21  ;;  %v3499_v7 = vmax.f32 %v3497_v40, %v3498_v44  ;;  %v5197_v44 = vld [vmem:[#allocation9_spill] sm:$0xff] }
 0x30c   :  { %v3401_v58 = vmax.f32 %v3399_v11, %v3400_v14  ;;  %v3482_v37 = vmax.f32 %v3480_v24, %v3481_v26  ;;  %v3384_v53 = vmax.f32 %v3382_v9, %v3383_v5  ;;  %v3489_v0 = vmax.f32 %v3487_v35, %v3488_v22  ;;  %v5199_v24 = vld [vmem:[#allocation11_spill] sm:$0xff]  ;;  %v5200_v9 = vld [vmem:[#allocation12_spill] sm:$0xff] }
 0x30d   :  { %v3298_v33 = vadd.f32 %v4586_v52, %v4478_v18  ;;  %v3491_v52 = vrot.slane %v3490_v23, 4  ;;  %v3474_v12 = vrot.slane %v3473_v4, 1  ;;  %v3388_v30 = vrot.slane %v3387_v31, 2 }
 0x30e   :  { %v3395_v18 = vrot.slane %v3394_v45, 2  ;;  %v3500_v57 = vrot.slane %v3499_v7, 2  ;;  %v3402_v41 = vrot.slane %v3401_v58, 2  ;;  %v3522_v56 = vsel %vm3511_vm4, %v3377_v49, %v3482_v37 }
 0x30f   :  { %v3504_v60 = vmax.f32 %v3295_v32, %v3298_v33  ;;  %v3492_v39 = vmax.f32 %v3490_v23, %v3491_v52  ;;  %v3475_v20 = vmax.f32 %v3473_v4, %v3474_v12  ;;  %v3389_v46 = vmax.f32 %v3387_v31, %v3388_v30 }
 0x310   :  { %v3396_v8 = vmax.f32 %v3394_v45, %v3395_v18  ;;  %v3501_v33 = vmax.f32 %v3499_v7, %v3500_v57  ;;  %v3403_v51 = vmax.f32 %v3401_v58, %v3402_v41  ;;  %v3523_v43 = vsel %vm3511_vm4, %v3384_v53, %v3489_v0 }
 0x311   :  { %v3505_v55 = vrot.slane %v3504_v60, 4  ;;  %v3493_v48 = vrot.slane %v3492_v39, 2  ;;  %v3521_v54 = vsel %vm3511_vm4, %v3370_v17, %v3475_v20  ;;  %v3390_v23 = vrot.slane %v3389_v46, 1 }
 0x312   :  { %v3397_v40 = vrot.slane %v3396_v8, 1  ;;  %v3502_v50 = vrot.slane %v3501_v33, 1  ;;  %v3404_v6 = vrot.slane %v3403_v51, 1  ;;  %v4005_v14 = vlaneseq }
 0x313   :  { %v3506_v59 = vmax.f32 %v3504_v60, %v3505_v55  ;;  %v3494_v42 = vmax.f32 %v3492_v39, %v3493_v48  ;;  %v5194_v60 = vld [vmem:[#allocation6_spill] sm:$0xff]  ;;  %v3391_v7 = vmax.f32 %v3389_v46, %v3390_v23  ;;  %v4725_v19 = vmov 1983009808  }
 0x314   :  { %v3398_v13 = vmax.f32 %v3396_v8, %v3397_v40  ;;  %v4003_v12 = vunpack.c.l.s4 %v4725_v19  ;;  %v3503_v16 = vmax.f32 %v3501_v33, %v3502_v50  ;;  %v3405_v30 = vmax.f32 %v3403_v51, %v3404_v6  ;;  %v3871_v40 = vld [vmem:[%s5179_s2 + $0xf8] sm:$0xff]  ;;  %v3856_v6 = vld [vmem:[%s5179_s2 + $0x80] sm:$0xff] }
 0x315   :  { %v3507_v38 = vrot.slane %v3506_v59, 2  ;;  %v3495_v29 = vrot.slane %v3494_v42, 1  ;;  %v4006_v27 = vshrl.u32 %v4005_v14, 7 }
 0x316   :  { %v4004_v17 = vunpack.c.0.s8 %v4003_v12  ;;  %v3525_v41 = vsel %vm3511_vm4, %v3398_v13, %v3503_v16  ;;  %v4434_v16 = vld [vmem:[%s5179_s2 + $0x100] ss:$0 sm:$0xff] }
 0x317   :  { %v3508_v36 = vmax.f32 %v3506_v59, %v3507_v38  ;;  %v3496_v15 = vmax.f32 %v3494_v42, %v3495_v29  ;;  %v3870_v29 = vld [vmem:[%s5179_s2 + $0xf0] sm:$0xff] }
 0x318   :  { %v4007_v42 = vsub.s32 %v4004_v17, %v4006_v27 }
 0x319   :  { %v3509_v4 = vrot.slane %v3508_v36, 1  ;;  %v3524_v20 = vsel %vm3511_vm4, %v3391_v7, %v3496_v15 }
 0x31b   :  { %v3510_v22 = vmax.f32 %v3508_v36, %v3509_v4  ;;  %v3857_v4 = vld [vmem:[%s5179_s2 + $0x88] sm:$0xff] }
 0x31d   :  { %v3526_v53 = vsel %vm3511_vm4, %v3405_v30, %v3510_v22 }
 0x352   :  { %v3530_v32 = vpop.permute.xlu1 %3529  ;;  %v3547_v25 = vpop.permute.xlu0 %3546 }
 0x353   :  { %v3532_v28 = vmul.f32 %v3530_v32, %v5193_v2  ;;  %v3533_v11 = vmul.f32 %v3530_v32, %v5194_v60  ;;  %v3534_v21 = vmul.f32 %v3530_v32, %v5195_v34  ;;  %v3549_v55 = vmul.f32 %v3547_v25, %v5199_v24  ;;  %v3868_v60 = vld [vmem:[%s5179_s2 + $0xe0] sm:$0xff]  ;;  %v3865_v34 = vld [vmem:[%s5179_s2 + $0xc8] sm:$0xff] }
 0x354   :  { %v3550_v35 = vmul.f32 %v3547_v25, %v5200_v9  ;;  %v3551_v26 = vmul.f32 %v3547_v25, %v3520_v47  ;;  %v5201_v2 = vmov 0.0   ;;  %v4409_v9 = vld [vmem:[%s5179_s2 + $0x78] ss:$0 sm:$0xff] }
 0x357   :  { %v3537_v62 = vpop.permute.xlu1 %3536 }
 0x358   :  { %v3539_v52 = vmul.f32 %v3537_v62, %v5196_v63  ;;  %v3540_v1 = vmul.f32 %v3537_v62, %v5197_v44  ;;  %v3541_v3 = vmul.f32 %v3537_v62, %v5198_v61  ;;  %v3866_v62 = vld [vmem:[%s5179_s2 + $0xd0] sm:$0xff]  ;;  %v3863_v63 = vld [vmem:[%s5179_s2 + $0xb8] sm:$0xff]  ;;  %v3861_v44 = vld [vmem:[%s5179_s2 + $0xa8] sm:$0xff] }
 0x359   :  { %v3859_v61 = vld [vmem:[%s5179_s2 + $0x98] sm:$0xff] }
 0x35a   :  { %v3542_v31 = vadd.f32 %v3539_v52, %v3532_v28  ;;  %v3543_v45 = vadd.f32 %v3540_v1, %v3533_v11  ;;  %v3544_v39 = vadd.f32 %v3541_v3, %v3534_v21  ;;  %v3869_v28 = vld [vmem:[%s5179_s2 + $0xe8] sm:$0xff]  ;;  %v3867_v11 = vld [vmem:[%s5179_s2 + $0xd8] sm:$0xff]  ;;  %v3864_v21 = vld [vmem:[%s5179_s2 + $0xc0] sm:$0xff] }
 0x35b   :  { %v3862_v52 = vld [vmem:[%s5179_s2 + $0xb0] sm:$0xff]  ;;  %v3860_v1 = vld [vmem:[%s5179_s2 + $0xa0] sm:$0xff] }
 0x35c   :  { %v3557_v59 = vpop.permute.xlu1 %3556  ;;  %v3552_v58 = vadd.f32 %v3549_v55, %v3542_v31  ;;  %v3553_v5 = vadd.f32 %v3550_v35, %v3543_v45  ;;  %v3554_v57 = vadd.f32 %v3551_v26, %v3544_v39  ;;  %v3858_v3 = vld [vmem:[%s5179_s2 + $0x90] sm:$0xff] }
 0x35d   :  { %v3559_v18 = vmul.f32 %v3557_v59, %v3521_v54  ;;  %v3560_v48 = vmul.f32 %v3557_v59, %v3522_v56  ;;  %v3561_v10 = vmul.f32 %v3557_v59, %v3523_v43  ;;  %v4435_v59 = vld [vmem:[%s5179_s2 + $0x108] ss:$0 sm:$0xff] }
 0x35f   :  { %v3562_v49 = vadd.f32 %v3559_v18, %v3552_v58  ;;  %v3563_v37 = vadd.f32 %v3560_v48, %v3553_v5  ;;  %v3564_v0 = vadd.f32 %v3561_v10, %v3554_v57  ;;  %v4436_v18 = vld [vmem:[%s5179_s2 + $0x110] ss:$0 sm:$0xff] }
 0x361   :  { %v3567_v38 = vpop.permute.xlu1 %3566 }
 0x362   :  { %v3569_v46 = vmul.f32 %v3567_v38, %v3524_v20  ;;  %v3570_v8 = vmul.f32 %v3567_v38, %v3525_v41  ;;  %v3571_v32 = vmul.f32 %v3567_v38, %v3526_v53 }
 0x364   :  { %v3572_v33 = vadd.f32 %v3569_v46, %v3562_v49  ;;  %v3573_v47 = vadd.f32 %v3570_v8, %v3563_v37  ;;  %v3574_v36 = vadd.f32 %v3571_v32, %v3564_v0  ;;  %v4692_v32 = vld [vmem:[%s5179_s2] sm:$0x3] }
 0x366   :  { %v3576_v51 = vpack.c.bf16 %v3572_v33, %v3572_v33  ;;  %v4001_v54 = vcombine.low %v3572_v33, %v3573_v47  ;;  %v3577_v56 = vpack.c.bf16 %v3573_v47, %v3573_v47  ;;  %v3578_v23 = vpack.c.bf16 %v3574_v36, %v3574_v36 }
 0x367   :  { %v4015_v43 = vrot.slane %v3574_v36, %v4007_v42 }
 0x368   :  { %v4008_v25 = vrot.slane %v4001_v54, %v4007_v42  ;;  %3807 = vmatprep.mubr.bf16.mxu1 %v3577_v56  ;;  %4604 = vmatmul.mubr.bf16.vlgmr.msra.gmra.mxu0 %v3578_v23  ;;  %v3977_v42 = vsub.f32 1.0, %v4692_v32 }
 0x369   :  { %3808 = vmatmul.mubr.bf16.vlgmr.msra.gmra.mxu1 %v3576_v51 }
 0x36a   :  { %v4016_v50 = vcombine.low %v4008_v25, %v4015_v43  ;;  %4608 = vmatpush3.msra.mxu1 %v3871_v40  ;;  %4639 = vmatprep.mubr.msk.f32.mxu1 %vm4719_vm0, %v5201_v2 }
 0x36b   :  { %4609 = vmatprep.subr.mxu1 %v5201_v2 }
 0x36c   :  { %4018 = vst [vmem:[%s5180_s3] sm:$0x3f] %v4016_v50  ;;  %4610 = vmatpush3.msra.mxu1 %v3870_v29 }
 0x36d   :  { %4611 = vmatprep.subr.mxu1 %v5201_v2 }
 0x36e   :  { %4612 = vmatpush3.msra.mxu1 %v3869_v28 }
 0x36f   :  { %4613 = vmatprep.subr.mxu1 %v5201_v2 }
 0x370   :  { %4614 = vmatpush3.msra.mxu1 %v3868_v60 }
 0x371   :  { %4615 = vmatprep.subr.mxu1 %v5201_v2 }
 0x372   :  { %4616 = vmatpush3.msra.mxu1 %v3867_v11 }
 0x373   :  { %4617 = vmatprep.subr.mxu1 %v5201_v2 }
 0x374   :  { %4618 = vmatpush3.msra.mxu1 %v3866_v62 }
 0x375   :  { %4619 = vmatprep.subr.mxu1 %v5201_v2 }
 0x376   :  { %4620 = vmatpush3.msra.mxu1 %v3865_v34 }
 0x377   :  { %4621 = vmatprep.subr.mxu1 %v5201_v2 }
 0x378   :  { %4622 = vmatpush3.msra.mxu1 %v3864_v21 }
 0x379   :  { %4623 = vmatprep.subr.mxu1 %v5201_v2 }
 0x37a   :  { %4624 = vmatpush3.msra.mxu1 %v3863_v63 }
 0x37b   :  { %4625 = vmatprep.subr.mxu1 %v5201_v2 }
 0x37c   :  { %4626 = vmatpush3.msra.mxu1 %v3862_v52 }
 0x37d   :  { %4627 = vmatprep.subr.mxu1 %v5201_v2 }
 0x37e   :  { %4628 = vmatpush3.msra.mxu1 %v3861_v44 }
 0x37f   :  { %4629 = vmatprep.subr.mxu1 %v5201_v2 }
 0x380   :  { %4630 = vmatpush3.msra.mxu1 %v3860_v1 }
 0x381   :  { %4631 = vmatprep.subr.mxu1 %v5201_v2 }
 0x382   :  { %4632 = vmatpush3.msra.mxu1 %v3859_v61 }
 0x383   :  { %4633 = vmatprep.subr.mxu1 %v5201_v2 }
 0x384   :  { %4634 = vmatpush3.msra.mxu1 %v3858_v3 }
 0x385   :  { %4635 = vmatprep.subr.mxu1 %v5201_v2 }
 0x386   :  { %4636 = vmatpush3.msra.mxu1 %v3857_v4 }
 0x387   :  { %4637 = vmatprep.subr.mxu1 %v5201_v2 }
 0x388   :  { %4638 = vmatpush3.msra.mxu1 %v3856_v6 }
 0x428   :  { %v3849_v24 = vpop.f32.mrf.mxu0 }
 0x429   :  { %v4505_v55 = vpop.f32.mrf.mxu1 }
 0x42a   :  { %v4605_v14 = vpop.f32.mrf.mxu0 }
 0x42b   :  { %v4506_v35 = vpop.f32.mrf.mxu1 }
 0x42c   :  { %v4507_v31 = vadd.f32 %v4506_v35, %v4505_v55  ;;  %v3852_v45 = vpop.f32.mrf.mxu0 }
 0x42d   :  { %v4508_v39 = vpop.f32.mrf.mxu1 }
 0x42e   :  { %v3810_v7 = vadd.f32 %v4507_v31, %v4409_v9  ;;  %v4606_v13 = vpop.f32.mrf.mxu0 }
 0x42f   :  { %v4509_v15 = vpop.f32.mrf.mxu1 }
 0x430   :  { %v3850_v19 = vadd.f32 %v3849_v24, %v3810_v7 }
 0x432   :  { %v3855_v12 = vmax.f32 %v3850_v19, 0.0 }
 0x434   :  { %4640 = vmatmul.mubr.f32.vlgmr.msra.gmra.mxu1 %v3855_v12 }
 0x4f4   :  { %v3943_v26 = vpop.f32.mrf.mxu1 }
 0x4f5   :  { %v3944_v58 = vadd.f32 %v4434_v16, %v3943_v26 }
 0x4f6   :  { %v4641_v5 = vpop.f32.mrf.mxu1 }
 0x4f7   :  { %v3953_v22 = vmul.f32 %v4435_v59, %v3944_v58 }
 0x4f9   :  { %v3955_v30 = vsel %vm3954_vm5, %v3953_v22, 0.0 }
 0x4fa   :  { %3956 = vadd.xlane.f32.xlu1 %v3955_v30 }
 0x583   :  { %v3957_v48 = vpop.xlane.xlu1 %3956 }
 0x584   :  { %v3962_v57 = vadd.f32 %v4436_v18, %v3957_v48 }
 0x586   :  { %v3963_v10 = vsub.f32 0.0, %v3962_v57 }
 0x588   :  { %v3964_v17 = vmul.f32 1.442695, %v3963_v10 }
 0x58a   :  { %4674 = vpow2.f32 %v3964_v17 }
 0x597   :  { %v4675_v27 = vpop.eup %4674 }
 0x598   :  { %v3966_v20 = vadd.f32 1.0, %v4675_v27 }
 0x59a   :  { %4676 = vrcp.f32 %v3966_v20 }
 0x5a7   :  { %v4677_v49 = vpop.eup %4676 }
 0x5a8   :  { %v3969_v37 = vadd.f32 1e-12, %v4677_v49  ;;  %v3978_v38 = vsub.f32 1.0, %v4677_v49 }
 0x5aa   :  { %4678 = vlog2.f32 %v3969_v37  ;;  %v3979_v41 = vadd.f32 1e-12, %v3978_v38 }
 0x5ac   :  { %4680 = vlog2.f32 %v3979_v41 }
 0x5b7   :  { %v4679_v53 = vpop.eup %4678 }
 0x5b8   :  { %v3971_v0 = vmul.f32 0.6931472, %v4679_v53 }
 0x5b9   :  { %v4681_v46 = vpop.eup %4680 }
 0x5ba   :  { %3973 = vrot.lane.b32.xlu0 %v3971_v0, %s4726_s9  ;;  %v3981_v8 = vmul.f32 0.6931472, %v4681_v46 }
 0x5bc   :  { %3983 = vrot.lane.b32.xlu1 %v3981_v8, %s4726_s9 }
 0x5be   :  { %4020 = vrot.lane.b32.xlu0 %v4677_v49, %s4727_s10 }
 0x62c   :  { %v3974_v33 = vpop.permute.xlu0 %3973 }
 0x62d   :  { %v3976_v36 = vmul.f32 %v4692_v32, %v3974_v33 }
 0x62e   :  { %v3984_v47 = vpop.permute.xlu1 %3983 }
 0x62f   :  { %v3986_v51 = vmul.f32 %v3984_v47, %v3977_v42 }
 0x630   :  { %v4021_v60 = vpop.permute.xlu0 %4020 }
 0x631   :  { %v3987_v54 = vadd.f32 %v3986_v51, %v3976_v36  ;;  %v4028_v11 = vsel %vm4027_vm7, %v3944_v58, %v4021_v60 }
 0x633   :  { %v3988_v56 = vsub.f32 0.0, %v3987_v54 }
 0x635   :  { %v3990_v23 = vsel %vm3989_vm6, %v3988_v56, 0.0 }
 0x636   :  { %v3991_v40 = vrot.slane %v3990_v23, 4 }
 0x638   :  { %v3992_v25 = vadd.f32 %v3991_v40, %v3990_v23 }
 0x63a   :  { %v3993_v43 = vrot.slane %v3992_v25, 2 }
 0x63c   :  { %v3994_v29 = vadd.f32 %v3993_v43, %v3992_v25 }
 0x63e   :  { %v3995_v50 = vrot.slane %v3994_v29, 1 }
 0x640   :  { %v3996_v2 = vadd.f32 %v3995_v50, %v3994_v29 }
 0x642   :  { %v3997_v28 = vmul.f32 0.5, %v3996_v2 }
 0x644   :  { %4024 = vrot.lane.b32.xlu0 %v3997_v28, %s4728_s13 }
 0x6b6   :  { %v4025_v62 = vpop.permute.xlu0 %4024 }
 0x6b7   :  { %v4030_v34 = vsel %vm4029_vm8, %v4028_v11, %v4025_v62 }
 0x6b8   :  { %v4032_v21 = vsel %vm4031_vm9, %v4030_v34, 0.0 }
 0x6b9   :  { %4033 = vst [vmem:[%s5180_s3 + $0x6] sm:$0x3] %v4032_v21 }
 0x6ba   :  { %4038 = vsyncpa [#allocation3], 1 }

</bundles_post_ra>
